<compile_context>
chip_gen: v6e
topology: v6e:2x2x1
jax: 0.10.0
libtpu: 0.0.40
codegen_flags: <defaults>
</compile_context>

<pallas_src>
import math
import functools

import jax
import jax.numpy as jnp
from jax.experimental import pallas as pl
from jax.experimental.pallas import tpu as pltpu

LN_EPS = 1e-5  # torch.nn.LayerNorm default


# ----------------------------- in-kernel math ------------------------------
def _erf(x):
    # Abramowitz & Stegun 7.1.26 (abs err < 1.5e-7). lax.erf is avoided because
    # its Mosaic lowering is not guaranteed; exp() goes to the EUP regardless.
    a1, a2, a3, a4, a5 = 0.254829592, -0.284496736, 1.421413741, -1.453152027, 1.061405429
    p = 0.3275911
    s = jnp.where(x >= 0.0, 1.0, -1.0)
    ax = jnp.abs(x)
    t = 1.0 / (1.0 + p * ax)
    poly = ((((a5 * t + a4) * t + a3) * t + a2) * t + a1) * t
    return s * (1.0 - poly * jnp.exp(-ax * ax))


def _gelu(x):
    # exact (erf-based) GELU, matching torch.nn.GELU() default
    return 0.5 * x * (1.0 + _erf(x * 0.7071067811865476))


def _softplus(x):
    # numerically-stable log(1 + exp(x)), matches F.softplus
    return jnp.maximum(x, 0.0) + jnp.log(1.0 + jnp.exp(-jnp.abs(x)))


def _layernorm(x, gamma, beta):
    mean = jnp.mean(x, axis=-1, keepdims=True)
    var = jnp.mean((x - mean) ** 2, axis=-1, keepdims=True)
    return (x - mean) * jax.lax.rsqrt(var + LN_EPS) * gamma + beta


def _softmax(x, axis):
    m = jnp.max(x, axis=axis, keepdims=True)
    e = jnp.exp(x - m)
    # EUP reciprocal instead of a VALU divide (review item).
    return e * pl.reciprocal(jnp.sum(e, axis=axis, keepdims=True), approx=True)


# ------------------------------- fused kernel -------------------------------
def fused_kernel(x_ref, we_ref, be_ref, g0_ref, b0_ref, pe_ref, alpha_ref,
                 wqkv_ref, bqkv_ref, wo_ref, bo_ref, ln1g_ref, ln1b_ref,
                 w1_ref, bf1_ref, w2_ref, bf2_ref, ln2g_ref, ln2b_ref,
                 wpool_ref, bpool_ref, whead_ref, bhead_ref,
                 wheads_ref, bheads_ref, out_ref, h_ref,
                 *, num_heads, batch, seq):
    """Grid step = one transformer block; step 0 also embeds, last step pools."""
    step = pl.program_id(0)
    num_layers = pl.num_programs(0)
    B, T = batch, seq
    D = we_ref.shape[1]
    hd = D // num_heads
    scale = 1.0 / math.sqrt(hd)

    # ---- embedding: Linear -> LayerNorm -> dropout(identity) -> + alpha*pe ----
    @pl.when(step == 0)
    def _embed():
        h = jnp.dot(x_ref[...], we_ref[...],
                    preferred_element_type=jnp.float32) + be_ref[...]
        h = _layernorm(h, g0_ref[...], b0_ref[...])
        # pe is pre-tiled to (B*T, D) in the wrapper; alpha is an SMEM scalar.
        h_ref[...] = h + alpha_ref[0, 0] * pe_ref[...]

    # ---- transformer block `step` (weights streamed for this layer only) ----
    hf = h_ref[...]                                                    # (B*T, D)
    qkv = jnp.dot(hf, wqkv_ref[...],
                  preferred_element_type=jnp.float32) + bqkv_ref[...]  # (B*T, 3D)

    # Per-head loop kept on purpose (see header): batched over B with 3-D
    # einsums; head slices are static lane slices of the packed [q|k|v] output.
    ctx_heads = []
    for hi in range(num_heads):
        qh = qkv[:, hi * hd:(hi + 1) * hd].reshape(B, T, hd) * scale
        kh = qkv[:, D + hi * hd:D + (hi + 1) * hd].reshape(B, T, hd)
        vh = qkv[:, 2 * D + hi * hd:2 * D + (hi + 1) * hd].reshape(B, T, hd)
        s = jnp.einsum('btd,bsd->bts', qh, kh,
                       preferred_element_type=jnp.float32)            # (B, T, T)
        p = _softmax(s, axis=-1)
        ctx_heads.append(jnp.einsum('bts,bsd->btd', p, vh,
                                    preferred_element_type=jnp.float32))
    ctx = jnp.concatenate(ctx_heads, axis=-1).reshape(B * T, D)
    attn = jnp.dot(ctx, wo_ref[...], preferred_element_type=jnp.float32) + bo_ref[...]

    x1 = _layernorm(hf + attn, ln1g_ref[...], ln1b_ref[...])
    hid = _gelu(jnp.dot(x1, w1_ref[...], preferred_element_type=jnp.float32) + bf1_ref[...])
    ffn = jnp.dot(hid, w2_ref[...], preferred_element_type=jnp.float32) + bf2_ref[...]
    h_new = _layernorm(x1 + ffn, ln2g_ref[...], ln2b_ref[...])
    h_ref[...] = h_new

    # ---- pooling + head MLP + merged output heads (last step only) ----
    @pl.when(step == num_layers - 1)
    def _finish():
        h3 = h_new.reshape(B, T, D)
        # attention-bottleneck pool: D->1 projection on the VPU (mul + lane sum)
        s = jnp.sum(h3 * wpool_ref[...], axis=-1, keepdims=True) + bpool_ref[0, 0]  # (B,T,1)
        w = _softmax(s, axis=1)                     # softmax over sequence (dim=1)
        xb = jnp.sum(h3 * w, axis=1)                # (B, D)

        hh = _gelu(jnp.dot(xb, whead_ref[...], preferred_element_type=jnp.float32)
                   + bhead_ref[...])                # (B, HD)
        raw = jnp.dot(hh, wheads_ref[...],
                      preferred_element_type=jnp.float32) + bheads_ref[...]          # (B, 8)

        # columns: [logits | mu, v, a, b | xi, sigma | precursor]
        sp = _softplus(raw)
        col = jax.lax.broadcasted_iota(jnp.int32, raw.shape, 1)
        out = jnp.where((col == 0) | (col == 1) | (col == 7), raw,
              jnp.where(col == 3, 1.0 + sp,
              jnp.where(col == 5, 1.5 * jnp.tanh(raw) - 0.5,
              jnp.where(col == 6, sp + 0.001, sp))))
        out_ref[...] = out


# ------------------------------ pallas_call wrapper --------------------------
def retplus_forward(x, params, num_heads):
    B, T, F = x.shape
    L, D = params["wqkv_t"].shape[0], params["wqkv_t"].shape[1]
    FF = params["w1_t"].shape[2]
    HD = params["whead_t"].shape[1]

    xf = x.reshape(B * T, F)                         # pre-flattened tokens
    pe_flat = jnp.tile(params["pe"], (B, 1))         # (B*T, D): pe broadcast over batch

    def full(shape):
        # whole-array block, fetched once (constant block index across the grid)
        return pl.BlockSpec(shape, lambda *_: (0,) * len(shape))

    def per_layer(shape):
        # stacked per-layer weights: squeeze the L axis, stream layer `l`
        return pl.BlockSpec((None,) + shape, lambda l: (l,) + (0,) * len(shape))

    def smem_scalar():
        return pl.BlockSpec(memory_space=pltpu.MemorySpace.SMEM)

    grid_spec = pltpu.PrefetchScalarGridSpec(
        num_scalar_prefetch=0,
        grid=(L,),
        in_specs=[
            full((B * T, F)),                 # x (flattened)
            full((F, D)), full((1, D)),       # embedding W^T, b
            full((1, D)), full((1, D)),       # embedding LayerNorm gamma, beta
            full((B * T, D)),                 # positional encoding (pre-tiled)
            smem_scalar(),                    # alpha
            per_layer((D, 3 * D)), per_layer((1, 3 * D)),   # in_proj (q|k|v)
            per_layer((D, D)), per_layer((1, D)),           # out_proj
            per_layer((1, D)), per_layer((1, D)),           # norm1
            per_layer((D, FF)), per_layer((1, FF)),         # ffn lin1
            per_layer((FF, D)), per_layer((1, D)),          # ffn lin2
            per_layer((1, D)), per_layer((1, D)),           # norm2
            full((1, D)), smem_scalar(),      # att_pool weight row, bias scalar
            full((D, HD)), full((1, HD)),     # head MLP
            full((HD, 8)), full((1, 8)),      # merged output heads
        ],
        out_specs=pl.BlockSpec((B, 8), lambda l: (0, 0)),
        scratch_shapes=[pltpu.VMEM((B * T, D), jnp.float32)],   # persistent activation
    )

    kern = functools.partial(fused_kernel, num_heads=num_heads, batch=B, seq=T)
    out = pl.pallas_call(
        kern,
        out_shape=jax.ShapeDtypeStruct((B, 8), jnp.float32),
        grid_spec=grid_spec,
        compiler_params=pltpu.CompilerParams(
            dimension_semantics=("arbitrary",),          # layer axis is sequential
            vmem_limit_bytes=48 * 1024 * 1024,           # >v5e/v6e defaults, <v7x physical
        ),
    )(xf,
      params["we_t"], params["be"], params["ln0_g"], params["ln0_b"],
      pe_flat, params["alpha"],
      params["wqkv_t"], params["bqkv"], params["wo_t"], params["bo"],
      params["ln1_g"], params["ln1_b"],
      params["w1_t"], params["bf1"], params["w2_t"], params["bf2"],
      params["ln2_g"], params["ln2_b"],
      params["wpool_row"], params["bpool"],
      params["whead_t"], params["bhead"],
      params["wheads_t"], params["bheads"])

    return {
        "logits": out[:, 0:1],
        "evid": out[:, 1:5],
        "gpd": out[:, 5:7],
        "precursor": out[:, 7:8],
    }


# ------------------------------ parameter setup -----------------------------
def _linear(key, fan_in, fan_out):
    # torch.nn.Linear default init: U(-1/sqrt(fan_in), 1/sqrt(fan_in))
    kw, kb = jax.random.split(key)
    bound = 1.0 / math.sqrt(fan_in)
    w_t = jax.random.uniform(kw, (fan_in, fan_out), jnp.float32, -bound, bound)
    b = jax.random.uniform(kb, (1, fan_out), jnp.float32, -bound, bound)
    return w_t, b


def make_pe(T, D):
    pos = jnp.arange(T, dtype=jnp.float32)[:, None]
    div = jnp.exp(jnp.arange(0, D, 2, dtype=jnp.float32) * (-math.log(10000.0) / D))
    pe = jnp.zeros((T, D), jnp.float32)
    pe = pe.at[:, 0::2].set(jnp.sin(pos * div))
    pe = pe.at[:, 1::2].set(jnp.cos(pos * div))
    return pe


def init_params(key, T, F, D, FF, num_blocks, head_dim=128):
    keys = iter(jax.random.split(key, 16 + 4 * num_blocks))
    p = {}
    p["we_t"], p["be"] = _linear(next(keys), F, D)
    p["ln0_g"] = jnp.ones((1, D), jnp.float32)
    p["ln0_b"] = jnp.zeros((1, D), jnp.float32)
    p["pe"] = make_pe(T, D)
    p["alpha"] = jnp.ones((1, 1), jnp.float32)

    wqkv, bqkv, wo, bo = [], [], [], []
    ln1g, ln1b, w1, bf1, w2, bf2, ln2g, ln2b = [], [], [], [], [], [], [], []
    for _ in range(num_blocks):
        a, b_ = _linear(next(keys), D, 3 * D); wqkv.append(a); bqkv.append(b_)
        a, b_ = _linear(next(keys), D, D);     wo.append(a);   bo.append(b_)
        ln1g.append(jnp.ones((1, D), jnp.float32)); ln1b.append(jnp.zeros((1, D), jnp.float32))
        a, b_ = _linear(next(keys), D, FF);    w1.append(a);   bf1.append(b_)
        a, b_ = _linear(next(keys), FF, D);    w2.append(a);   bf2.append(b_)
        ln2g.append(jnp.ones((1, D), jnp.float32)); ln2b.append(jnp.zeros((1, D), jnp.float32))

    stack = lambda xs: jnp.stack(xs, axis=0)
    p["wqkv_t"], p["bqkv"] = stack(wqkv), stack(bqkv)
    p["wo_t"], p["bo"] = stack(wo), stack(bo)
    p["ln1_g"], p["ln1_b"] = stack(ln1g), stack(ln1b)
    p["w1_t"], p["bf1"] = stack(w1), stack(bf1)
    p["w2_t"], p["bf2"] = stack(w2), stack(bf2)
    p["ln2_g"], p["ln2_b"] = stack(ln2g), stack(ln2b)

    wpool_t, p["bpool"] = _linear(next(keys), D, 1)
    p["wpool_row"] = wpool_t.T                                  # (1, D) for VPU projection
    p["whead_t"], p["bhead"] = _linear(next(keys), D, head_dim)

    wlog_t, blog = _linear(next(keys), head_dim, 1)
    wnig_t, bnig = _linear(next(keys), head_dim, 4)
    wgpd_t, bgpd = _linear(next(keys), head_dim, 2)
    wprec_t, bprec = _linear(next(keys), head_dim, 1)
    # merged output heads: columns [logits | mu logv loga logb | xi logsig | precursor]
    p["wheads_t"] = jnp.concatenate([wlog_t, wnig_t, wgpd_t, wprec_t], axis=1)   # (HD, 8)
    p["bheads"] = jnp.concatenate([blog, bnig, bgpd, bprec], axis=1)             # (1, 8)
    return p


# ----------------------------------- main -----------------------------------
if __name__ == "__main__":
    # Module-default feature dims (embed_dim=128, num_heads=4, ff_dim=256, head
    # width 128) so matmul lane dims fill the MXU; small T/B/num_blocks for a
    # quick deterministic demo.
    B, T, F = 4, 8, 16
    D, H, FF, L = 128, 4, 256, 3

    root = jax.random.PRNGKey(0)
    k_params, k_x = jax.random.split(root)
    params = init_params(k_params, T, F, D, FF, L, head_dim=128)
    x = jax.random.normal(k_x, (B, T, F), jnp.float32)

    out = retplus_forward(x, params, num_heads=H)
    out = jax.tree_util.tree_map(jax.block_until_ready, out)

    assert out["logits"].shape == (B, 1)
    assert out["evid"].shape == (B, 4)
    assert out["gpd"].shape == (B, 2)
    assert out["precursor"].shape == (B, 1)
    for v in out.values():
        assert bool(jnp.isfinite(v).all())
    print("KERNEL_OK")
</pallas_src>

<mosaic_0001>
module attributes {stable_mosaic.version = 11 : i64} {
  func.func @fused_kernel(%arg0: i32, %arg1: memref<32x16xf32, #tpu.memory_space<vmem>>, %arg2: memref<16x128xf32, #tpu.memory_space<vmem>>, %arg3: memref<1x128xf32, #tpu.memory_space<vmem>>, %arg4: memref<1x128xf32, #tpu.memory_space<vmem>>, %arg5: memref<1x128xf32, #tpu.memory_space<vmem>>, %arg6: memref<32x128xf32, #tpu.memory_space<vmem>>, %arg7: memref<1x1xf32, #tpu.memory_space<smem>>, %arg8: memref<1x128x384xf32, #tpu.memory_space<vmem>>, %arg9: memref<1x1x384xf32, #tpu.memory_space<vmem>>, %arg10: memref<1x128x128xf32, #tpu.memory_space<vmem>>, %arg11: memref<1x1x128xf32, #tpu.memory_space<vmem>>, %arg12: memref<1x1x128xf32, #tpu.memory_space<vmem>>, %arg13: memref<1x1x128xf32, #tpu.memory_space<vmem>>, %arg14: memref<1x128x256xf32, #tpu.memory_space<vmem>>, %arg15: memref<1x1x256xf32, #tpu.memory_space<vmem>>, %arg16: memref<1x256x128xf32, #tpu.memory_space<vmem>>, %arg17: memref<1x1x128xf32, #tpu.memory_space<vmem>>, %arg18: memref<1x1x128xf32, #tpu.memory_space<vmem>>, %arg19: memref<1x1x128xf32, #tpu.memory_space<vmem>>, %arg20: memref<1x128xf32, #tpu.memory_space<vmem>>, %arg21: memref<1x1xf32, #tpu.memory_space<smem>>, %arg22: memref<128x128xf32, #tpu.memory_space<vmem>>, %arg23: memref<1x128xf32, #tpu.memory_space<vmem>>, %arg24: memref<128x8xf32, #tpu.memory_space<vmem>>, %arg25: memref<1x8xf32, #tpu.memory_space<vmem>>, %arg26: memref<4x8xf32, #tpu.memory_space<vmem>>, %arg27: memref<32x128xf32, #tpu.memory_space<vmem>>) attributes {dimension_semantics = [#tpu.dimension_semantics<arbitrary>], iteration_bounds = array<i64: 3>, scalar_prefetch = 0 : i64, scratch_operands = 1 : i64, tpu.core_type = #tpu.core_type<tc>, window_params = [{pipeline_mode = #tpu.pipeline_mode<synchronous>, transform_indices = @transform_0, window_bounds = array<i64: 32, 16>}, {pipeline_mode = #tpu.pipeline_mode<synchronous>, transform_indices = @transform_1, window_bounds = array<i64: 16, 128>}, {pipeline_mode = #tpu.pipeline_mode<synchronous>, transform_indices = @transform_2, window_bounds = array<i64: 1, 128>}, {pipeline_mode = #tpu.pipeline_mode<synchronous>, transform_indices = @transform_3, window_bounds = array<i64: 1, 128>}, {pipeline_mode = #tpu.pipeline_mode<synchronous>, transform_indices = @transform_4, window_bounds = array<i64: 1, 128>}, {pipeline_mode = #tpu.pipeline_mode<synchronous>, transform_indices = @transform_5, window_bounds = array<i64: 32, 128>}, {transform_indices = @transform_6, window_bounds = array<i64: 1, 1>}, {transform_indices = @transform_7, window_bounds = array<i64: 1, 128, 384>}, {transform_indices = @transform_8, window_bounds = array<i64: 1, 1, 384>}, {transform_indices = @transform_9, window_bounds = array<i64: 1, 128, 128>}, {transform_indices = @transform_10, window_bounds = array<i64: 1, 1, 128>}, {transform_indices = @transform_11, window_bounds = array<i64: 1, 1, 128>}, {transform_indices = @transform_12, window_bounds = array<i64: 1, 1, 128>}, {transform_indices = @transform_13, window_bounds = array<i64: 1, 128, 256>}, {transform_indices = @transform_14, window_bounds = array<i64: 1, 1, 256>}, {transform_indices = @transform_15, window_bounds = array<i64: 1, 256, 128>}, {transform_indices = @transform_16, window_bounds = array<i64: 1, 1, 128>}, {transform_indices = @transform_17, window_bounds = array<i64: 1, 1, 128>}, {transform_indices = @transform_18, window_bounds = array<i64: 1, 1, 128>}, {pipeline_mode = #tpu.pipeline_mode<synchronous>, transform_indices = @transform_19, window_bounds = array<i64: 1, 128>}, {transform_indices = @transform_20, window_bounds = array<i64: 1, 1>}, {pipeline_mode = #tpu.pipeline_mode<synchronous>, transform_indices = @transform_21, window_bounds = array<i64: 128, 128>}, {pipeline_mode = #tpu.pipeline_mode<synchronous>, transform_indices = @transform_22, window_bounds = array<i64: 1, 128>}, {pipeline_mode = #tpu.pipeline_mode<synchronous>, transform_indices = @transform_23, window_bounds = array<i64: 128, 8>}, {pipeline_mode = #tpu.pipeline_mode<synchronous>, transform_indices = @transform_24, window_bounds = array<i64: 1, 8>}, {pipeline_mode = #tpu.pipeline_mode<synchronous>, transform_indices = @transform_25, window_bounds = array<i64: 4, 8>}]} {
    %c0_i32 = arith.constant 0 : i32
    %0 = arith.cmpi eq, %arg0, %c0_i32 : i32
    %1 = arith.extui %0 : i1 to i32
    %c0_i32_0 = arith.constant 0 : i32
    %2 = arith.cmpi ne, %1, %c0_i32_0 : i32
    scf.if %2 {
      %c0_90 = arith.constant 0 : index
      %c0_91 = arith.constant 0 : index
      %213 = vector.load %arg1[%c0_90, %c0_91] : memref<32x16xf32, #tpu.memory_space<vmem>>, vector<32x16xf32>
      %c0_92 = arith.constant 0 : index
      %c0_93 = arith.constant 0 : index
      %214 = vector.load %arg2[%c0_92, %c0_93] : memref<16x128xf32, #tpu.memory_space<vmem>>, vector<16x128xf32>
      %cst_94 = arith.constant dense<0.000000e+00> : vector<32x128xf32>
      %215 = tpu.matmul %213, %214, %cst_94 {dimension_numbers = #tpu.dot_dimension_numbers<[1], [0], [0], [1], [0, 0, 1, 1], [], []>} : vector<32x16xf32>, vector<16x128xf32>, vector<32x128xf32> -> vector<32x128xf32>
      %c0_95 = arith.constant 0 : index
      %c0_96 = arith.constant 0 : index
      %216 = vector.load %arg3[%c0_95, %c0_96] : memref<1x128xf32, #tpu.memory_space<vmem>>, vector<1x128xf32>
      %217 = vector.broadcast %216 : vector<1x128xf32> to vector<32x128xf32>
      %218 = arith.addf %215, %217 : vector<32x128xf32>
      %c0_97 = arith.constant 0 : index
      %c0_98 = arith.constant 0 : index
      %219 = vector.load %arg4[%c0_97, %c0_98] : memref<1x128xf32, #tpu.memory_space<vmem>>, vector<1x128xf32>
      %c0_99 = arith.constant 0 : index
      %c0_100 = arith.constant 0 : index
      %220 = vector.load %arg5[%c0_99, %c0_100] : memref<1x128xf32, #tpu.memory_space<vmem>>, vector<1x128xf32>
      %cst_101 = arith.constant dense<0.000000e+00> : vector<32xf32>
      %221 = vector.multi_reduction <add>, %218, %cst_101 [1] : vector<32x128xf32> to vector<32xf32>
      %222 = vector.shape_cast %221 : vector<32xf32> to vector<32x1xf32>
      %cst_102 = arith.constant 1.280000e+02 : f32
      %223 = vector.broadcast %cst_102 : f32 to vector<32x1xf32>
      %224 = arith.divf %222, %223 : vector<32x1xf32>
      %225 = vector.broadcast %224 : vector<32x1xf32> to vector<32x128xf32>
      %226 = arith.subf %218, %225 : vector<32x128xf32>
      %227 = arith.mulf %226, %226 : vector<32x128xf32>
      %cst_103 = arith.constant dense<0.000000e+00> : vector<32xf32>
      %228 = vector.multi_reduction <add>, %227, %cst_103 [1] : vector<32x128xf32> to vector<32xf32>
      %229 = vector.shape_cast %228 : vector<32xf32> to vector<32x1xf32>
      %cst_104 = arith.constant 1.280000e+02 : f32
      %230 = vector.broadcast %cst_104 : f32 to vector<32x1xf32>
      %231 = arith.divf %229, %230 : vector<32x1xf32>
      %232 = vector.broadcast %224 : vector<32x1xf32> to vector<32x128xf32>
      %233 = arith.subf %218, %232 : vector<32x128xf32>
      %cst_105 = arith.constant 9.99999974E-6 : f32
      %234 = vector.broadcast %cst_105 : f32 to vector<32x1xf32>
      %235 = arith.addf %231, %234 : vector<32x1xf32>
      %236 = math.rsqrt %235 : vector<32x1xf32>
      %237 = vector.broadcast %236 : vector<32x1xf32> to vector<32x128xf32>
      %238 = arith.mulf %233, %237 : vector<32x128xf32>
      %239 = vector.broadcast %219 : vector<1x128xf32> to vector<32x128xf32>
      %240 = arith.mulf %238, %239 : vector<32x128xf32>
      %241 = vector.broadcast %220 : vector<1x128xf32> to vector<32x128xf32>
      %242 = arith.addf %240, %241 : vector<32x128xf32>
      %c0_106 = arith.constant 0 : index
      %c0_107 = arith.constant 0 : index
      %243 = memref.load %arg7[%c0_106, %c0_107] : memref<1x1xf32, #tpu.memory_space<smem>>
      %c0_108 = arith.constant 0 : index
      %c0_109 = arith.constant 0 : index
      %244 = vector.load %arg6[%c0_108, %c0_109] : memref<32x128xf32, #tpu.memory_space<vmem>>, vector<32x128xf32>
      %245 = vector.broadcast %243 : f32 to vector<32x128xf32>
      %246 = arith.mulf %245, %244 : vector<32x128xf32>
      %247 = arith.addf %242, %246 : vector<32x128xf32>
      %c0_110 = arith.constant 0 : index
      %c0_111 = arith.constant 0 : index
      %248 = vector.load %arg27[%c0_110, %c0_111] : memref<32x128xf32, #tpu.memory_space<vmem>>, vector<32x128xf32>
      tpu.vector_store %arg27[%c0_110, %c0_111], %247 {strides = array<i32>} : memref<32x128xf32, #tpu.memory_space<vmem>>, vector<32x128xf32>,
    } else {
    }
    %c0 = arith.constant 0 : index
    %c0_1 = arith.constant 0 : index
    %3 = vector.load %arg27[%c0, %c0_1] : memref<32x128xf32, #tpu.memory_space<vmem>>, vector<32x128xf32>
    %c0_2 = arith.constant 0 : index
    %c0_3 = arith.constant 0 : index
    %c0_4 = arith.constant 0 : index
    %4 = vector.load %arg8[%c0_2, %c0_3, %c0_4] : memref<1x128x384xf32, #tpu.memory_space<vmem>>, vector<1x128x384xf32>
    %5 = vector.shape_cast %4 : vector<1x128x384xf32> to vector<128x384xf32>
    %cst = arith.constant dense<0.000000e+00> : vector<32x384xf32>
    %6 = tpu.matmul %3, %5, %cst {dimension_numbers = #tpu.dot_dimension_numbers<[1], [0], [0], [1], [0, 0, 1, 1], [], []>} : vector<32x128xf32>, vector<128x384xf32>, vector<32x384xf32> -> vector<32x384xf32>
    %c0_5 = arith.constant 0 : index
    %c0_6 = arith.constant 0 : index
    %c0_7 = arith.constant 0 : index
    %7 = vector.load %arg9[%c0_5, %c0_6, %c0_7] : memref<1x1x384xf32, #tpu.memory_space<vmem>>, vector<1x1x384xf32>
    %8 = vector.shape_cast %7 : vector<1x1x384xf32> to vector<1x384xf32>
    %9 = vector.broadcast %8 : vector<1x384xf32> to vector<32x384xf32>
    %10 = arith.addf %6, %9 : vector<32x384xf32>
    %11 = vector.extract_strided_slice %10 {offsets = [0, 0], sizes = [32, 32], strides = [1, 1]} : vector<32x384xf32> to vector<32x32xf32>
    %12 = vector.shape_cast %11 : vector<32x32xf32> to vector<4x8x32xf32>
    %cst_8 = arith.constant 0.176776692 : f32
    %13 = vector.broadcast %cst_8 : f32 to vector<4x8x32xf32>
    %14 = arith.mulf %12, %13 : vector<4x8x32xf32>
    %15 = vector.extract_strided_slice %10 {offsets = [0, 128], sizes = [32, 32], strides = [1, 1]} : vector<32x384xf32> to vector<32x32xf32>
    %16 = vector.shape_cast %15 : vector<32x32xf32> to vector<4x8x32xf32>
    %17 = vector.extract_strided_slice %10 {offsets = [0, 256], sizes = [32, 32], strides = [1, 1]} : vector<32x384xf32> to vector<32x32xf32>
    %18 = vector.shape_cast %17 : vector<32x32xf32> to vector<4x8x32xf32>
    "tpu.trace_start"() <{level = 10 : i32, message = "btd,bsd->bts"}> : () -> ()
    %cst_9 = arith.constant dense<0.000000e+00> : vector<4x8x8xf32>
    %19 = tpu.matmul %14, %16, %cst_9 {dimension_numbers = #tpu.dot_dimension_numbers<[2], [2], [1], [1], [0, 0, 0, 1, 1, 1], [0], [0]>} : vector<4x8x32xf32>, vector<4x8x32xf32>, vector<4x8x8xf32> -> vector<4x8x8xf32>
    "tpu.trace_stop"() : () -> ()
    %cst_10 = arith.constant dense<0xFF800000> : vector<4x8xf32>
    %20 = vector.multi_reduction <maximumf>, %19, %cst_10 [2] : vector<4x8x8xf32> to vector<4x8xf32>
    %21 = vector.shape_cast %20 : vector<4x8xf32> to vector<4x8x1xf32>
    %22 = vector.broadcast %21 : vector<4x8x1xf32> to vector<4x8x8xf32>
    %23 = arith.subf %19, %22 : vector<4x8x8xf32>
    %24 = math.exp %23 : vector<4x8x8xf32>
    %cst_11 = arith.constant dense<0.000000e+00> : vector<4x8xf32>
    %25 = vector.multi_reduction <add>, %24, %cst_11 [2] : vector<4x8x8xf32> to vector<4x8xf32>
    %26 = vector.shape_cast %25 : vector<4x8xf32> to vector<4x8x1xf32>
    %27 = tpu.reciprocal %26 {approx = true} : vector<4x8x1xf32> -> vector<4x8x1xf32>
    %28 = vector.broadcast %27 : vector<4x8x1xf32> to vector<4x8x8xf32>
    %29 = arith.mulf %24, %28 : vector<4x8x8xf32>
    "tpu.trace_start"() <{level = 10 : i32, message = "bts,bsd->btd"}> : () -> ()
    %cst_12 = arith.constant dense<0.000000e+00> : vector<4x8x32xf32>
    %30 = tpu.matmul %29, %18, %cst_12 {dimension_numbers = #tpu.dot_dimension_numbers<[2], [1], [1], [2], [0, 0, 0, 1, 1, 2], [0], [0]>} : vector<4x8x8xf32>, vector<4x8x32xf32>, vector<4x8x32xf32> -> vector<4x8x32xf32>
    "tpu.trace_stop"() : () -> ()
    %31 = vector.extract_strided_slice %10 {offsets = [0, 32], sizes = [32, 32], strides = [1, 1]} : vector<32x384xf32> to vector<32x32xf32>
    %32 = vector.shape_cast %31 : vector<32x32xf32> to vector<4x8x32xf32>
    %cst_13 = arith.constant 0.176776692 : f32
    %33 = vector.broadcast %cst_13 : f32 to vector<4x8x32xf32>
    %34 = arith.mulf %32, %33 : vector<4x8x32xf32>
    %35 = vector.extract_strided_slice %10 {offsets = [0, 160], sizes = [32, 32], strides = [1, 1]} : vector<32x384xf32> to vector<32x32xf32>
    %36 = vector.shape_cast %35 : vector<32x32xf32> to vector<4x8x32xf32>
    %37 = vector.extract_strided_slice %10 {offsets = [0, 288], sizes = [32, 32], strides = [1, 1]} : vector<32x384xf32> to vector<32x32xf32>
    %38 = vector.shape_cast %37 : vector<32x32xf32> to vector<4x8x32xf32>
    "tpu.trace_start"() <{level = 10 : i32, message = "btd,bsd->bts"}> : () -> ()
    %cst_14 = arith.constant dense<0.000000e+00> : vector<4x8x8xf32>
    %39 = tpu.matmul %34, %36, %cst_14 {dimension_numbers = #tpu.dot_dimension_numbers<[2], [2], [1], [1], [0, 0, 0, 1, 1, 1], [0], [0]>} : vector<4x8x32xf32>, vector<4x8x32xf32>, vector<4x8x8xf32> -> vector<4x8x8xf32>
    "tpu.trace_stop"() : () -> ()
    %cst_15 = arith.constant dense<0xFF800000> : vector<4x8xf32>
    %40 = vector.multi_reduction <maximumf>, %39, %cst_15 [2] : vector<4x8x8xf32> to vector<4x8xf32>
    %41 = vector.shape_cast %40 : vector<4x8xf32> to vector<4x8x1xf32>
    %42 = vector.broadcast %41 : vector<4x8x1xf32> to vector<4x8x8xf32>
    %43 = arith.subf %39, %42 : vector<4x8x8xf32>
    %44 = math.exp %43 : vector<4x8x8xf32>
    %cst_16 = arith.constant dense<0.000000e+00> : vector<4x8xf32>
    %45 = vector.multi_reduction <add>, %44, %cst_16 [2] : vector<4x8x8xf32> to vector<4x8xf32>
    %46 = vector.shape_cast %45 : vector<4x8xf32> to vector<4x8x1xf32>
    %47 = tpu.reciprocal %46 {approx = true} : vector<4x8x1xf32> -> vector<4x8x1xf32>
    %48 = vector.broadcast %47 : vector<4x8x1xf32> to vector<4x8x8xf32>
    %49 = arith.mulf %44, %48 : vector<4x8x8xf32>
    "tpu.trace_start"() <{level = 10 : i32, message = "bts,bsd->btd"}> : () -> ()
    %cst_17 = arith.constant dense<0.000000e+00> : vector<4x8x32xf32>
    %50 = tpu.matmul %49, %38, %cst_17 {dimension_numbers = #tpu.dot_dimension_numbers<[2], [1], [1], [2], [0, 0, 0, 1, 1, 2], [0], [0]>} : vector<4x8x8xf32>, vector<4x8x32xf32>, vector<4x8x32xf32> -> vector<4x8x32xf32>
    "tpu.trace_stop"() : () -> ()
    %51 = vector.extract_strided_slice %10 {offsets = [0, 64], sizes = [32, 32], strides = [1, 1]} : vector<32x384xf32> to vector<32x32xf32>
    %52 = vector.shape_cast %51 : vector<32x32xf32> to vector<4x8x32xf32>
    %cst_18 = arith.constant 0.176776692 : f32
    %53 = vector.broadcast %cst_18 : f32 to vector<4x8x32xf32>
    %54 = arith.mulf %52, %53 : vector<4x8x32xf32>
    %55 = vector.extract_strided_slice %10 {offsets = [0, 192], sizes = [32, 32], strides = [1, 1]} : vector<32x384xf32> to vector<32x32xf32>
    %56 = vector.shape_cast %55 : vector<32x32xf32> to vector<4x8x32xf32>
    %57 = vector.extract_strided_slice %10 {offsets = [0, 320], sizes = [32, 32], strides = [1, 1]} : vector<32x384xf32> to vector<32x32xf32>
    %58 = vector.shape_cast %57 : vector<32x32xf32> to vector<4x8x32xf32>
    "tpu.trace_start"() <{level = 10 : i32, message = "btd,bsd->bts"}> : () -> ()
    %cst_19 = arith.constant dense<0.000000e+00> : vector<4x8x8xf32>
    %59 = tpu.matmul %54, %56, %cst_19 {dimension_numbers = #tpu.dot_dimension_numbers<[2], [2], [1], [1], [0, 0, 0, 1, 1, 1], [0], [0]>} : vector<4x8x32xf32>, vector<4x8x32xf32>, vector<4x8x8xf32> -> vector<4x8x8xf32>
    "tpu.trace_stop"() : () -> ()
    %cst_20 = arith.constant dense<0xFF800000> : vector<4x8xf32>
    %60 = vector.multi_reduction <maximumf>, %59, %cst_20 [2] : vector<4x8x8xf32> to vector<4x8xf32>
    %61 = vector.shape_cast %60 : vector<4x8xf32> to vector<4x8x1xf32>
    %62 = vector.broadcast %61 : vector<4x8x1xf32> to vector<4x8x8xf32>
    %63 = arith.subf %59, %62 : vector<4x8x8xf32>
    %64 = math.exp %63 : vector<4x8x8xf32>
    %cst_21 = arith.constant dense<0.000000e+00> : vector<4x8xf32>
    %65 = vector.multi_reduction <add>, %64, %cst_21 [2] : vector<4x8x8xf32> to vector<4x8xf32>
    %66 = vector.shape_cast %65 : vector<4x8xf32> to vector<4x8x1xf32>
    %67 = tpu.reciprocal %66 {approx = true} : vector<4x8x1xf32> -> vector<4x8x1xf32>
    %68 = vector.broadcast %67 : vector<4x8x1xf32> to vector<4x8x8xf32>
    %69 = arith.mulf %64, %68 : vector<4x8x8xf32>
    "tpu.trace_start"() <{level = 10 : i32, message = "bts,bsd->btd"}> : () -> ()
    %cst_22 = arith.constant dense<0.000000e+00> : vector<4x8x32xf32>
    %70 = tpu.matmul %69, %58, %cst_22 {dimension_numbers = #tpu.dot_dimension_numbers<[2], [1], [1], [2], [0, 0, 0, 1, 1, 2], [0], [0]>} : vector<4x8x8xf32>, vector<4x8x32xf32>, vector<4x8x32xf32> -> vector<4x8x32xf32>
    "tpu.trace_stop"() : () -> ()
    %71 = vector.extract_strided_slice %10 {offsets = [0, 96], sizes = [32, 32], strides = [1, 1]} : vector<32x384xf32> to vector<32x32xf32>
    %72 = vector.shape_cast %71 : vector<32x32xf32> to vector<4x8x32xf32>
    %cst_23 = arith.constant 0.176776692 : f32
    %73 = vector.broadcast %cst_23 : f32 to vector<4x8x32xf32>
    %74 = arith.mulf %72, %73 : vector<4x8x32xf32>
    %75 = vector.extract_strided_slice %10 {offsets = [0, 224], sizes = [32, 32], strides = [1, 1]} : vector<32x384xf32> to vector<32x32xf32>
    %76 = vector.shape_cast %75 : vector<32x32xf32> to vector<4x8x32xf32>
    %77 = vector.extract_strided_slice %10 {offsets = [0, 352], sizes = [32, 32], strides = [1, 1]} : vector<32x384xf32> to vector<32x32xf32>
    %78 = vector.shape_cast %77 : vector<32x32xf32> to vector<4x8x32xf32>
    "tpu.trace_start"() <{level = 10 : i32, message = "btd,bsd->bts"}> : () -> ()
    %cst_24 = arith.constant dense<0.000000e+00> : vector<4x8x8xf32>
    %79 = tpu.matmul %74, %76, %cst_24 {dimension_numbers = #tpu.dot_dimension_numbers<[2], [2], [1], [1], [0, 0, 0, 1, 1, 1], [0], [0]>} : vector<4x8x32xf32>, vector<4x8x32xf32>, vector<4x8x8xf32> -> vector<4x8x8xf32>
    "tpu.trace_stop"() : () -> ()
    %cst_25 = arith.constant dense<0xFF800000> : vector<4x8xf32>
    %80 = vector.multi_reduction <maximumf>, %79, %cst_25 [2] : vector<4x8x8xf32> to vector<4x8xf32>
    %81 = vector.shape_cast %80 : vector<4x8xf32> to vector<4x8x1xf32>
    %82 = vector.broadcast %81 : vector<4x8x1xf32> to vector<4x8x8xf32>
    %83 = arith.subf %79, %82 : vector<4x8x8xf32>
    %84 = math.exp %83 : vector<4x8x8xf32>
    %cst_26 = arith.constant dense<0.000000e+00> : vector<4x8xf32>
    %85 = vector.multi_reduction <add>, %84, %cst_26 [2] : vector<4x8x8xf32> to vector<4x8xf32>
    %86 = vector.shape_cast %85 : vector<4x8xf32> to vector<4x8x1xf32>
    %87 = tpu.reciprocal %86 {approx = true} : vector<4x8x1xf32> -> vector<4x8x1xf32>
    %88 = vector.broadcast %87 : vector<4x8x1xf32> to vector<4x8x8xf32>
    %89 = arith.mulf %84, %88 : vector<4x8x8xf32>
    "tpu.trace_start"() <{level = 10 : i32, message = "bts,bsd->btd"}> : () -> ()
    %cst_27 = arith.constant dense<0.000000e+00> : vector<4x8x32xf32>
    %90 = tpu.matmul %89, %78, %cst_27 {dimension_numbers = #tpu.dot_dimension_numbers<[2], [1], [1], [2], [0, 0, 0, 1, 1, 2], [0], [0]>} : vector<4x8x8xf32>, vector<4x8x32xf32>, vector<4x8x32xf32> -> vector<4x8x32xf32>
    "tpu.trace_stop"() : () -> ()
    %91 = tpu.concatenate %30, %50, %70, %90 in 2 : vector<4x8x32xf32>, vector<4x8x32xf32>, vector<4x8x32xf32>, vector<4x8x32xf32> -> vector<4x8x128xf32>
    %92 = vector.shape_cast %91 : vector<4x8x128xf32> to vector<32x128xf32>
    %c0_28 = arith.constant 0 : index
    %c0_29 = arith.constant 0 : index
    %c0_30 = arith.constant 0 : index
    %93 = vector.load %arg10[%c0_28, %c0_29, %c0_30] : memref<1x128x128xf32, #tpu.memory_space<vmem>>, vector<1x128x128xf32>
    %94 = vector.shape_cast %93 : vector<1x128x128xf32> to vector<128x128xf32>
    %cst_31 = arith.constant dense<0.000000e+00> : vector<32x128xf32>
    %95 = tpu.matmul %92, %94, %cst_31 {dimension_numbers = #tpu.dot_dimension_numbers<[1], [0], [0], [1], [0, 0, 1, 1], [], []>} : vector<32x128xf32>, vector<128x128xf32>, vector<32x128xf32> -> vector<32x128xf32>
    %c0_32 = arith.constant 0 : index
    %c0_33 = arith.constant 0 : index
    %c0_34 = arith.constant 0 : index
    %96 = vector.load %arg11[%c0_32, %c0_33, %c0_34] : memref<1x1x128xf32, #tpu.memory_space<vmem>>, vector<1x1x128xf32>
    %97 = vector.shape_cast %96 : vector<1x1x128xf32> to vector<1x128xf32>
    %98 = vector.broadcast %97 : vector<1x128xf32> to vector<32x128xf32>
    %99 = arith.addf %95, %98 : vector<32x128xf32>
    %100 = arith.addf %3, %99 : vector<32x128xf32>
    %c0_35 = arith.constant 0 : index
    %c0_36 = arith.constant 0 : index
    %c0_37 = arith.constant 0 : index
    %101 = vector.load %arg12[%c0_35, %c0_36, %c0_37] : memref<1x1x128xf32, #tpu.memory_space<vmem>>, vector<1x1x128xf32>
    %102 = vector.shape_cast %101 : vector<1x1x128xf32> to vector<1x128xf32>
    %c0_38 = arith.constant 0 : index
    %c0_39 = arith.constant 0 : index
    %c0_40 = arith.constant 0 : index
    %103 = vector.load %arg13[%c0_38, %c0_39, %c0_40] : memref<1x1x128xf32, #tpu.memory_space<vmem>>, vector<1x1x128xf32>
    %104 = vector.shape_cast %103 : vector<1x1x128xf32> to vector<1x128xf32>
    %cst_41 = arith.constant dense<0.000000e+00> : vector<32xf32>
    %105 = vector.multi_reduction <add>, %100, %cst_41 [1] : vector<32x128xf32> to vector<32xf32>
    %106 = vector.shape_cast %105 : vector<32xf32> to vector<32x1xf32>
    %cst_42 = arith.constant 1.280000e+02 : f32
    %107 = vector.broadcast %cst_42 : f32 to vector<32x1xf32>
    %108 = arith.divf %106, %107 : vector<32x1xf32>
    %109 = vector.broadcast %108 : vector<32x1xf32> to vector<32x128xf32>
    %110 = arith.subf %100, %109 : vector<32x128xf32>
    %111 = arith.mulf %110, %110 : vector<32x128xf32>
    %cst_43 = arith.constant dense<0.000000e+00> : vector<32xf32>
    %112 = vector.multi_reduction <add>, %111, %cst_43 [1] : vector<32x128xf32> to vector<32xf32>
    %113 = vector.shape_cast %112 : vector<32xf32> to vector<32x1xf32>
    %cst_44 = arith.constant 1.280000e+02 : f32
    %114 = vector.broadcast %cst_44 : f32 to vector<32x1xf32>
    %115 = arith.divf %113, %114 : vector<32x1xf32>
    %116 = vector.broadcast %108 : vector<32x1xf32> to vector<32x128xf32>
    %117 = arith.subf %100, %116 : vector<32x128xf32>
    %cst_45 = arith.constant 9.99999974E-6 : f32
    %118 = vector.broadcast %cst_45 : f32 to vector<32x1xf32>
    %119 = arith.addf %115, %118 : vector<32x1xf32>
    %120 = math.rsqrt %119 : vector<32x1xf32>
    %121 = vector.broadcast %120 : vector<32x1xf32> to vector<32x128xf32>
    %122 = arith.mulf %117, %121 : vector<32x128xf32>
    %123 = vector.broadcast %102 : vector<1x128xf32> to vector<32x128xf32>
    %124 = arith.mulf %122, %123 : vector<32x128xf32>
    %125 = vector.broadcast %104 : vector<1x128xf32> to vector<32x128xf32>
    %126 = arith.addf %124, %125 : vector<32x128xf32>
    %c0_46 = arith.constant 0 : index
    %c0_47 = arith.constant 0 : index
    %c0_48 = arith.constant 0 : index
    %127 = vector.load %arg14[%c0_46, %c0_47, %c0_48] : memref<1x128x256xf32, #tpu.memory_space<vmem>>, vector<1x128x256xf32>
    %128 = vector.shape_cast %127 : vector<1x128x256xf32> to vector<128x256xf32>
    %cst_49 = arith.constant dense<0.000000e+00> : vector<32x256xf32>
    %129 = tpu.matmul %126, %128, %cst_49 {dimension_numbers = #tpu.dot_dimension_numbers<[1], [0], [0], [1], [0, 0, 1, 1], [], []>} : vector<32x128xf32>, vector<128x256xf32>, vector<32x256xf32> -> vector<32x256xf32>
    %c0_50 = arith.constant 0 : index
    %c0_51 = arith.constant 0 : index
    %c0_52 = arith.constant 0 : index
    %130 = vector.load %arg15[%c0_50, %c0_51, %c0_52] : memref<1x1x256xf32, #tpu.memory_space<vmem>>, vector<1x1x256xf32>
    %131 = vector.shape_cast %130 : vector<1x1x256xf32> to vector<1x256xf32>
    %132 = vector.broadcast %131 : vector<1x256xf32> to vector<32x256xf32>
    %133 = arith.addf %129, %132 : vector<32x256xf32>
    %cst_53 = arith.constant 5.000000e-01 : f32
    %134 = vector.broadcast %cst_53 : f32 to vector<32x256xf32>
    %135 = arith.mulf %134, %133 : vector<32x256xf32>
    %cst_54 = arith.constant 0.707106769 : f32
    %136 = vector.broadcast %cst_54 : f32 to vector<32x256xf32>
    %137 = arith.mulf %133, %136 : vector<32x256xf32>
    %cst_55 = arith.constant 0.000000e+00 : f32
    %138 = vector.broadcast %cst_55 : f32 to vector<32x256xf32>
    %139 = arith.cmpf oge, %137, %138 : vector<32x256xf32>
    %cst_56 = arith.constant 1.000000e+00 : f32
    %cst_57 = arith.constant -1.000000e+00 : f32
    %140 = vector.broadcast %cst_56 : f32 to vector<32x256xf32>
    %141 = vector.broadcast %cst_57 : f32 to vector<32x256xf32>
    %142 = arith.select %139, %140, %141 : vector<32x256xi1>, vector<32x256xf32>
    %143 = math.absf %137 : vector<32x256xf32>
    %cst_58 = arith.constant 0.327591091 : f32
    %144 = vector.broadcast %cst_58 : f32 to vector<32x256xf32>
    %145 = arith.mulf %144, %143 : vector<32x256xf32>
    %cst_59 = arith.constant 1.000000e+00 : f32
    %146 = vector.broadcast %cst_59 : f32 to vector<32x256xf32>
    %147 = arith.addf %146, %145 : vector<32x256xf32>
    %cst_60 = arith.constant 1.000000e+00 : f32
    %148 = vector.broadcast %cst_60 : f32 to vector<32x256xf32>
    %149 = arith.divf %148, %147 : vector<32x256xf32>
    %cst_61 = arith.constant 1.06140542 : f32
    %150 = vector.broadcast %cst_61 : f32 to vector<32x256xf32>
    %151 = arith.mulf %150, %149 : vector<32x256xf32>
    %cst_62 = arith.constant -1.45315206 : f32
    %152 = vector.broadcast %cst_62 : f32 to vector<32x256xf32>
    %153 = arith.addf %151, %152 : vector<32x256xf32>
    %154 = arith.mulf %153, %149 : vector<32x256xf32>
    %cst_63 = arith.constant 1.42141378 : f32
    %155 = vector.broadcast %cst_63 : f32 to vector<32x256xf32>
    %156 = arith.addf %154, %155 : vector<32x256xf32>
    %157 = arith.mulf %156, %149 : vector<32x256xf32>
    %cst_64 = arith.constant -0.284496725 : f32
    %158 = vector.broadcast %cst_64 : f32 to vector<32x256xf32>
    %159 = arith.addf %157, %158 : vector<32x256xf32>
    %160 = arith.mulf %159, %149 : vector<32x256xf32>
    %cst_65 = arith.constant 0.254829586 : f32
    %161 = vector.broadcast %cst_65 : f32 to vector<32x256xf32>
    %162 = arith.addf %160, %161 : vector<32x256xf32>
    %163 = arith.mulf %162, %149 : vector<32x256xf32>
    %cst_66 = arith.constant 0.000000e+00 : f32
    %164 = vector.broadcast %cst_66 : f32 to vector<32x256xf32>
    %165 = arith.subf %164, %143 : vector<32x256xf32>
    %166 = arith.mulf %165, %143 : vector<32x256xf32>
    %167 = math.exp %166 : vector<32x256xf32>
    %168 = arith.mulf %163, %167 : vector<32x256xf32>
    %cst_67 = arith.constant 1.000000e+00 : f32
    %169 = vector.broadcast %cst_67 : f32 to vector<32x256xf32>
    %170 = arith.subf %169, %168 : vector<32x256xf32>
    %171 = arith.mulf %142, %170 : vector<32x256xf32>
    %cst_68 = arith.constant 1.000000e+00 : f32
    %172 = vector.broadcast %cst_68 : f32 to vector<32x256xf32>
    %173 = arith.addf %172, %171 : vector<32x256xf32>
    %174 = arith.mulf %135, %173 : vector<32x256xf32>
    %c0_69 = arith.constant 0 : index
    %c0_70 = arith.constant 0 : index
    %c0_71 = arith.constant 0 : index
    %175 = vector.load %arg16[%c0_69, %c0_70, %c0_71] : memref<1x256x128xf32, #tpu.memory_space<vmem>>, vector<1x256x128xf32>
    %176 = vector.shape_cast %175 : vector<1x256x128xf32> to vector<256x128xf32>
    %cst_72 = arith.constant dense<0.000000e+00> : vector<32x128xf32>
    %177 = tpu.matmul %174, %176, %cst_72 {dimension_numbers = #tpu.dot_dimension_numbers<[1], [0], [0], [1], [0, 0, 1, 1], [], []>} : vector<32x256xf32>, vector<256x128xf32>, vector<32x128xf32> -> vector<32x128xf32>
    %c0_73 = arith.constant 0 : index
    %c0_74 = arith.constant 0 : index
    %c0_75 = arith.constant 0 : index
    %178 = vector.load %arg17[%c0_73, %c0_74, %c0_75] : memref<1x1x128xf32, #tpu.memory_space<vmem>>, vector<1x1x128xf32>
    %179 = vector.shape_cast %178 : vector<1x1x128xf32> to vector<1x128xf32>
    %180 = vector.broadcast %179 : vector<1x128xf32> to vector<32x128xf32>
    %181 = arith.addf %177, %180 : vector<32x128xf32>
    %182 = arith.addf %126, %181 : vector<32x128xf32>
    %c0_76 = arith.constant 0 : index
    %c0_77 = arith.constant 0 : index
    %c0_78 = arith.constant 0 : index
    %183 = vector.load %arg18[%c0_76, %c0_77, %c0_78] : memref<1x1x128xf32, #tpu.memory_space<vmem>>, vector<1x1x128xf32>
    %184 = vector.shape_cast %183 : vector<1x1x128xf32> to vector<1x128xf32>
    %c0_79 = arith.constant 0 : index
    %c0_80 = arith.constant 0 : index
    %c0_81 = arith.constant 0 : index
    %185 = vector.load %arg19[%c0_79, %c0_80, %c0_81] : memref<1x1x128xf32, #tpu.memory_space<vmem>>, vector<1x1x128xf32>
    %186 = vector.shape_cast %185 : vector<1x1x128xf32> to vector<1x128xf32>
    %cst_82 = arith.constant dense<0.000000e+00> : vector<32xf32>
    %187 = vector.multi_reduction <add>, %182, %cst_82 [1] : vector<32x128xf32> to vector<32xf32>
    %188 = vector.shape_cast %187 : vector<32xf32> to vector<32x1xf32>
    %cst_83 = arith.constant 1.280000e+02 : f32
    %189 = vector.broadcast %cst_83 : f32 to vector<32x1xf32>
    %190 = arith.divf %188, %189 : vector<32x1xf32>
    %191 = vector.broadcast %190 : vector<32x1xf32> to vector<32x128xf32>
    %192 = arith.subf %182, %191 : vector<32x128xf32>
    %193 = arith.mulf %192, %192 : vector<32x128xf32>
    %cst_84 = arith.constant dense<0.000000e+00> : vector<32xf32>
    %194 = vector.multi_reduction <add>, %193, %cst_84 [1] : vector<32x128xf32> to vector<32xf32>
    %195 = vector.shape_cast %194 : vector<32xf32> to vector<32x1xf32>
    %cst_85 = arith.constant 1.280000e+02 : f32
    %196 = vector.broadcast %cst_85 : f32 to vector<32x1xf32>
    %197 = arith.divf %195, %196 : vector<32x1xf32>
    %198 = vector.broadcast %190 : vector<32x1xf32> to vector<32x128xf32>
    %199 = arith.subf %182, %198 : vector<32x128xf32>
    %cst_86 = arith.constant 9.99999974E-6 : f32
    %200 = vector.broadcast %cst_86 : f32 to vector<32x1xf32>
    %201 = arith.addf %197, %200 : vector<32x1xf32>
    %202 = math.rsqrt %201 : vector<32x1xf32>
    %203 = vector.broadcast %202 : vector<32x1xf32> to vector<32x128xf32>
    %204 = arith.mulf %199, %203 : vector<32x128xf32>
    %205 = vector.broadcast %184 : vector<1x128xf32> to vector<32x128xf32>
    %206 = arith.mulf %204, %205 : vector<32x128xf32>
    %207 = vector.broadcast %186 : vector<1x128xf32> to vector<32x128xf32>
    %208 = arith.addf %206, %207 : vector<32x128xf32>
    %c0_87 = arith.constant 0 : index
    %c0_88 = arith.constant 0 : index
    %209 = vector.load %arg27[%c0_87, %c0_88] : memref<32x128xf32, #tpu.memory_space<vmem>>, vector<32x128xf32>
    tpu.vector_store %arg27[%c0_87, %c0_88], %208 {strides = array<i32>} : memref<32x128xf32, #tpu.memory_space<vmem>>, vector<32x128xf32>,
    %c2_i32 = arith.constant 2 : i32
    %210 = arith.cmpi eq, %arg0, %c2_i32 : i32
    %211 = arith.extui %210 : i1 to i32
    %c0_i32_89 = arith.constant 0 : i32
    %212 = arith.cmpi ne, %211, %c0_i32_89 : i32
    scf.if %212 {
      %213 = vector.shape_cast %208 : vector<32x128xf32> to vector<4x8x128xf32>
      %c0_90 = arith.constant 0 : index
      %c0_91 = arith.constant 0 : index
      %214 = vector.load %arg20[%c0_90, %c0_91] : memref<1x128xf32, #tpu.memory_space<vmem>>, vector<1x128xf32>
      %215 = vector.shape_cast %214 : vector<1x128xf32> to vector<1x1x128xf32>
      %216 = vector.broadcast %215 : vector<1x1x128xf32> to vector<4x8x128xf32>
      %217 = arith.mulf %213, %216 : vector<4x8x128xf32>
      %cst_92 = arith.constant dense<0.000000e+00> : vector<4x8xf32>
      %218 = vector.multi_reduction <add>, %217, %cst_92 [2] : vector<4x8x128xf32> to vector<4x8xf32>
      %219 = vector.shape_cast %218 : vector<4x8xf32> to vector<4x8x1xf32>
      %c0_93 = arith.constant 0 : index
      %c0_94 = arith.constant 0 : index
      %220 = memref.load %arg21[%c0_93, %c0_94] : memref<1x1xf32, #tpu.memory_space<smem>>
      %221 = vector.broadcast %220 : f32 to vector<4x8x1xf32>
      %222 = arith.addf %219, %221 : vector<4x8x1xf32>
      %cst_95 = arith.constant dense<0xFF800000> : vector<4x1xf32>
      %223 = vector.multi_reduction <maximumf>, %222, %cst_95 [1] : vector<4x8x1xf32> to vector<4x1xf32>
      %224 = vector.shape_cast %223 : vector<4x1xf32> to vector<4x1x1xf32>
      %225 = vector.broadcast %224 : vector<4x1x1xf32> to vector<4x8x1xf32>
      %226 = arith.subf %222, %225 : vector<4x8x1xf32>
      %227 = math.exp %226 : vector<4x8x1xf32>
      %cst_96 = arith.constant dense<0.000000e+00> : vector<4x1xf32>
      %228 = vector.multi_reduction <add>, %227, %cst_96 [1] : vector<4x8x1xf32> to vector<4x1xf32>
      %229 = vector.shape_cast %228 : vector<4x1xf32> to vector<4x1x1xf32>
      %230 = tpu.reciprocal %229 {approx = true} : vector<4x1x1xf32> -> vector<4x1x1xf32>
      %231 = vector.broadcast %230 : vector<4x1x1xf32> to vector<4x8x1xf32>
      %232 = arith.mulf %227, %231 : vector<4x8x1xf32>
      %233 = vector.broadcast %232 : vector<4x8x1xf32> to vector<4x8x128xf32>
      %234 = arith.mulf %213, %233 : vector<4x8x128xf32>
      %cst_97 = arith.constant dense<0.000000e+00> : vector<4x128xf32>
      %235 = vector.multi_reduction <add>, %234, %cst_97 [1] : vector<4x8x128xf32> to vector<4x128xf32>
      %c0_98 = arith.constant 0 : index
      %c0_99 = arith.constant 0 : index
      %236 = vector.load %arg22[%c0_98, %c0_99] : memref<128x128xf32, #tpu.memory_space<vmem>>, vector<128x128xf32>
      %cst_100 = arith.constant dense<0.000000e+00> : vector<4x128xf32>
      %237 = tpu.matmul %235, %236, %cst_100 {dimension_numbers = #tpu.dot_dimension_numbers<[1], [0], [0], [1], [0, 0, 1, 1], [], []>} : vector<4x128xf32>, vector<128x128xf32>, vector<4x128xf32> -> vector<4x128xf32>
      %c0_101 = arith.constant 0 : index
      %c0_102 = arith.constant 0 : index
      %238 = vector.load %arg23[%c0_101, %c0_102] : memref<1x128xf32, #tpu.memory_space<vmem>>, vector<1x128xf32>
      %239 = vector.broadcast %238 : vector<1x128xf32> to vector<4x128xf32>
      %240 = arith.addf %237, %239 : vector<4x128xf32>
      %cst_103 = arith.constant 5.000000e-01 : f32
      %241 = vector.broadcast %cst_103 : f32 to vector<4x128xf32>
      %242 = arith.mulf %241, %240 : vector<4x128xf32>
      %cst_104 = arith.constant 0.707106769 : f32
      %243 = vector.broadcast %cst_104 : f32 to vector<4x128xf32>
      %244 = arith.mulf %240, %243 : vector<4x128xf32>
      %cst_105 = arith.constant 0.000000e+00 : f32
      %245 = vector.broadcast %cst_105 : f32 to vector<4x128xf32>
      %246 = arith.cmpf oge, %244, %245 : vector<4x128xf32>
      %cst_106 = arith.constant 1.000000e+00 : f32
      %cst_107 = arith.constant -1.000000e+00 : f32
      %247 = vector.broadcast %cst_106 : f32 to vector<4x128xf32>
      %248 = vector.broadcast %cst_107 : f32 to vector<4x128xf32>
      %249 = arith.select %246, %247, %248 : vector<4x128xi1>, vector<4x128xf32>
      %250 = math.absf %244 : vector<4x128xf32>
      %cst_108 = arith.constant 0.327591091 : f32
      %251 = vector.broadcast %cst_108 : f32 to vector<4x128xf32>
      %252 = arith.mulf %251, %250 : vector<4x128xf32>
      %cst_109 = arith.constant 1.000000e+00 : f32
      %253 = vector.broadcast %cst_109 : f32 to vector<4x128xf32>
      %254 = arith.addf %253, %252 : vector<4x128xf32>
      %cst_110 = arith.constant 1.000000e+00 : f32
      %255 = vector.broadcast %cst_110 : f32 to vector<4x128xf32>
      %256 = arith.divf %255, %254 : vector<4x128xf32>
      %cst_111 = arith.constant 1.06140542 : f32
      %257 = vector.broadcast %cst_111 : f32 to vector<4x128xf32>
      %258 = arith.mulf %257, %256 : vector<4x128xf32>
      %cst_112 = arith.constant -1.45315206 : f32
      %259 = vector.broadcast %cst_112 : f32 to vector<4x128xf32>
      %260 = arith.addf %258, %259 : vector<4x128xf32>
      %261 = arith.mulf %260, %256 : vector<4x128xf32>
      %cst_113 = arith.constant 1.42141378 : f32
      %262 = vector.broadcast %cst_113 : f32 to vector<4x128xf32>
      %263 = arith.addf %261, %262 : vector<4x128xf32>
      %264 = arith.mulf %263, %256 : vector<4x128xf32>
      %cst_114 = arith.constant -0.284496725 : f32
      %265 = vector.broadcast %cst_114 : f32 to vector<4x128xf32>
      %266 = arith.addf %264, %265 : vector<4x128xf32>
      %267 = arith.mulf %266, %256 : vector<4x128xf32>
      %cst_115 = arith.constant 0.254829586 : f32
      %268 = vector.broadcast %cst_115 : f32 to vector<4x128xf32>
      %269 = arith.addf %267, %268 : vector<4x128xf32>
      %270 = arith.mulf %269, %256 : vector<4x128xf32>
      %cst_116 = arith.constant 0.000000e+00 : f32
      %271 = vector.broadcast %cst_116 : f32 to vector<4x128xf32>
      %272 = arith.subf %271, %250 : vector<4x128xf32>
      %273 = arith.mulf %272, %250 : vector<4x128xf32>
      %274 = math.exp %273 : vector<4x128xf32>
      %275 = arith.mulf %270, %274 : vector<4x128xf32>
      %cst_117 = arith.constant 1.000000e+00 : f32
      %276 = vector.broadcast %cst_117 : f32 to vector<4x128xf32>
      %277 = arith.subf %276, %275 : vector<4x128xf32>
      %278 = arith.mulf %249, %277 : vector<4x128xf32>
      %cst_118 = arith.constant 1.000000e+00 : f32
      %279 = vector.broadcast %cst_118 : f32 to vector<4x128xf32>
      %280 = arith.addf %279, %278 : vector<4x128xf32>
      %281 = arith.mulf %242, %280 : vector<4x128xf32>
      %c0_119 = arith.constant 0 : index
      %c0_120 = arith.constant 0 : index
      %282 = vector.load %arg24[%c0_119, %c0_120] : memref<128x8xf32, #tpu.memory_space<vmem>>, vector<128x8xf32>
      %cst_121 = arith.constant dense<0.000000e+00> : vector<4x8xf32>
      %283 = tpu.matmul %281, %282, %cst_121 {dimension_numbers = #tpu.dot_dimension_numbers<[1], [0], [0], [1], [0, 0, 1, 1], [], []>} : vector<4x128xf32>, vector<128x8xf32>, vector<4x8xf32> -> vector<4x8xf32>
      %c0_122 = arith.constant 0 : index
      %c0_123 = arith.constant 0 : index
      %284 = vector.load %arg25[%c0_122, %c0_123] : memref<1x8xf32, #tpu.memory_space<vmem>>, vector<1x8xf32>
      %285 = vector.broadcast %284 : vector<1x8xf32> to vector<4x8xf32>
      %286 = arith.addf %283, %285 : vector<4x8xf32>
      %cst_124 = arith.constant 0.000000e+00 : f32
      %287 = vector.broadcast %cst_124 : f32 to vector<4x8xf32>
      %288 = arith.maximumf %286, %287 : vector<4x8xf32>
      %289 = math.absf %286 : vector<4x8xf32>
      %cst_125 = arith.constant 0.000000e+00 : f32
      %290 = vector.broadcast %cst_125 : f32 to vector<4x8xf32>
      %291 = arith.subf %290, %289 : vector<4x8xf32>
      %292 = math.exp %291 : vector<4x8xf32>
      %cst_126 = arith.constant 1.000000e+00 : f32
      %293 = vector.broadcast %cst_126 : f32 to vector<4x8xf32>
      %294 = arith.addf %293, %292 : vector<4x8xf32>
      %295 = math.log %294 : vector<4x8xf32>
      %296 = arith.addf %288, %295 : vector<4x8xf32>
      %297 = tpu.iota {dimensions = array<i32: 1>} : vector<4x8xi32>
      %c0_i32_127 = arith.constant 0 : i32
      %298 = vector.broadcast %c0_i32_127 : i32 to vector<4x8xi32>
      %299 = arith.cmpi eq, %297, %298 : vector<4x8xi32>
      %c1_i32 = arith.constant 1 : i32
      %300 = vector.broadcast %c1_i32 : i32 to vector<4x8xi32>
      %301 = arith.cmpi eq, %297, %300 : vector<4x8xi32>
      %302 = arith.ori %299, %301 : vector<4x8xi1>
      %c7_i32 = arith.constant 7 : i32
      %303 = vector.broadcast %c7_i32 : i32 to vector<4x8xi32>
      %304 = arith.cmpi eq, %297, %303 : vector<4x8xi32>
      %305 = arith.ori %302, %304 : vector<4x8xi1>
      %c3_i32 = arith.constant 3 : i32
      %306 = vector.broadcast %c3_i32 : i32 to vector<4x8xi32>
      %307 = arith.cmpi eq, %297, %306 : vector<4x8xi32>
      %cst_128 = arith.constant 1.000000e+00 : f32
      %308 = vector.broadcast %cst_128 : f32 to vector<4x8xf32>
      %309 = arith.addf %308, %296 : vector<4x8xf32>
      %c5_i32 = arith.constant 5 : i32
      %310 = vector.broadcast %c5_i32 : i32 to vector<4x8xi32>
      %311 = arith.cmpi eq, %297, %310 : vector<4x8xi32>
      %312 = math.tanh %286 : vector<4x8xf32>
      %cst_129 = arith.constant 1.500000e+00 : f32
      %313 = vector.broadcast %cst_129 : f32 to vector<4x8xf32>
      %314 = arith.mulf %313, %312 : vector<4x8xf32>
      %cst_130 = arith.constant 5.000000e-01 : f32
      %315 = vector.broadcast %cst_130 : f32 to vector<4x8xf32>
      %316 = arith.subf %314, %315 : vector<4x8xf32>
      %c6_i32 = arith.constant 6 : i32
      %317 = vector.broadcast %c6_i32 : i32 to vector<4x8xi32>
      %318 = arith.cmpi eq, %297, %317 : vector<4x8xi32>
      %cst_131 = arith.constant 1.000000e-03 : f32
      %319 = vector.broadcast %cst_131 : f32 to vector<4x8xf32>
      %320 = arith.addf %296, %319 : vector<4x8xf32>
      %321 = arith.select %318, %320, %296 : vector<4x8xi1>, vector<4x8xf32>
      %322 = arith.select %311, %316, %321 : vector<4x8xi1>, vector<4x8xf32>
      %323 = arith.select %307, %309, %322 : vector<4x8xi1>, vector<4x8xf32>
      %324 = arith.select %305, %286, %323 : vector<4x8xi1>, vector<4x8xf32>
      %c0_132 = arith.constant 0 : index
      %c0_133 = arith.constant 0 : index
      %325 = vector.load %arg26[%c0_132, %c0_133] : memref<4x8xf32, #tpu.memory_space<vmem>>, vector<4x8xf32>
      tpu.vector_store %arg26[%c0_132, %c0_133], %324 {strides = array<i32>} : memref<4x8xf32, #tpu.memory_space<vmem>>, vector<4x8xf32>,
    } else {
    }
    return
  }
  func.func @transform_0(%arg0: i32) -> (i32, i32) {
    %c0_i32 = arith.constant 0 : i32
    %c0_i32_0 = arith.constant 0 : i32
    %c0_i32_1 = arith.constant 0 : i32
    return %c0_i32, %c0_i32_0 : i32, i32
  }
  func.func @transform_1(%arg0: i32) -> (i32, i32) {
    %c0_i32 = arith.constant 0 : i32
    %c0_i32_0 = arith.constant 0 : i32
    %c0_i32_1 = arith.constant 0 : i32
    return %c0_i32, %c0_i32_0 : i32, i32
  }
  func.func @transform_2(%arg0: i32) -> (i32, i32) {
    %c0_i32 = arith.constant 0 : i32
    %c0_i32_0 = arith.constant 0 : i32
    %c0_i32_1 = arith.constant 0 : i32
    return %c0_i32, %c0_i32_0 : i32, i32
  }
  func.func @transform_3(%arg0: i32) -> (i32, i32) {
    %c0_i32 = arith.constant 0 : i32
    %c0_i32_0 = arith.constant 0 : i32
    %c0_i32_1 = arith.constant 0 : i32
    return %c0_i32, %c0_i32_0 : i32, i32
  }
  func.func @transform_4(%arg0: i32) -> (i32, i32) {
    %c0_i32 = arith.constant 0 : i32
    %c0_i32_0 = arith.constant 0 : i32
    %c0_i32_1 = arith.constant 0 : i32
    return %c0_i32, %c0_i32_0 : i32, i32
  }
  func.func @transform_5(%arg0: i32) -> (i32, i32) {
    %c0_i32 = arith.constant 0 : i32
    %c0_i32_0 = arith.constant 0 : i32
    %c0_i32_1 = arith.constant 0 : i32
    return %c0_i32, %c0_i32_0 : i32, i32
  }
  func.func @transform_6(%arg0: i32) -> (i32, i32) {
    %c0_i32 = arith.constant 0 : i32
    %c0_i32_0 = arith.constant 0 : i32
    %c0_i32_1 = arith.constant 0 : i32
    return %c0_i32, %c0_i32_0 : i32, i32
  }
  func.func @transform_7(%arg0: i32) -> (i32, i32, i32) {
    %c0_i32 = arith.constant 0 : i32
    %c0_i32_0 = arith.constant 0 : i32
    %c0_i32_1 = arith.constant 0 : i32
    return %arg0, %c0_i32, %c0_i32_0 : i32, i32, i32
  }
  func.func @transform_8(%arg0: i32) -> (i32, i32, i32) {
    %c0_i32 = arith.constant 0 : i32
    %c0_i32_0 = arith.constant 0 : i32
    %c0_i32_1 = arith.constant 0 : i32
    return %arg0, %c0_i32, %c0_i32_0 : i32, i32, i32
  }
  func.func @transform_9(%arg0: i32) -> (i32, i32, i32) {
    %c0_i32 = arith.constant 0 : i32
    %c0_i32_0 = arith.constant 0 : i32
    %c0_i32_1 = arith.constant 0 : i32
    return %arg0, %c0_i32, %c0_i32_0 : i32, i32, i32
  }
  func.func @transform_10(%arg0: i32) -> (i32, i32, i32) {
    %c0_i32 = arith.constant 0 : i32
    %c0_i32_0 = arith.constant 0 : i32
    %c0_i32_1 = arith.constant 0 : i32
    return %arg0, %c0_i32, %c0_i32_0 : i32, i32, i32
  }
  func.func @transform_11(%arg0: i32) -> (i32, i32, i32) {
    %c0_i32 = arith.constant 0 : i32
    %c0_i32_0 = arith.constant 0 : i32
    %c0_i32_1 = arith.constant 0 : i32
    return %arg0, %c0_i32, %c0_i32_0 : i32, i32, i32
  }
  func.func @transform_12(%arg0: i32) -> (i32, i32, i32) {
    %c0_i32 = arith.constant 0 : i32
    %c0_i32_0 = arith.constant 0 : i32
    %c0_i32_1 = arith.constant 0 : i32
    return %arg0, %c0_i32, %c0_i32_0 : i32, i32, i32
  }
  func.func @transform_13(%arg0: i32) -> (i32, i32, i32) {
    %c0_i32 = arith.constant 0 : i32
    %c0_i32_0 = arith.constant 0 : i32
    %c0_i32_1 = arith.constant 0 : i32
    return %arg0, %c0_i32, %c0_i32_0 : i32, i32, i32
  }
  func.func @transform_14(%arg0: i32) -> (i32, i32, i32) {
    %c0_i32 = arith.constant 0 : i32
    %c0_i32_0 = arith.constant 0 : i32
    %c0_i32_1 = arith.constant 0 : i32
    return %arg0, %c0_i32, %c0_i32_0 : i32, i32, i32
  }
  func.func @transform_15(%arg0: i32) -> (i32, i32, i32) {
    %c0_i32 = arith.constant 0 : i32
    %c0_i32_0 = arith.constant 0 : i32
    %c0_i32_1 = arith.constant 0 : i32
    return %arg0, %c0_i32, %c0_i32_0 : i32, i32, i32
  }
  func.func @transform_16(%arg0: i32) -> (i32, i32, i32) {
    %c0_i32 = arith.constant 0 : i32
    %c0_i32_0 = arith.constant 0 : i32
    %c0_i32_1 = arith.constant 0 : i32
    return %arg0, %c0_i32, %c0_i32_0 : i32, i32, i32
  }
  func.func @transform_17(%arg0: i32) -> (i32, i32, i32) {
    %c0_i32 = arith.constant 0 : i32
    %c0_i32_0 = arith.constant 0 : i32
    %c0_i32_1 = arith.constant 0 : i32
    return %arg0, %c0_i32, %c0_i32_0 : i32, i32, i32
  }
  func.func @transform_18(%arg0: i32) -> (i32, i32, i32) {
    %c0_i32 = arith.constant 0 : i32
    %c0_i32_0 = arith.constant 0 : i32
    %c0_i32_1 = arith.constant 0 : i32
    return %arg0, %c0_i32, %c0_i32_0 : i32, i32, i32
  }
  func.func @transform_19(%arg0: i32) -> (i32, i32) {
    %c0_i32 = arith.constant 0 : i32
    %c0_i32_0 = arith.constant 0 : i32
    %c0_i32_1 = arith.constant 0 : i32
    return %c0_i32, %c0_i32_0 : i32, i32
  }
  func.func @transform_20(%arg0: i32) -> (i32, i32) {
    %c0_i32 = arith.constant 0 : i32
    %c0_i32_0 = arith.constant 0 : i32
    %c0_i32_1 = arith.constant 0 : i32
    return %c0_i32, %c0_i32_0 : i32, i32
  }
  func.func @transform_21(%arg0: i32) -> (i32, i32) {
    %c0_i32 = arith.constant 0 : i32
    %c0_i32_0 = arith.constant 0 : i32
    %c0_i32_1 = arith.constant 0 : i32
    return %c0_i32, %c0_i32_0 : i32, i32
  }
  func.func @transform_22(%arg0: i32) -> (i32, i32) {
    %c0_i32 = arith.constant 0 : i32
    %c0_i32_0 = arith.constant 0 : i32
    %c0_i32_1 = arith.constant 0 : i32
    return %c0_i32, %c0_i32_0 : i32, i32
  }
  func.func @transform_23(%arg0: i32) -> (i32, i32) {
    %c0_i32 = arith.constant 0 : i32
    %c0_i32_0 = arith.constant 0 : i32
    %c0_i32_1 = arith.constant 0 : i32
    return %c0_i32, %c0_i32_0 : i32, i32
  }
  func.func @transform_24(%arg0: i32) -> (i32, i32) {
    %c0_i32 = arith.constant 0 : i32
    %c0_i32_0 = arith.constant 0 : i32
    %c0_i32_1 = arith.constant 0 : i32
    return %c0_i32, %c0_i32_0 : i32, i32
  }
  func.func @transform_25(%arg0: i32) -> (i32, i32) {
    %c0_i32 = arith.constant 0 : i32
    %c0_i32_0 = arith.constant 0 : i32
    %c0_i32_1 = arith.constant 0 : i32
    return %c0_i32, %c0_i32_0 : i32, i32
  }
}

</mosaic_0001>

<bundles_post_ra>
// kernel: tpu_custom_call.1
= control target key start
LH: loop header
LB: loop body
LE: loop exit
PB: predicated region body
PF: predicated region fallthrough
CT: control target
= control target key end

     0   :  { %s7818_s0 = inlined_call_operand.vmem [shape: f32[32,16], index: 0, kind: input, shape index: {}]   ;;  %s7819_s1 = inlined_call_operand.vmem [shape: f32[16,128], index: 1, kind: input, shape index: {}]   ;;  %s7820_s2 = inlined_call_operand.vmem [shape: f32[1,128], index: 2, kind: input, shape index: {}]   ;;  %s7821_s3 = inlined_call_operand.vmem [shape: f32[1,128], index: 3, kind: input, shape index: {}]   ;;  %s7822_s4 = inlined_call_operand.vmem [shape: f32[1,128], index: 4, kind: input, shape index: {}]   ;;  %s7823_s5 = inlined_call_operand.vmem [shape: f32[32,128], index: 5, kind: input, shape index: {}]   ;;  %s7824_s6 = inlined_call_operand.<no memory space> [shape: f32[1,1], index: 6, kind: input, shape index: {}]   ;;  %s7825_s7 = inlined_call_operand.hbm [shape: f32[3,128,384], index: 7, kind: input, shape index: {}]   ;;  %s7826_s8 = inlined_call_operand.vmem [shape: f32[3,1,384], index: 8, kind: input, shape index: {}]   ;;  %s7827_s9 = inlined_call_operand.hbm [shape: f32[3,128,128], index: 9, kind: input, shape index: {}]   ;;  %s7828_s10 = inlined_call_operand.vmem [shape: f32[3,1,128], index: 10, kind: input, shape index: {}]   ;;  %s7829_s11 = inlined_call_operand.vmem [shape: f32[3,1,128], index: 11, kind: input, shape index: {}]   ;;  %s7830_s12 = inlined_call_operand.vmem [shape: f32[3,1,128], index: 12, kind: input, shape index: {}]   ;;  %s7831_s13 = inlined_call_operand.hbm [shape: f32[3,128,256], index: 13, kind: input, shape index: {}]   ;;  %s7832_s14 = inlined_call_operand.vmem [shape: f32[3,1,256], index: 14, kind: input, shape index: {}]   ;;  %s7833_s15 = inlined_call_operand.hbm [shape: f32[3,256,128], index: 15, kind: input, shape index: {}]   ;;  %s7834_s16 = inlined_call_operand.vmem [shape: f32[3,1,128], index: 16, kind: input, shape index: {}]   ;;  %s7835_s17 = inlined_call_operand.vmem [shape: f32[3,1,128], index: 17, kind: input, shape index: {}]   ;;  %s7836_s18 = inlined_call_operand.vmem [shape: f32[3,1,128], index: 18, kind: input, shape index: {}]   ;;  %s7837_s19 = inlined_call_operand.vmem [shape: f32[1,128], index: 19, kind: input, shape index: {}]   ;;  %s7838_s20 = inlined_call_operand.<no memory space> [shape: f32[1,1], index: 20, kind: input, shape index: {}]   ;;  %s7839_s21 = inlined_call_operand.vmem [shape: f32[128,128], index: 21, kind: input, shape index: {}]   ;;  %s7840_s22 = inlined_call_operand.vmem [shape: f32[1,128], index: 22, kind: input, shape index: {}]   ;;  %s7841_s23 = inlined_call_operand.vmem [shape: f32[128,8], index: 23, kind: input, shape index: {}]   ;;  %s7842_s24 = inlined_call_operand.vmem [shape: f32[1,8], index: 24, kind: input, shape index: {}]   ;;  %s7843_s25 = inlined_call_operand.hbm [shape: f32[4,8], index: 25, kind: output, shape index: {}]  }
   0x1   :  { %7860 = sst [smem:[#allocation22_spill]] %s7818_s0 }
   0x2   :  { %7861 = sst [smem:[#allocation23_spill]] %s7819_s1 }
   0x3   :  { %7862 = sst [smem:[#allocation24_spill]] %s7820_s2 }
   0x4   :  { %7863 = sst [smem:[#allocation25_spill]] %s7821_s3 }
   0x5   :  { %7864 = sst [smem:[#allocation26_spill]] %s7822_s4 }
   0x6   :  { %7865 = sst [smem:[#allocation27_spill]] %s7823_s5 }
   0x7   :  { %7866 = sst [smem:[#allocation28_spill]] %s7824_s6 }
   0x8   :  { %7867 = sst [smem:[#allocation29_spill]] %s7825_s7 }
   0x9   :  { %7868 = sst [smem:[#allocation30_spill]] %s7826_s8 }
   0xa   :  { %7869 = sst [smem:[#allocation31_spill]] %s7827_s9 }
   0xb   :  { %7870 = sst [smem:[#allocation32_spill]] %s7831_s13 }
   0xc   :  { %7871 = sst [smem:[#allocation33_spill]] %s7833_s15 }
   0xd   :  { %7872 = sst [smem:[#allocation34_spill]] %s7837_s19 }
   0xe   :  { %7873 = sst [smem:[#allocation35_spill]] %s7839_s21 }
   0xf   :  { %7874 = sst [smem:[#allocation36_spill]] %s7840_s22 }
  0x10   :  { %7875 = sst [smem:[#allocation37_spill]] %s7841_s23 }
  0x11   :  { %7876 = sst [smem:[#allocation38_spill]] %s7842_s24 }
  0x12   :  { %7877 = sst [smem:[#allocation39_spill]] %s7843_s25 }
  0x13   :  { %s7878_s6 = sld [smem:[#allocation28_spill]] }
  0x14   :  { %31 = sst [smem:[#allocation4]] %s7838_s20 }
  0x19   :  { %30 = sst [smem:[#allocation3]] %s7878_s6 }
  0x1a   :  { %32 = vsyncpa [#allocation6], 0 }
  0x1b   :  { %34 = vsyncpa [#allocation6 + $0x1], 0 }
  0x1c   :  { %35 = vsyncpa [#allocation9], 0 }
  0x1d   :  { %37 = vsyncpa [#allocation9 + $0x1], 0 }
  0x1e   :  { %38 = vsyncpa [#allocation12], 0 }
  0x1f   :  { %40 = vsyncpa [#allocation12 + $0x1], 0 }
  0x20   :  { %41 = vsyncpa [#allocation7], 0  ;;  %s6681_s3 = smov 0   ;;  %s6683_s26 = smov 0  }
  0x21   :  { %s6685_s1 = smov 0   ;;  %s6687_s8 = smov 0  }
  0x22 LB: > { %7879 = sst [smem:[#allocation18_spill]] %s6515_s26  ;;  %s6700_s20 = sadd.s32 4294967295, %s6523_s8   ;;  %s6523_s8 = sphi %s6687_s8, %s7913_s8   ;;  %s6519_s1 = sphi %s6685_s1, %s7916_s1   ;;  %s6515_s26 = sphi %s6683_s26, %s7915_s26   ;;  %s6511_s3 = sphi %s6681_s3, %s7914_s3  }
  0x23   : > { %7880 = sst [smem:[#allocation19_spill]] %s6519_s1  ;;  %s6703_s27 = sadd.s32 1, %s6523_s8  }
  0x24   : > { %7881 = sst [smem:[#allocation20_spill]] %s6703_s27  ;;  %s198_s4 = ssub.s32 %s6523_s8, %s6703_s27 }
  0x25   : > { %s201_s28 = sadd.s32 1, %s6519_s1  ;;  %p199_p0 = scmp.eq.s32.totalorder %s198_s4, 0 }
  0x26   : > { %p208_p1 = scmp.ne.s32.totalorder %s6519_s1, %s6515_s26  ;;  %p209_p2 = scmp.eq.s32.totalorder %s6523_s8, 0 }
  0x27   : > { %p214_p3 = scmp.ne.s32.totalorder %s6515_s26, %s6511_s3  ;;  %p215_p5 = scmp.eq.s32.totalorder %s6700_s20, 0 }
  0x28   : > { %s6713_s9 = scalar_select %p199_p0, %s6519_s1, %s201_s28  }
  0x29   : > { %p210_p4 = por %p209_p2, %p208_p1  ;;  %p6110_p6 = scmp.lt.s32.totalorder %s6523_s8, 3 }
  0x2a   : > { %7882 = sst [smem:[#allocation21_spill]] %s6713_s9  ;;  %p6717_p7 = por %p215_p5, %p214_p3 }
  0x2b   : > { %s6722_s0 = sand.u32 1, %s6519_s1   ;;  %p6724_p8 = pnand %p6110_p6, %p210_p4 }
  0x2c   : > { %s7883_s5 = scalar_select %p6717_p7, 1, 0 }
  0x2d   : > { %s738_s2 = sand.u32 1, %s6523_s8   ;;  %s5453_s6 = sshll.u32 %s6722_s0, 7 }
  0x2e   : > { %s5538_s30 = sshll.u32 %s6523_s8, 11  ;;  %s742_s7 = scalar_lea.vmem [#allocation8], %s5453_s6 }
  0x2f   : > { %s749_s3 = sshll.u32 %s742_s7, 4  ;;  %s7885_s9 = sld [smem:[#allocation31_spill]]  ;;  %s6736_s3 = int_to_ptr.vmem [resolvable:$true] %s749_s3 }
  0x30   : > { %s6738_s1 = scalar_lea.sflag [#allocation9], %s738_s2  ;;  %p6744_p10 = pneg %p6724_p8 }
  0x35   : > { %s6734_s27 = scalar_lea.hbm %s7885_s9, %s5538_s30  ;;  %s6346_s7 = scalar_lea.hbm %s7885_s9, 6144 }
  0x36   : > { %s6341_s25 = scalar_lea.hbm %s6734_s27, 2048  ;;  %p6347_p13 = scmp.lt.s32.totalorder %s6734_s27, %s7885_s9 }
  0x37   : > { %p6342_p9 = scmp.ne.s32.totalorder %s6734_s27, %s6341_s25  ;;  %p6348_p0 = scmp.lt.s32.totalorder %s6346_s7, %s6341_s25 }
  0x39   : > { %p6344_p11 = pnand %p6744_p10, %p6342_p9  ;;  %p6349_p1 = por %p6348_p0, %p6347_p13 }
  0x3b   : > { %p6345_p12 = pneg %p6344_p11 }
  0x3d   : > { %p6350_p2 = pnand %p6349_p1, %p6345_p12 }
  0x3f   : > { %6353 = shalt.err (!%p6350_p2)
}
  0x40   : > { %s6354_s2 = scalar_lea.vmem %s6736_s3, 2048  ;;  %s6525_s22 = smov [#allocation8]  }
  0x41   : > { %p6355_p3 = scmp.ne.s32.totalorder %s6736_s3, %s6354_s2  ;;  %s6359_s6 = sshll.u32 %s6525_s22, 4  ;;  %s6360_s6 = int_to_ptr.vmem [resolvable:$false] %s6359_s6 }
  0x42   : > { %s6361_s30 = scalar_lea.vmem %s6360_s6, 4096  ;;  %p6362_p6 = scmp.lt.s32.totalorder %s6736_s3, %s6360_s6 }
  0x43   : > { %p6357_p4 = pnand %p6355_p3, %p6744_p10  ;;  %p6363_p9 = scmp.lt.s32.totalorder %s6361_s30, %s6354_s2 }
  0x45   : > { %p6358_p5 = pneg %p6357_p4  ;;  %p6364_p11 = por %p6363_p9, %p6362_p6 }
  0x47   : > { %p6365_p7 = pnand %p6364_p11, %p6358_p5 }
  0x49   : > { %6368 = shalt.err (!%p6365_p7)
}
  0x4a   : > { %s7856_s25 = smov 128   ;;  %s7857_s7 = smov 8  }
  0x4b   : > { %6103 = dma.hbm_to_vmem [thread:$0]  (!%p6724_p8), %s6734_s27, 2048, %s6736_s3, %s6738_s1, %s7856_s25, %s7856_s25, %s7857_s7  }
  0x4c   : > { %p5462_p12 = scmp.ge.s32.totalorder %s6523_s8, 1  ;;  %p842_p13 = scmp.lt.s32.totalorder %s6523_s8, 4 }
  0x4d   : > { %s6081_s22 = smul.u32 384, %s6722_s0  ;;  %s7888_s30 = sld [smem:[#allocation29_spill]] }
  0x4e   : > { %p6773_p7 = pnand %p5462_p12, %p842_p13  ;;  %s6082_s28 = smul.u32 6144, %s6523_s8 }
  0x4f   : > { %s714_s23 = scalar_lea.vmem [#allocation5], %s6081_s22  ;;  %s711_s27 = scalar_lea.sflag [#allocation6], %s6722_s0 }
  0x50   : > { %s7887_s4 = scalar_select %p6773_p7, 1, 0 }
  0x51   : > { %s721_s21 = sshll.u32 %s714_s23, 4  ;;  %s6783_s21 = int_to_ptr.vmem [resolvable:$true] %s721_s21 }
  0x53   : > { %s6781_s9 = scalar_lea.hbm %s7888_s30, %s6082_s28  ;;  %s6374_s19 = scalar_lea.hbm %s7888_s30, 18432 }
  0x54   : > { %s6369_s3 = scalar_lea.hbm %s6781_s9, 6144  ;;  %p6375_p3 = scmp.lt.s32.totalorder %s6781_s9, %s7888_s30 }
  0x55   : > { %p6370_p0 = scmp.ne.s32.totalorder %s6781_s9, %s6369_s3  ;;  %p6376_p4 = scmp.lt.s32.totalorder %s6374_s19, %s6369_s3 }
  0x57   : > { %p6372_p1 = pnand %p6370_p0, %p6744_p10  ;;  %p6377_p5 = por %p6376_p4, %p6375_p3 }
  0x59   : > { %p6373_p2 = pneg %p6372_p1 }
  0x5b   : > { %p6378_p6 = pnand %p6377_p5, %p6373_p2 }
  0x5d   : > { %6381 = shalt.err (!%p6378_p6)
}
  0x5e   : > { %s6382_s23 = scalar_lea.vmem %s6783_s21, 6144  ;;  %s6528_s22 = smov [#allocation5]  }
  0x5f   : > { %p6383_p9 = scmp.ne.s32.totalorder %s6783_s21, %s6382_s23  ;;  %s6387_s25 = sshll.u32 %s6528_s22, 4  ;;  %s6388_s25 = int_to_ptr.vmem [resolvable:$false] %s6387_s25 }
  0x60   : > { %s6389_s7 = scalar_lea.vmem %s6388_s25, 12288  ;;  %p6390_p13 = scmp.lt.s32.totalorder %s6783_s21, %s6388_s25 }
  0x61   : > { %p6385_p11 = pnand %p6383_p9, %p6744_p10  ;;  %p6391_p0 = scmp.lt.s32.totalorder %s6389_s7, %s6382_s23 }
  0x63   : > { %p6386_p12 = pneg %p6385_p11  ;;  %p6392_p1 = por %p6391_p0, %p6390_p13 }
  0x65   : > { %p6393_p7 = pnand %p6392_p1, %p6386_p12 }
  0x67   : > { %6396 = shalt.err (!%p6393_p7)
}
  0x68   : > { %s6529_s19 = smov 384   ;;  %s6530_s6 = smov 24  }
  0x69   : > { %6100 = dma.hbm_to_vmem [thread:$0]  (!%p6724_p8), %s6781_s9, 6144, %s6783_s21, %s711_s27, %s6529_s19, %s6529_s19, %s6530_s6  }
  0x6a   : > { %s5456_s3 = sshll.u32 %s6722_s0, 8  ;;  %s5539_s2 = sshll.u32 %s6523_s8, 12 }
  0x6b   : > { %s7889_s13 = sld [smem:[#allocation32_spill]]  ;;  %s781_s25 = scalar_lea.vmem [#allocation10], %s5456_s3 }
  0x6c   : > { %s788_s7 = sshll.u32 %s781_s25, 4  ;;  %s6819_s7 = int_to_ptr.vmem [resolvable:$true] %s788_s7 }
  0x71   : > { %s6815_s22 = scalar_lea.hbm %s7889_s13, %s5539_s2  ;;  %s6402_s27 = scalar_lea.hbm %s7889_s13, 12288 }
  0x72   : > { %s6397_s30 = scalar_lea.hbm %s6815_s22, 4096  ;;  %p6403_p4 = scmp.lt.s32.totalorder %s6815_s22, %s7889_s13 }
  0x73   : > { %p6398_p7 = scmp.ne.s32.totalorder %s6815_s22, %s6397_s30  ;;  %p6404_p5 = scmp.lt.s32.totalorder %s6402_s27, %s6397_s30 }
  0x75   : > { %p6400_p2 = pnand %p6398_p7, %p6744_p10  ;;  %p6405_p6 = por %p6404_p5, %p6403_p4 }
  0x77   : > { %p6401_p3 = pneg %p6400_p2 }
  0x79   : > { %p6406_p9 = pnand %p6405_p6, %p6401_p3 }
  0x7b   : > { %6409 = shalt.err (!%p6406_p9)
}
  0x7c   : > { %s6410_s28 = scalar_lea.vmem %s6819_s7, 4096  ;;  %s6531_s23 = smov [#allocation10]  }
  0x7d   : > { %p6411_p11 = scmp.ne.s32.totalorder %s6819_s7, %s6410_s28  ;;  %s6415_s25 = sshll.u32 %s6531_s23, 4  ;;  %s6416_s25 = int_to_ptr.vmem [resolvable:$false] %s6415_s25 }
  0x7e   : > { %s6417_s21 = scalar_lea.vmem %s6416_s25, 8192  ;;  %p6418_p0 = scmp.lt.s32.totalorder %s6819_s7, %s6416_s25 }
  0x7f   : > { %p6413_p12 = pnand %p6411_p11, %p6744_p10  ;;  %p6419_p1 = scmp.lt.s32.totalorder %s6417_s21, %s6410_s28 }
  0x81   : > { %p6414_p13 = pneg %p6413_p12  ;;  %p6420_p7 = por %p6419_p1, %p6418_p0 }
  0x83   : > { %p6421_p2 = pnand %p6420_p7, %p6414_p13 }
  0x85   : > { %6424 = shalt.err (!%p6421_p2)
}
  0x86   : > { %s6532_s30 = smov 256   ;;  %s6533_s9 = smov 16  }
  0x87   : > { %6106 = dma.hbm_to_vmem [thread:$0]  (!%p6724_p8), %s6815_s22, 4096, %s6819_s7, %s6738_s1, %s6532_s30, %s6532_s30, %s6533_s9  }
  0x88   : > { %s7890_s15 = sld [smem:[#allocation33_spill]]  ;;  %s809_s28 = scalar_lea.vmem [#allocation11], %s5456_s3 }
  0x89   : > { %s816_s23 = sshll.u32 %s809_s28, 4  ;;  %s806_s25 = scalar_lea.sflag [#allocation12], %s6722_s0  ;;  %s6851_s23 = int_to_ptr.vmem [resolvable:$true] %s816_s23 }
  0x8e   : > { %s6847_s6 = scalar_lea.hbm %s7890_s15, %s5539_s2  ;;  %s6430_s22 = scalar_lea.hbm %s7890_s15, 12288 }
  0x8f   : > { %s6425_s21 = scalar_lea.hbm %s6847_s6, 4096  ;;  %p6431_p6 = scmp.lt.s32.totalorder %s6847_s6, %s7890_s15 }
  0x90   : > { %p6426_p3 = scmp.ne.s32.totalorder %s6847_s6, %s6425_s21  ;;  %p6432_p9 = scmp.lt.s32.totalorder %s6430_s22, %s6425_s21 }
  0x92   : > { %p6428_p4 = pnand %p6426_p3, %p6744_p10  ;;  %p6433_p11 = por %p6432_p9, %p6431_p6 }
  0x94   : > { %p6429_p5 = pneg %p6428_p4 }
  0x96   : > { %p6434_p12 = pnand %p6433_p11, %p6429_p5 }
  0x98   : > { %6437 = shalt.err (!%p6434_p12)
}
  0x99   : > { %s6438_s0 = scalar_lea.vmem %s6851_s23, 4096  ;;  %s6534_s3 = smov [#allocation11]  }
  0x9a   : > { %p6439_p13 = scmp.ne.s32.totalorder %s6851_s23, %s6438_s0  ;;  %s6443_s30 = sshll.u32 %s6534_s3, 4  ;;  %s6444_s30 = int_to_ptr.vmem [resolvable:$false] %s6443_s30 }
  0x9b   : > { %s6445_s9 = scalar_lea.vmem %s6444_s30, 8192  ;;  %p6446_p7 = scmp.lt.s32.totalorder %s6851_s23, %s6444_s30 }
  0x9c   : > { %p6441_p0 = pnand %p6439_p13, %p6744_p10  ;;  %p6447_p2 = scmp.lt.s32.totalorder %s6445_s9, %s6438_s0 }
  0x9e   : > { %p6442_p1 = pneg %p6441_p0  ;;  %p6448_p3 = por %p6447_p2, %p6446_p7 }
  0xa0   : > { %p6449_p4 = pnand %p6448_p3, %p6442_p1 }
  0xa2   : > { %6452 = shalt.err (!%p6449_p4)
}
  0xa3   : > { %s7891_s27 = smov 8   ;;  %s7892_s19 = smov 128  }
  0xa4   : > { %6109 = dma.hbm_to_vmem [thread:$0]  (!%p6724_p8), %s6847_s6, 4096, %s6851_s23, %s806_s25, %s7892_s19, %s7892_s19, %s7891_s27  }
  0xa5   : > { %p7893_p10 = scmp.ne.s32.totalorder %s7887_s4, 0 }
  0xa6   : > { %s848_s24 = sand.u32 (!%p7893_p10), 1, %s6515_s26   ;;  %p7894_p5 = scmp.ne.s32.totalorder (!%p7893_p10), %s7883_s5, 0 }
  0xa7   : > { %846 = sbr.rel (%p7893_p10) target bundleno = 5524 (0x1594), region = 120  ;;  %s849_s21 = scalar_lea.sflag (!%p7893_p10), [#allocation6], %s848_s24 }
  0xa8   : > { %s6083_s28 = smul.u32 (!%p7893_p10), 384, %s848_s24 }
  0xaa   : > { %s6880_s1 = scalar_lea.vmem (!%p7893_p10), [#allocation5], %s6083_s28 }
  0xac   : > { %6494 = dma.done.wait (%p7894_p5), %s849_s21, 6144  }
  0xad   : > { %6496 = vsyncadd (%p7894_p5), %s849_s21, 4294961152  ;;  %s857_s29 = sand.u32 1, %s6700_s20   ;;  %s5463_s8 = sshll.u32 %s848_s24, 7 }
  0xae   : > { %s858_s6 = scalar_lea.sflag [#allocation9], %s857_s29  ;;  %s6887_s23 = scalar_lea.vmem [#allocation8], %s5463_s8 }
  0xaf   : > { %6498 = dma.done.wait (%p7894_p5), %s858_s6, 6144  }
  0xb0   : > { %6500 = vsyncadd (%p7894_p5), %s858_s6, 4294961152  ;;  %s5464_s4 = sshll.u32 %s848_s24, 8  ;;  %s876_s22 = scalar_lea.sflag [#allocation12], %s848_s24 }
  0xb1   : > { %s6893_s25 = scalar_lea.vmem [#allocation10], %s5464_s4  ;;  %s6895_s2 = scalar_lea.vmem [#allocation11], %s5464_s4 }
  0xb2   : > { %6502 = dma.done.wait (%p7894_p5), %s876_s22, 4096  }
  0xb3   : > { %6504 = vsyncadd (%p7894_p5), %s876_s22, 4294963200  ;;  %p982_p8 = scmp.lt.s32.totalorder %s6700_s20, 2  ;;  %s7895_s6 = sld [smem:[#allocation30_spill]] }
  0xb4   : > { %p5467_p6 = scmp.ne.s32.totalorder %s6700_s20, 0 }
  0xb5   : > { %s6903_s7 = scalar_select %p982_p8, %s6700_s20, 2 }
  0xb6   : > { %1011 = sbr.rel (%p5467_p6) target bundleno = 708 (0x2c4), region = 140  ;;  %s7896_s13 = sld [smem:[#allocation23_spill]] (!%p5467_p6) }
  0xb7   : > { %s6084_s0 = smul.u32 3, %s6903_s7  ;;  %s988_s9 = scalar_lea.vmem %s7828_s10, %s6903_s7 }
  0xb8   : > { %s5466_s22 = sshll.u32 %s6903_s7, 1  ;;  %s1001_s5 = scalar_lea.vmem %s7834_s16, %s6903_s7 }
  0xb9   : > { %s6921_s4 = scalar_lea.vmem %s7895_s6, %s6084_s0  ;;  %s6927_s26 = scalar_lea.vmem %s7832_s14, %s5466_s22 }
  0xba   : > { %s7897_s3 = sld [smem:[#allocation22_spill]] (!%p5467_p6) }
  0xbb   : > { %vm1025_vm0 = vcmask 130048   ;;  %s7899_s22 = sld [smem:[#allocation24_spill]] }
  0xbc   : > { %v1017_v0 = vld [vmem:[%s7896_s13 + $0x8] sm:$0xff]  ;;  %v1016_v1 = vld [vmem:[%s7896_s13] sm:$0xff]  ;;  %s7900_s28 = sld [smem:[#allocation25_spill]] }
  0xbd   : > { %5729 = vmatprep.subr.mxu0 %v1017_v0  ;;  %6045 = vmatprep.subr.mxu1 %v1017_v0  ;;  %s7901_s15 = sld [smem:[#allocation27_spill]] }
  0xbe   : > { %5730 = vmatpush3.msra.mxu0 %v1017_v0  ;;  %6047 = vmatpush3.msra.mxu1 %v1017_v0 }
  0xbf   : > { %5731 = vmatprep.subr.mxu0 %v1016_v1  ;;  %6046 = vmatprep.subr.mxu1 %v1016_v1 }
  0xc0   : > { %s7898_s30 = smov %s7897_s3  ;;  %v1012_v2 = vld [vmem:[%s7897_s3] sm:$0xff]  ;;  %5732 = vmatpush3.msra.mxu0 %v1016_v1  ;;  %6048 = vmatpush3.msra.mxu1 %v1016_v1  ;;  %s1190_s3 = sld [smem:[#allocation3]] }
  0xc1   : > { %v1014_v3 = vld [vmem:[%s7898_s30 + $0x10] sm:$0xff]  ;;  %v1013_v4 = vld [vmem:[%s7898_s30 + $0x8] sm:$0xff]  ;;  %v1015_v5 = vld [vmem:[%s7898_s30 + $0x18] sm:$0xff]  ;;  %5733 = vmatprep.mubr.msk.f32.mxu0 %vm1025_vm0, %v1012_v2 }
  0xc2   : > { %5736 = vmatprep.mubr.msk.f32.mxu1 %vm1025_vm0, %v1014_v3  ;;  %5734 = vmatmul.mubr.msk.f32.vlgmr.msra.gmra.mxu0 %vm1025_vm0, %v1013_v4  ;;  %v5468_v8 = vld [vmem:[%s7899_s22] ss:$0 sm:$0xff]  ;;  %s7902_s22 = sld [smem:[#allocation26_spill]] }
  0xc3   : > { %5737 = vmatmul.mubr.msk.f32.vlgmr.msra.gmra.mxu1 %vm1025_vm0, %v1015_v5  ;;  %v5473_v44 = vld [vmem:[%s7900_s28] ss:$0 sm:$0xff]  ;;  %v1192_v52 = vld [vmem:[%s7901_s15 + $0x8] sm:$0xff]  ;;  %v1193_v56 = vld [vmem:[%s7901_s15 + $0x10] sm:$0xff] }
  0xc4   : > { %v1191_v45 = vld [vmem:[%s7901_s15] sm:$0xff]  ;;  %v1194_v0 = vld [vmem:[%s7901_s15 + $0x18] sm:$0xff] }
  0xc6   : > { %v1195_v46 = vstv %s1190_s3 }
  0xc7   : > { %v1196_v49 = vmul.f32 %v1195_v46, %v1191_v45  ;;  %v1197_v59 = vmul.f32 %v1195_v46, %v1192_v52  ;;  %v1198_v62 = vmul.f32 %v1195_v46, %v1193_v56  ;;  %v1199_v5 = vmul.f32 %v1195_v46, %v1194_v0 }
  0xc8   : > { %v5474_v48 = vld [vmem:[%s7902_s22] ss:$0 sm:$0xff] }
 0x182   : > { %v5735_v6 = vpop.f32.mrf.mxu0 }
 0x183   : > { %v5738_v7 = vpop.f32.mrf.mxu1  ;;  %v1110_v13 = vadd.f32 %v5735_v6, %v5468_v8 }
 0x184   : > { %v1104_v9 = vpop.f32.mrf.mxu0  ;;  %v1120_v14 = vadd.f32 %v5738_v7, %v5468_v8 }
 0x185   : > { %v1114_v10 = vpop.f32.mrf.mxu1  ;;  %v1105_v11 = vadd.f32 %v5468_v8, %v1104_v9 }
 0x186   : > { %v1115_v12 = vadd.f32 %v5468_v8, %v1114_v10 }
 0x187   : > { %1125 = vadd.xlane.f32.xlu0 %v1105_v11 }
 0x188   : > { %1129 = vadd.xlane.f32.xlu1 %v1115_v12 }
 0x18b   : > { %1127 = vadd.xlane.f32.xlu0 %v1110_v13 }
 0x18c   : > { %1131 = vadd.xlane.f32.xlu1 %v1120_v14 }
 0x210   : > { %v1126_v16 = vpop.xlane.xlu0 %1125 }
 0x211   : > { %v1130_v15 = vpop.xlane.xlu1 %1129  ;;  %v1134_v18 = vmul.f32 0.0078125, %v1126_v16 }
 0x212   : > { %v1136_v17 = vmul.f32 0.0078125, %v1130_v15 }
 0x213   : > { %v1138_v19 = vsub.f32 %v1105_v11, %v1134_v18 }
 0x214   : > { %v1128_v21 = vpop.xlane.xlu0 %1127  ;;  %v1140_v22 = vsub.f32 %v1115_v12, %v1136_v17 }
 0x215   : > { %v1132_v20 = vpop.xlane.xlu1 %1131  ;;  %v1135_v24 = vmul.f32 0.0078125, %v1128_v21  ;;  %v1142_v25 = vmul.f32 %v1138_v19, %v1138_v19 }
 0x216   : > { %v1137_v23 = vmul.f32 0.0078125, %v1132_v20  ;;  %v1144_v28 = vmul.f32 %v1140_v22, %v1140_v22 }
 0x217   : > { %v1139_v26 = vsub.f32 %v1110_v13, %v1135_v24  ;;  %1146 = vadd.xlane.f32.xlu0 %v1142_v25 }
 0x218   : > { %v1141_v27 = vsub.f32 %v1120_v14, %v1137_v23 }
 0x219   : > { %v1143_v29 = vmul.f32 %v1139_v26, %v1139_v26 }
 0x21a   : > { %v1145_v30 = vmul.f32 %v1141_v27, %v1141_v27 }
 0x21b   : > { %1150 = vadd.xlane.f32.xlu0 %v1144_v28  ;;  %1148 = vadd.xlane.f32.xlu1 %v1143_v29 }
 0x21f   : > { %1152 = vadd.xlane.f32.xlu1 %v1145_v30 }
 0x2a0   : > { %v1147_v31 = vpop.xlane.xlu0 %1146 }
 0x2a1   : > { %v1154_v32 = vmul.f32 0.0078125, %v1147_v31 }
 0x2a3   : > { %v1158_v33 = vadd.f32 1e-05, %v1154_v32 }
 0x2a4   : > { %v1149_v34 = vpop.xlane.xlu1 %1148  ;;  %v1151_v35 = vpop.xlane.xlu0 %1150 }
 0x2a5   : > { %6161 = vrsqrt.f32 %v1158_v33  ;;  %v1155_v36 = vmul.f32 0.0078125, %v1149_v34  ;;  %v1156_v37 = vmul.f32 0.0078125, %v1151_v35 }
 0x2a7   : > { %v1159_v38 = vadd.f32 1e-05, %v1155_v36  ;;  %v1160_v39 = vadd.f32 1e-05, %v1156_v37 }
 0x2a8   : > { %v1153_v40 = vpop.xlane.xlu1 %1152 }
 0x2a9   : > { %6163 = vrsqrt.f32 %v1159_v38  ;;  %v1157_v41 = vmul.f32 0.0078125, %v1153_v40 }
 0x2aa   : > { %6165 = vrsqrt.f32 %v1160_v39 }
 0x2ab   : > { %v1161_v42 = vadd.f32 1e-05, %v1157_v41 }
 0x2ad   : > { %6167 = vrsqrt.f32 %v1161_v42 }
 0x2b2   : > { %v6162_v43 = vpop.eup %6161 }
 0x2b3   : > { %v1166_v47 = vmul.f32 %v6162_v43, %v1138_v19 }
 0x2b5   : > { %v1176_v50 = vmul.f32 %v5473_v44, %v1166_v47 }
 0x2b6   : > { %v6164_v51 = vpop.eup %6163 }
 0x2b7   : > { %v6166_v53 = vpop.eup %6165  ;;  %v1186_v54 = vadd.f32 %v5474_v48, %v1176_v50  ;;  %v1167_v55 = vmul.f32 %v6164_v51, %v1139_v26 }
 0x2b8   : > { %v1168_v57 = vmul.f32 %v6166_v53, %v1140_v22 }
 0x2b9   : > { %v1200_v58 = vadd.f32 %v1196_v49, %v1186_v54  ;;  %v1177_v60 = vmul.f32 %v5473_v44, %v1167_v55 }
 0x2ba   : > { %v6168_v61 = vpop.eup %6167  ;;  %v1178_v63 = vmul.f32 %v5473_v44, %v1168_v57 }
 0x2bb   : > { %1204 = vst [vmem:[#allocation2 + $0x10] sm:$0xff] %v1200_v58  ;;  %v1187_v1 = vadd.f32 %v5474_v48, %v1177_v60  ;;  %v1169_v2 = vmul.f32 %v6168_v61, %v1141_v27 }
 0x2bc   : > { %v1188_v3 = vadd.f32 %v5474_v48, %v1178_v63 }
 0x2bd   : > { %v1201_v4 = vadd.f32 %v1197_v59, %v1187_v1  ;;  %v1179_v6 = vmul.f32 %v5473_v44, %v1169_v2 }
 0x2be   : > { %v1202_v7 = vadd.f32 %v1198_v62, %v1188_v3 }
 0x2bf   : > { %1205 = vst [vmem:[#allocation2] sm:$0xff] %v1201_v4  ;;  %v1189_v8 = vadd.f32 %v5474_v48, %v1179_v6 }
 0x2c0   : > { %1206 = vst [vmem:[#allocation2 + $0x18] sm:$0xff] %v1202_v7 }
 0x2c1   : > { %v1203_v9 = vadd.f32 %v1199_v5, %v1189_v8 }
 0x2c3   : > { %1207 = vst [vmem:[#allocation2 + $0x8] sm:$0xff] %v1203_v9 }
 0x2c4 PF: > { %v1258_v10 = vld [vmem:[%s6880_s1 + $0x170] sm:$0xff]  ;;  %v1257_v11 = vld [vmem:[%s6880_s1 + $0x168] sm:$0xff]  ;;  %v1255_v12 = vld [vmem:[%s6880_s1 + $0x158] sm:$0xff]  ;;  %v6535_v14 = vmov 0.0   ;;  %vm6536_vm1 = vmmov 0   ;;  %v1262_v63 = vlaneseq  ;;  %vm1455_vm2 = vcmask 261120   ;;  %s7903_s0 = scalar_lea.vmem %s7829_s11, %s6903_s7  ;;  %s7904_s19 = scalar_lea.vmem %s7830_s12, %s6903_s7 }
 0x2c5   : > { %1277 = vmatprep.subr.mxu0 %v1258_v10  ;;  %v1254_v13 = vld [vmem:[%s6880_s1 + $0x150] sm:$0xff]  ;;  %1341 = vmatprep.mubr.f32.mxu0 %v6535_v14  ;;  %v1252_v15 = vld [vmem:[%s6880_s1 + $0x140] sm:$0xff]  ;;  %v1251_v16 = vld [vmem:[%s6880_s1 + $0x138] sm:$0xff]  ;;  %vm1760_vm3 = vcmask 64512   ;;  %s6539_s24 = smov 32   ;;  %vm4133_vm4 = vcmask 523264   ;;  %s7905_s21 = scalar_lea.vmem %s7835_s17, %s6903_s7 }
 0x2c6   : > { %1278 = vmatpush1.msra.mxu0 %v1257_v11  ;;  %v1249_v17 = vld [vmem:[%s6880_s1 + $0x128] sm:$0xff]  ;;  %v1248_v18 = vld [vmem:[%s6880_s1 + $0x120] sm:$0xff]  ;;  %v1246_v19 = vld [vmem:[%s6880_s1 + $0x110] sm:$0xff]  ;;  %v7044_v0 = vshrl.u32 %v1262_v63, 7  ;;  %vm4138_vm5 = vcmask 785408   ;;  %s7906_s28 = scalar_lea.vmem %s7836_s18, %s6903_s7  ;;  %p5529_p9 = scmp.ne.s32.totalorder %s6700_s20, 2 }
 0x2c7   : > { %1279 = vmatprep.subr.mxu0 %v1255_v12  ;;  %v1245_v20 = vld [vmem:[%s6880_s1 + $0x108] sm:$0xff]  ;;  %v1243_v21 = vld [vmem:[%s6880_s1 + $0xf8] sm:$0xff]  ;;  %v1242_v22 = vld [vmem:[%s6880_s1 + $0xf0] sm:$0xff]  ;;  %s7908_s29 = sld [smem:[#allocation35_spill]] (!%p5529_p9) }
 0x2c8   : > { %1280 = vmatpush1.msra.mxu0 %v1254_v13  ;;  %v1240_v23 = vld [vmem:[%s6880_s1 + $0xe0] sm:$0xff]  ;;  %v6995_v24 = vld [vmem:[#allocation2 + $0x10] sm:$0xff]  ;;  %v1239_v25 = vld [vmem:[%s6880_s1 + $0xd8] sm:$0xff]  ;;  %v1264_v1 = vsub.s32 0, %v7044_v0  ;;  %v1268_v3 = vsub.s32 1, %v7044_v0  ;;  %s4892_s27 = sld [smem:[#allocation4]] (!%p5529_p9) }
 0x2c9   : > { %1281 = vmatprep.subr.mxu0 %v1252_v15  ;;  %5771 = vmatprep.mubr.f32.mxu1 %v6995_v24  ;;  %v1237_v26 = vld [vmem:[%s6880_s1 + $0xc8] sm:$0xff]  ;;  %v1259_v27 = vld [vmem:[%s6880_s1 + $0x178] sm:$0xff]  ;;  %v1256_v28 = vld [vmem:[%s6880_s1 + $0x160] sm:$0xff]  ;;  %s7909_s7 = sld [smem:[#allocation37_spill]] (!%p5529_p9) }
 0x2ca   : > { %1282 = vmatpush1.msra.mxu0 %v1251_v16  ;;  %v1236_v29 = vld [vmem:[%s6880_s1 + $0xc0] sm:$0xff]  ;;  %5739 = vmatprep.subr.mxu1 %v1259_v27  ;;  %v1234_v30 = vld [vmem:[%s6880_s1 + $0xb0] sm:$0xff]  ;;  %v1253_v31 = vld [vmem:[%s6880_s1 + $0x148] sm:$0xff]  ;;  %v1272_v16 = vsub.s32 2, %v7044_v0 }
 0x2cb   : > { %1283 = vmatprep.subr.mxu0 %v1249_v17  ;;  %5740 = vmatpush3.msra.mxu1 %v1259_v27  ;;  %v1233_v32 = vld [vmem:[%s6880_s1 + $0xa8] sm:$0xff]  ;;  %v1231_v33 = vld [vmem:[%s6880_s1 + $0x98] sm:$0xff]  ;;  %v1250_v34 = vld [vmem:[%s6880_s1 + $0x130] sm:$0xff] }
 0x2cc   : > { %1284 = vmatpush1.msra.mxu0 %v1248_v18  ;;  %5741 = vmatprep.subr.mxu1 %v1256_v28  ;;  %v1230_v35 = vld [vmem:[%s6880_s1 + $0x90] sm:$0xff]  ;;  %v1228_v36 = vld [vmem:[%s6880_s1 + $0x80] sm:$0xff]  ;;  %v1247_v37 = vld [vmem:[%s6880_s1 + $0x118] sm:$0xff] }
 0x2cd   : > { %1285 = vmatprep.subr.mxu0 %v1246_v19  ;;  %5742 = vmatpush3.msra.mxu1 %v1256_v28  ;;  %v1227_v38 = vld [vmem:[%s6880_s1 + $0x78] sm:$0xff]  ;;  %v1225_v39 = vld [vmem:[%s6880_s1 + $0x68] sm:$0xff]  ;;  %v1244_v40 = vld [vmem:[%s6880_s1 + $0x100] sm:$0xff] }
 0x2ce   : > { %1286 = vmatpush1.msra.mxu0 %v1245_v20  ;;  %5743 = vmatprep.subr.mxu1 %v1253_v31  ;;  %v1224_v41 = vld [vmem:[%s6880_s1 + $0x60] sm:$0xff]  ;;  %v1222_v42 = vld [vmem:[%s6880_s1 + $0x50] sm:$0xff]  ;;  %v1241_v43 = vld [vmem:[%s6880_s1 + $0xe8] sm:$0xff] }
 0x2cf   : > { %1287 = vmatprep.subr.mxu0 %v1243_v21  ;;  %5744 = vmatpush3.msra.mxu1 %v1253_v31  ;;  %v1221_v44 = vld [vmem:[%s6880_s1 + $0x48] sm:$0xff]  ;;  %v1219_v45 = vld [vmem:[%s6880_s1 + $0x38] sm:$0xff]  ;;  %v1238_v46 = vld [vmem:[%s6880_s1 + $0xd0] sm:$0xff] }
 0x2d0   : > { %1288 = vmatpush1.msra.mxu0 %v1242_v22  ;;  %5745 = vmatprep.subr.mxu1 %v1250_v34  ;;  %v1218_v47 = vld [vmem:[%s6880_s1 + $0x30] sm:$0xff]  ;;  %v1216_v48 = vld [vmem:[%s6880_s1 + $0x20] sm:$0xff]  ;;  %v1235_v49 = vld [vmem:[%s6880_s1 + $0xb8] sm:$0xff] }
 0x2d1   : > { %1289 = vmatprep.subr.mxu0 %v1240_v23  ;;  %5746 = vmatpush3.msra.mxu1 %v1250_v34  ;;  %v1215_v50 = vld [vmem:[%s6880_s1 + $0x18] sm:$0xff]  ;;  %v1213_v51 = vld [vmem:[%s6880_s1 + $0x8] sm:$0xff]  ;;  %v1232_v52 = vld [vmem:[%s6880_s1 + $0xa0] sm:$0xff] }
 0x2d2   : > { %1290 = vmatpush1.msra.mxu0 %v1239_v25  ;;  %5747 = vmatprep.subr.mxu1 %v1247_v37  ;;  %v1212_v53 = vld [vmem:[%s6880_s1] sm:$0xff]  ;;  %v1229_v54 = vld [vmem:[%s6880_s1 + $0x88] sm:$0xff]  ;;  %v1226_v55 = vld [vmem:[%s6880_s1 + $0x70] sm:$0xff] }
 0x2d3   : > { %1291 = vmatprep.subr.mxu0 %v1237_v26  ;;  %5748 = vmatpush3.msra.mxu1 %v1247_v37  ;;  %v1209_v56 = vld [vmem:[#allocation2] sm:$0xff]  ;;  %v1223_v57 = vld [vmem:[%s6880_s1 + $0x58] sm:$0xff]  ;;  %v1217_v60 = vld [vmem:[%s6880_s1 + $0x28] sm:$0xff] }
 0x2d4   : > { %1292 = vmatpush1.msra.mxu0 %v1236_v29  ;;  %5749 = vmatprep.subr.mxu1 %v1244_v40  ;;  %v1220_v58 = vld [vmem:[%s6880_s1 + $0x40] sm:$0xff]  ;;  %v1210_v59 = vld [vmem:[#allocation2 + $0x18] sm:$0xff]  ;;  %v1214_v61 = vld [vmem:[%s6880_s1 + $0x10] sm:$0xff]  ;;  %s6537_s1 = smov 96  }
 0x2d5   : > { %1293 = vmatprep.subr.mxu0 %v1234_v30  ;;  %5750 = vmatpush3.msra.mxu1 %v1244_v40  ;;  %v1211_v62 = vld [vmem:[#allocation2 + $0x8] sm:$0xff]  ;;  %v1260_v2 = vld [vmem:[%s6921_s4] sm:$0x7]  ;;  %s6538_s4 = smov 64  }
 0x2d6   : > { %1294 = vmatpush1.msra.mxu0 %v1233_v32  ;;  %5751 = vmatprep.subr.mxu1 %v1241_v43  ;;  %v1265_v4 = vrot.slane %v1260_v2, %v1264_v1  ;;  %v1269_v5 = vrot.slane %v1260_v2, %v1268_v3  ;;  %v7074_v22 = vrot.slane %v1260_v2, %v1272_v16 }
 0x2d7   : > { %1295 = vmatprep.subr.mxu0 %v1231_v33  ;;  %5752 = vmatpush3.msra.mxu1 %v1241_v43 }
 0x2d8   : > { %1296 = vmatpush1.msra.mxu0 %v1230_v35  ;;  %5753 = vmatprep.subr.mxu1 %v1238_v46 }
 0x2d9   : > { %1297 = vmatprep.subr.mxu0 %v1228_v36  ;;  %5754 = vmatpush3.msra.mxu1 %v1238_v46 }
 0x2da   : > { %1298 = vmatpush1.msra.mxu0 %v1227_v38  ;;  %5755 = vmatprep.subr.mxu1 %v1235_v49 }
 0x2db   : > { %1299 = vmatprep.subr.mxu0 %v1225_v39  ;;  %5756 = vmatpush3.msra.mxu1 %v1235_v49 }
 0x2dc   : > { %1300 = vmatpush1.msra.mxu0 %v1224_v41  ;;  %5757 = vmatprep.subr.mxu1 %v1232_v52 }
 0x2dd   : > { %1301 = vmatprep.subr.mxu0 %v1222_v42  ;;  %5758 = vmatpush3.msra.mxu1 %v1232_v52 }
 0x2de   : > { %1302 = vmatpush1.msra.mxu0 %v1221_v44  ;;  %5759 = vmatprep.subr.mxu1 %v1229_v54 }
 0x2df   : > { %1303 = vmatprep.subr.mxu0 %v1219_v45  ;;  %5760 = vmatpush3.msra.mxu1 %v1229_v54 }
 0x2e0   : > { %1304 = vmatpush1.msra.mxu0 %v1218_v47  ;;  %5761 = vmatprep.subr.mxu1 %v1226_v55 }
 0x2e1   : > { %1305 = vmatprep.subr.mxu0 %v1216_v48  ;;  %5762 = vmatpush3.msra.mxu1 %v1226_v55 }
 0x2e2   : > { %1306 = vmatpush1.msra.mxu0 %v1215_v50  ;;  %5763 = vmatprep.subr.mxu1 %v1223_v57 }
 0x2e3   : > { %1307 = vmatprep.subr.mxu0 %v1213_v51  ;;  %5764 = vmatpush3.msra.mxu1 %v1223_v57 }
 0x2e4   : > { %1308 = vmatpush1.msra.mxu0 %v1212_v53  ;;  %5765 = vmatprep.subr.mxu1 %v1220_v58 }
 0x2e5   : > { %1342 = vmatmul.mubr.f32.vlgmr.msra.gmra.mxu0 %v6995_v24  ;;  %5787 = vmatprep.subr.mxu0 %v6535_v14 }
 0x2e6   : > { %1347 = vmatprep.mubr.f32.mxu0 %v6535_v14  ;;  %5766 = vmatpush3.msra.mxu1 %v1220_v58 }
 0x2e7   : > { %5767 = vmatprep.subr.mxu1 %v1217_v60 }
 0x2e8   : > { %5768 = vmatpush3.msra.mxu1 %v1217_v60 }
 0x2e9   : > { %1348 = vmatmul.mubr.f32.gmra.mxu0 %v1209_v56  ;;  %5769 = vmatprep.subr.mxu1 %v1214_v61 }
 0x2ea   : > { %1353 = vmatprep.mubr.f32.mxu0 %v6535_v14  ;;  %5770 = vmatpush3.msra.mxu1 %v1214_v61 }
 0x2eb   : > { %5772 = vmatmul.mubr.f32.vlgmr.msra.gmra.mxu1 %v1209_v56  ;;  %5777 = vmatprep.subr.mxu1 %v6535_v14 }
 0x2ec   : > { %5774 = vmatprep.mubr.f32.mxu1 %v1210_v59 }
 0x2ed   : > { %1354 = vmatmul.mubr.f32.gmra.mxu0 %v1210_v59 }
 0x2ee   : > { %1359 = vmatprep.mubr.f32.mxu0 %v6535_v14 }
 0x2ef   : > { %5775 = vmatmul.mubr.f32.gmra.mxu1 %v1211_v62 }
 0x2f0   : > { %5779 = vmatprep.mubr.msk.f32.mxu1 %vm6536_vm1, %v6535_v14 }
 0x2f1   : > { %1360 = vmatmul.mubr.f32.gmra.mxu0 %v1211_v62 }
 0x2f2   : > { %5789 = vmatprep.mubr.msk.f32.mxu0 %vm6536_vm1, %v6535_v14 }
 0x3a5   : > { %v1343_v6 = vpop.f32.mrf.mxu0 }
 0x3a6   : > { %v1344_v7 = vadd.f32 %v1343_v6, %v1265_v4 }
 0x3a7   : > { %v1345_v8 = vpop.f32.mrf.mxu0 }
 0x3a8   : > { %v7053_v9 = vadd.f32 %v1345_v8, %v1269_v5  ;;  %v7057_v11 = vmul.f32 0.17677669, %v1344_v7 }
 0x3a9   : > { %v1349_v10 = vpop.f32.mrf.mxu0 }
 0x3aa   : > { %5778 = vmatpush3.xpose.msk.msra.mxu1 %vm1455_vm2, %v7053_v9  ;;  %v1350_v12 = vadd.f32 %v1349_v10, %v1265_v4 }
 0x3ab   : > { %v1351_v13 = vpop.f32.mrf.mxu0  ;;  %5782 = vmatprep.subr.mxu1 %v6535_v14  ;;  %v5773_v25 = vpop.f32.mrf.mxu1 }
 0x3ac   : > { %v7060_v15 = vadd.f32 %v1351_v13, %v1269_v5  ;;  %v7069_v19 = vmul.f32 0.17677669, %v1350_v12  ;;  %v7097_v33 = vadd.f32 %v5773_v25, %v7074_v22 }
 0x3ad   : > { %v1355_v17 = vpop.f32.mrf.mxu0  ;;  %5780 = vmatmul.mubr.msk.f32.vlgmr.msra.gmra.mxu1 %vm1455_vm2, %v7057_v11  ;;  %v1432_v28 = vpop.f32.mrf.mxu1 }
 0x3ae   : > { %v1356_v18 = vadd.f32 %v1355_v17, %v1265_v4  ;;  %5783 = vmatpush3.xpose.msk.msra.mxu1 %vm1455_vm2, %v7060_v15  ;;  %5784 = vmatprep.mubr.msk.f32.mxu1 %vm6536_vm1, %v6535_v14  ;;  %v7088_v30 = vadd.f32 %v1432_v28, %v7074_v22 }
 0x3af   : > { %v1357_v20 = vpop.f32.mrf.mxu0  ;;  %5792 = vmatprep.subr.mxu1 %v6535_v14  ;;  %v5776_v32 = vpop.f32.mrf.mxu1 }
 0x3b0   : > { %v7072_v21 = vadd.f32 %v1357_v20, %v1269_v5  ;;  %v7076_v23 = vmul.f32 0.17677669, %v1356_v18  ;;  %v7100_v34 = vadd.f32 %v5776_v32, %v7074_v22 }
 0x3b1   : > { %v1361_v24 = vpop.f32.mrf.mxu0  ;;  %5785 = vmatmul.mubr.msk.f32.vlgmr.msra.gmra.mxu1 %vm1455_vm2, %v7069_v19  ;;  %v7113_v35 = vpop.f32.mrf.mxu1 }
 0x3b2   : > { %v1362_v26 = vadd.f32 %v1361_v24, %v1265_v4  ;;  %5788 = vmatpush3.xpose.msk.msra.mxu0 %vm1455_vm2, %v7072_v21  ;;  %5794 = vmatprep.mubr.msk.f32.mxu1 %vm6536_vm1, %v6535_v14  ;;  %v7141_v17 = vadd.f32 %v7113_v35, %v7074_v22 }
 0x3b3   : > { %v1363_v27 = vpop.f32.mrf.mxu0  ;;  %5797 = vmatprep.subr.mxu0 %v6535_v14 }
 0x3b4   : > { %v7085_v29 = vadd.f32 %v1363_v27, %v1269_v5  ;;  %v7090_v31 = vmul.f32 0.17677669, %v1362_v26 }
 0x3b5   : > { %5790 = vmatmul.mubr.msk.f32.vlgmr.msra.gmra.mxu0 %vm1455_vm2, %v7076_v23 }
 0x3b6   : > { %5793 = vmatpush3.xpose.msk.msra.mxu1 %vm1455_vm2, %v7085_v29  ;;  %5798 = vmatpush3.msra.mxu0 %v7088_v30 }
 0x3b7   : > { %5802 = vmatprep.subr.mxu1 %v6535_v14  ;;  %5799 = vmatprep.mubr.msk.f32.mxu0 %vm6536_vm1, %v6535_v14 }
 0x3b8   : > { %5807 = vmatprep.subr.mxu0 %v6535_v14 }
 0x3b9   : > { %5795 = vmatmul.mubr.msk.f32.vlgmr.msra.gmra.mxu1 %vm1455_vm2, %v7090_v31 }
 0x3ba   : > { %5803 = vmatpush3.msra.mxu1 %v7097_v33  ;;  %5804 = vmatprep.mubr.msk.f32.mxu1 %vm6536_vm1, %v6535_v14 }
 0x3bb   : > { %5812 = vmatprep.subr.mxu1 %v6535_v14 }
 0x46d   : > { %v1528_v36 = vpop.f32.mrf.mxu1 }
 0x46e   : > { %v1761_v37 = vsel %vm1760_vm3, %v1528_v36, -inf }
 0x46f   : > { %1762 = vmax.xlane.f32.xlu0 %v1761_v37  ;;  %v5781_v38 = vpop.f32.mrf.mxu1 }
 0x471   : > { %v1604_v39 = vpop.f32.mrf.mxu1 }
 0x472   : > { %v1764_v40 = vsel %vm1760_vm3, %v1604_v39, -inf }
 0x473   : > { %1765 = vmax.xlane.f32.xlu0 %v1764_v40  ;;  %v5786_v41 = vpop.f32.mrf.mxu1 }
 0x475   : > { %v1680_v42 = vpop.f32.mrf.mxu0 }
 0x476   : > { %v1767_v43 = vsel %vm1760_vm3, %v1680_v42, -inf }
 0x477   : > { %1768 = vmax.xlane.f32.xlu1 %v1767_v43  ;;  %v5791_v44 = vpop.f32.mrf.mxu0 }
 0x479   : > { %v1756_v45 = vpop.f32.mrf.mxu1 }
 0x47a   : > { %v1770_v46 = vsel %vm1760_vm3, %v1756_v45, -inf }
 0x47b   : > { %1771 = vmax.xlane.f32.xlu1 %v1770_v46  ;;  %v5796_v47 = vpop.f32.mrf.mxu1 }
 0x4f8   : > { %v1763_v48 = vpop.xlane.xlu0 %1762 }
 0x4f9   : > { %v1773_v49 = vsub.f32 %v1528_v36, %v1763_v48 }
 0x4fb   : > { %v1777_v50 = vmul.f32 1.442695, %v1773_v49 }
 0x4fc   : > { %v1766_v51 = vpop.xlane.xlu0 %1765 }
 0x4fd   : > { %6199 = vpow2.f32 %v1777_v50  ;;  %v1774_v52 = vsub.f32 %v1604_v39, %v1766_v51 }
 0x4ff   : > { %v1779_v53 = vmul.f32 1.442695, %v1774_v52 }
 0x500   : > { %v1769_v54 = vpop.xlane.xlu1 %1768 }
 0x501   : > { %6201 = vpow2.f32 %v1779_v53  ;;  %v1775_v55 = vsub.f32 %v1680_v42, %v1769_v54 }
 0x503   : > { %v1781_v56 = vmul.f32 1.442695, %v1775_v55 }
 0x504   : > { %v1772_v2 = vpop.xlane.xlu1 %1771 }
 0x505   : > { %6203 = vpow2.f32 %v1781_v56  ;;  %v1776_v4 = vsub.f32 %v1756_v45, %v1772_v2 }
 0x507   : > { %v1783_v5 = vmul.f32 1.442695, %v1776_v4 }
 0x509   : > { %6205 = vpow2.f32 %v1783_v5 }
 0x50a   : > { %v6200_v57 = vpop.eup %6199 }
 0x50b   : > { %v1785_v58 = vsel %vm1760_vm3, %v6200_v57, 0.0 }
 0x50c   : > { %1786 = vadd.xlane.f32.xlu0 %v1785_v58 }
 0x50e   : > { %v6202_v59 = vpop.eup %6201 }
 0x50f   : > { %v1788_v60 = vsel %vm1760_vm3, %v6202_v59, 0.0 }
 0x510   : > { %1789 = vadd.xlane.f32.xlu1 %v1788_v60 }
 0x512   : > { %v6204_v61 = vpop.eup %6203 }
 0x513   : > { %v1791_v62 = vsel %vm1760_vm3, %v6204_v61, 0.0 }
 0x514   : > { %1792 = vadd.xlane.f32.xlu0 %v1791_v62 }
 0x516   : > { %v6206_v6 = vpop.eup %6205 }
 0x517   : > { %v1794_v7 = vsel %vm1760_vm3, %v6206_v6, 0.0 }
 0x521   : > { %2177 = vrot.lane.b32.xlu1 %v7060_v15, %s6537_s1 }
 0x525   : > { %2097 = vrot.lane.b32.xlu1 %v7057_v11, %s6537_s1 }
 0x529   : > { %2175 = vrot.lane.b32.xlu1 %v7069_v19, %s6537_s1 }
 0x52a   : > { %2099 = vrot.lane.b32.xlu0 %v7053_v9, %s6537_s1 }
 0x52d   : > { %2333 = vrot.lane.b32.xlu1 %v7085_v29, %s6537_s1 }
 0x52e   : > { %2255 = vrot.lane.b32.xlu0 %v7072_v21, %s6537_s1 }
 0x532   : > { %2253 = vrot.lane.b32.xlu0 %v7076_v23, %s6537_s1 }
 0x551   : > { %1795 = vadd.xlane.f32.xlu1 %v1794_v7 }
 0x562   : > { %2331 = vrot.lane.b32.xlu1 %v7090_v31, %s6537_s1 }
 0x595   : > { %v1787_v8 = vpop.xlane.xlu0 %1786 }
 0x596   : > { %6207 = vrcp.f32 %v1787_v8 }
 0x599   : > { %v1790_v10 = vpop.xlane.xlu1 %1789 }
 0x59a   : > { %6209 = vrcp.f32 %v1790_v10 }
 0x59d   : > { %v1793_v12 = vpop.xlane.xlu0 %1792  ;;  %v2178_v26 = vpop.permute.xlu1 %2177 }
 0x59e   : > { %6211 = vrcp.f32 %v1793_v12 }
 0x5a1   : > { %v2100_v24 = vpop.permute.xlu0 %2099  ;;  %v2098_v28 = vpop.permute.xlu1 %2097 }
 0x5a3   : > { %v6208_v13 = vpop.eup %6207 }
 0x5a4   : > { %v1801_v16 = vmul.f32 %v6208_v13, %v6200_v57 }
 0x5a5   : > { %v2256_v27 = vpop.permute.xlu0 %2255  ;;  %v2176_v35 = vpop.permute.xlu1 %2175 }
 0x5a6   : > { %5800 = vmatmul.mubr.msk.f32.vlgmr.msra.gmra.mxu0 %vm1760_vm3, %v1801_v16 }
 0x5a7   : > { %v6210_v18 = vpop.eup %6209  ;;  %5808 = vmatpush3.msra.mxu0 %v7141_v17  ;;  %5809 = vmatprep.mubr.msk.f32.mxu0 %vm6536_vm1, %v6535_v14 }
 0x5a8   : > { %v1802_v20 = vmul.f32 %v6210_v18, %v6202_v59  ;;  %5817 = vmatprep.subr.mxu0 %v6535_v14 }
 0x5a9   : > { %v2254_v32 = vpop.permute.xlu0 %2253  ;;  %v2334_v36 = vpop.permute.xlu1 %2333 }
 0x5aa   : > { %5805 = vmatmul.mubr.msk.f32.vlgmr.msra.gmra.mxu1 %vm1760_vm3, %v1802_v20 }
 0x5ab   : > { %v6212_v25 = vpop.eup %6211  ;;  %5813 = vmatpush3.msra.mxu1 %v7100_v34  ;;  %5814 = vmatprep.mubr.msk.f32.mxu1 %vm6536_vm1, %v6535_v14 }
 0x5ac   : > { %v1803_v22 = vmul.f32 %v6212_v25, %v6204_v61  ;;  %5822 = vmatprep.subr.mxu1 %v6535_v14 }
 0x5ae   : > { %5810 = vmatmul.mubr.msk.f32.vlgmr.msra.gmra.mxu0 %vm1760_vm3, %v1803_v22 }
 0x5af   : > { %5818 = vmatpush3.xpose.msk.msra.mxu0 %vm1455_vm2, %v2100_v24  ;;  %5819 = vmatprep.mubr.msk.f32.mxu0 %vm6536_vm1, %v6535_v14 }
 0x5b0   : > { %5827 = vmatprep.subr.mxu0 %v6535_v14 }
 0x5b2   : > { %5820 = vmatmul.mubr.msk.f32.vlgmr.msra.gmra.mxu0 %vm1455_vm2, %v2098_v28 }
 0x5b3   : > { %5828 = vmatpush3.xpose.msk.msra.mxu0 %vm1455_vm2, %v2256_v27  ;;  %5829 = vmatprep.mubr.msk.f32.mxu0 %vm6536_vm1, %v6535_v14 }
 0x5b4   : > { %5837 = vmatprep.subr.mxu0 %v6535_v14 }
 0x5b6   : > { %5830 = vmatmul.mubr.msk.f32.vlgmr.msra.gmra.mxu0 %vm1455_vm2, %v2254_v32 }
 0x5b7   : > { %5839 = vmatprep.mubr.msk.f32.mxu0 %vm6536_vm1, %v6535_v14 }
 0x5da   : > { %v1796_v37 = vpop.xlane.xlu1 %1795 }
 0x5db   : > { %6213 = vrcp.f32 %v1796_v37 }
 0x5de   : > { %v2332_v40 = vpop.permute.xlu1 %2331 }
 0x5e8   : > { %v6214_v38 = vpop.eup %6213 }
 0x5e9   : > { %v1804_v39 = vmul.f32 %v6214_v38, %v6206_v6 }
 0x5eb   : > { %5815 = vmatmul.mubr.msk.f32.vlgmr.msra.gmra.mxu1 %vm1760_vm3, %v1804_v39 }
 0x5ec   : > { %5823 = vmatpush3.xpose.msk.msra.mxu1 %vm1455_vm2, %v2178_v26  ;;  %5824 = vmatprep.mubr.msk.f32.mxu1 %vm6536_vm1, %v6535_v14 }
 0x5ed   : > { %5832 = vmatprep.subr.mxu1 %v6535_v14 }
 0x5ef   : > { %5825 = vmatmul.mubr.msk.f32.vlgmr.msra.gmra.mxu1 %vm1455_vm2, %v2176_v35 }
 0x5f0   : > { %5833 = vmatpush3.xpose.msk.msra.mxu1 %vm1455_vm2, %v2334_v36  ;;  %5834 = vmatprep.mubr.msk.f32.mxu1 %vm6536_vm1, %v6535_v14 }
 0x5f1   : > { %5842 = vmatprep.subr.mxu1 %v6535_v14 }
 0x5f3   : > { %5835 = vmatmul.mubr.msk.f32.vlgmr.msra.gmra.mxu1 %vm1455_vm2, %v2332_v40 }
 0x5f4   : > { %5844 = vmatprep.mubr.msk.f32.mxu1 %vm6536_vm1, %v6535_v14 }
 0x666   : > { %v7179_v41 = vpop.f32.mrf.mxu0 }
 0x668   : > { %v5801_v42 = vpop.f32.mrf.mxu0 }
 0x66a   : > { %v7181_v43 = vpop.f32.mrf.mxu1 }
 0x66c   : > { %v5806_v44 = vpop.f32.mrf.mxu1 }
 0x66e   : > { %v7183_v45 = vpop.f32.mrf.mxu0 }
 0x670   : > { %v5811_v46 = vpop.f32.mrf.mxu0 }
 0x672   : > { %v2171_v47 = vpop.f32.mrf.mxu0 }
 0x673   : > { %v2409_v48 = vsel %vm1760_vm3, %v2171_v47, -inf }
 0x674   : > { %2410 = vmax.xlane.f32.xlu0 %v2409_v48  ;;  %v5821_v49 = vpop.f32.mrf.mxu0 }
 0x676   : > { %v2327_v50 = vpop.f32.mrf.mxu0 }
 0x677   : > { %v2415_v51 = vsel %vm1760_vm3, %v2327_v50, -inf }
 0x678   : > { %2416 = vmax.xlane.f32.xlu0 %v2415_v51  ;;  %v5831_v52 = vpop.f32.mrf.mxu0 }
 0x6ab   : > { %v7187_v53 = vpop.f32.mrf.mxu1 }
 0x6ad   : > { %v5816_v54 = vpop.f32.mrf.mxu1 }
 0x6af   : > { %v2249_v55 = vpop.f32.mrf.mxu1 }
 0x6b0   : > { %v2412_v56 = vsel %vm1760_vm3, %v2249_v55, -inf }
 0x6b1   : > { %2413 = vmax.xlane.f32.xlu1 %v2412_v56  ;;  %v5826_v57 = vpop.f32.mrf.mxu1 }
 0x6b3   : > { %v2405_v58 = vpop.f32.mrf.mxu1 }
 0x6b4   : > { %v2418_v59 = vsel %vm1760_vm3, %v2405_v58, -inf }
 0x6b5   : > { %2419 = vmax.xlane.f32.xlu0 %v2418_v59  ;;  %v5836_v60 = vpop.f32.mrf.mxu1 }
 0x6c2   : > { %2531 = vrot.lane.b32.xlu1 %v7097_v33, %s6537_s1 }
 0x6c6   : > { %2608 = vrot.lane.b32.xlu1 %v7141_v17, %s6537_s1 }
 0x6ca   : > { %2685 = vrot.lane.b32.xlu1 %v7100_v34, %s6537_s1 }
 0x6cb   : > { %2454 = vrot.lane.b32.xlu0 %v7088_v30, %s6537_s1 }
 0x6ce   : > { %2841 = vrot.lane.b32.xlu1 %v7060_v15, %s6538_s4 }
 0x6cf   : > { %2763 = vrot.lane.b32.xlu0 %v7053_v9, %s6538_s4 }
 0x6fd   : > { %v2411_v61 = vpop.xlane.xlu0 %2410 }
 0x6fe   : > { %v2421_v62 = vsub.f32 %v2171_v47, %v2411_v61 }
 0x700   : > { %v2425_v2 = vmul.f32 1.442695, %v2421_v62 }
 0x701   : > { %v2417_v4 = vpop.xlane.xlu0 %2416 }
 0x702   : > { %6215 = vpow2.f32 %v2425_v2  ;;  %v2423_v5 = vsub.f32 %v2327_v50, %v2417_v4 }
 0x704   : > { %v2429_v6 = vmul.f32 1.442695, %v2423_v5 }
 0x706   : > { %6217 = vpow2.f32 %v2429_v6 }
 0x70f   : > { %v6216_v7 = vpop.eup %6215 }
 0x710   : > { %v2433_v8 = vsel %vm1760_vm3, %v6216_v7, 0.0 }
 0x711   : > { %2434 = vadd.xlane.f32.xlu0 %v2433_v8 }
 0x713   : > { %v6218_v10 = vpop.eup %6217 }
 0x714   : > { %v2439_v12 = vsel %vm1760_vm3, %v6218_v10, 0.0 }
 0x715   : > { %2440 = vadd.xlane.f32.xlu0 %v2439_v12 }
 0x72b   : > { %2761 = vrot.lane.b32.xlu0 %v7057_v11, %s6538_s4 }
 0x72f   : > { %2919 = vrot.lane.b32.xlu0 %v7072_v21, %s6538_s4 }
 0x733   : > { %2917 = vrot.lane.b32.xlu0 %v7076_v23, %s6538_s4 }
 0x73a   : > { %v2414_v13 = vpop.xlane.xlu1 %2413 }
 0x73b   : > { %v2422_v16 = vsub.f32 %v2249_v55, %v2414_v13 }
 0x73d   : > { %v2427_v18 = vmul.f32 1.442695, %v2422_v16 }
 0x73e   : > { %v2532_v20 = vpop.permute.xlu1 %2531  ;;  %v2420_v24 = vpop.xlane.xlu0 %2419 }
 0x73f   : > { %6219 = vpow2.f32 %v2427_v18  ;;  %5843 = vmatpush3.msra.mxu1 %v2532_v20  ;;  %v2424_v27 = vsub.f32 %v2405_v58, %v2420_v24 }
 0x740   : > { %5852 = vmatprep.subr.mxu1 %v6535_v14 }
 0x741   : > { %v2431_v28 = vmul.f32 1.442695, %v2424_v27 }
 0x742   : > { %v2455_v25 = vpop.permute.xlu0 %2454  ;;  %v2609_v44 = vpop.permute.xlu1 %2608 }
 0x743   : > { %5838 = vmatpush3.msra.mxu0 %v2455_v25  ;;  %6221 = vpow2.f32 %v2431_v28 }
 0x744   : > { %5847 = vmatprep.subr.mxu0 %v6535_v14 }
 0x746   : > { %v2764_v36 = vpop.permute.xlu0 %2763  ;;  %v2686_v50 = vpop.permute.xlu1 %2685 }
 0x74a   : > { %v2842_v51 = vpop.permute.xlu1 %2841 }
 0x74c   : > { %v6220_v26 = vpop.eup %6219 }
 0x74d   : > { %v2436_v22 = vsel %vm1760_vm3, %v6220_v26, 0.0 }
 0x74e   : > { %2437 = vadd.xlane.f32.xlu1 %v2436_v22 }
 0x750   : > { %v6222_v32 = vpop.eup %6221 }
 0x751   : > { %v2442_v35 = vsel %vm1760_vm3, %v6222_v32, 0.0 }
 0x75f   : > { %2839 = vrot.lane.b32.xlu1 %v7069_v19, %s6538_s4 }
 0x763   : > { %2997 = vrot.lane.b32.xlu1 %v7085_v29, %s6538_s4 }
 0x787   : > { %2443 = vadd.xlane.f32.xlu1 %v2442_v35 }
 0x798   : > { %2995 = vrot.lane.b32.xlu1 %v7090_v31, %s6538_s4 }
 0x79a   : > { %v2435_v37 = vpop.xlane.xlu0 %2434 }
 0x79b   : > { %6223 = vrcp.f32 %v2435_v37 }
 0x79e   : > { %v2441_v38 = vpop.xlane.xlu0 %2440 }
 0x79f   : > { %6225 = vrcp.f32 %v2441_v38 }
 0x7a2   : > { %v2762_v42 = vpop.permute.xlu0 %2761 }
 0x7a6   : > { %v2920_v48 = vpop.permute.xlu0 %2919 }
 0x7a8   : > { %v6224_v39 = vpop.eup %6223 }
 0x7a9   : > { %v2449_v40 = vmul.f32 %v6224_v39, %v6216_v7 }
 0x7aa   : > { %v2918_v49 = vpop.permute.xlu0 %2917 }
 0x7ab   : > { %5840 = vmatmul.mubr.msk.f32.vlgmr.msra.gmra.mxu0 %vm1760_vm3, %v2449_v40 }
 0x7ac   : > { %v6226_v46 = vpop.eup %6225  ;;  %5848 = vmatpush3.msra.mxu0 %v2609_v44  ;;  %5849 = vmatprep.mubr.msk.f32.mxu0 %vm6536_vm1, %v6535_v14 }
 0x7ad   : > { %5857 = vmatprep.subr.mxu0 %v6535_v14  ;;  %v2451_v47 = vmul.f32 %v6226_v46, %v6218_v10 }
 0x7af   : > { %5850 = vmatmul.mubr.msk.f32.vlgmr.msra.gmra.mxu0 %vm1760_vm3, %v2451_v47 }
 0x7b0   : > { %5858 = vmatpush3.xpose.msk.msra.mxu0 %vm1455_vm2, %v2764_v36  ;;  %5859 = vmatprep.mubr.msk.f32.mxu0 %vm6536_vm1, %v6535_v14 }
 0x7b1   : > { %5867 = vmatprep.subr.mxu0 %v6535_v14 }
 0x7b3   : > { %5860 = vmatmul.mubr.msk.f32.vlgmr.msra.gmra.mxu0 %vm1455_vm2, %v2762_v42 }
 0x7b4   : > { %5868 = vmatpush3.xpose.msk.msra.mxu0 %vm1455_vm2, %v2920_v48  ;;  %5869 = vmatprep.mubr.msk.f32.mxu0 %vm6536_vm1, %v6535_v14 }
 0x7b5   : > { %5877 = vmatprep.subr.mxu0 %v6535_v14 }
 0x7b7   : > { %5870 = vmatmul.mubr.msk.f32.vlgmr.msra.gmra.mxu0 %vm1455_vm2, %v2918_v49 }
 0x7b8   : > { %5879 = vmatprep.mubr.msk.f32.mxu0 %vm6536_vm1, %v6535_v14 }
 0x7d7   : > { %v2438_v52 = vpop.xlane.xlu1 %2437 }
 0x7d8   : > { %6227 = vrcp.f32 %v2438_v52 }
 0x7db   : > { %v2840_v56 = vpop.permute.xlu1 %2839 }
 0x7df   : > { %v2998_v57 = vpop.permute.xlu1 %2997 }
 0x7e5   : > { %v6228_v54 = vpop.eup %6227 }
 0x7e6   : > { %v2450_v55 = vmul.f32 %v6228_v54, %v6220_v26 }
 0x7e8   : > { %5845 = vmatmul.mubr.msk.f32.vlgmr.msra.gmra.mxu1 %vm1760_vm3, %v2450_v55 }
 0x7e9   : > { %5853 = vmatpush3.msra.mxu1 %v2686_v50  ;;  %5854 = vmatprep.mubr.msk.f32.mxu1 %vm6536_vm1, %v6535_v14 }
 0x7ea   : > { %5862 = vmatprep.subr.mxu1 %v6535_v14 }
 0x810   : > { %v2444_v58 = vpop.xlane.xlu1 %2443 }
 0x811   : > { %6229 = vrcp.f32 %v2444_v58 }
 0x814   : > { %v2996_v61 = vpop.permute.xlu1 %2995 }
 0x81e   : > { %v6230_v59 = vpop.eup %6229 }
 0x81f   : > { %v2452_v60 = vmul.f32 %v6230_v59, %v6222_v32 }
 0x821   : > { %5855 = vmatmul.mubr.msk.f32.vlgmr.msra.gmra.mxu1 %vm1760_vm3, %v2452_v60 }
 0x822   : > { %5863 = vmatpush3.xpose.msk.msra.mxu1 %vm1455_vm2, %v2842_v51  ;;  %5864 = vmatprep.mubr.msk.f32.mxu1 %vm6536_vm1, %v6535_v14 }
 0x823   : > { %5872 = vmatprep.subr.mxu1 %v6535_v14 }
 0x825   : > { %5865 = vmatmul.mubr.msk.f32.vlgmr.msra.gmra.mxu1 %vm1455_vm2, %v2840_v56 }
 0x826   : > { %5873 = vmatpush3.xpose.msk.msra.mxu1 %vm1455_vm2, %v2998_v57  ;;  %5874 = vmatprep.mubr.msk.f32.mxu1 %vm6536_vm1, %v6535_v14 }
 0x827   : > { %5882 = vmatprep.subr.mxu1 %v6535_v14 }
 0x829   : > { %5875 = vmatmul.mubr.msk.f32.vlgmr.msra.gmra.mxu1 %vm1455_vm2, %v2996_v61 }
 0x82a   : > { %5884 = vmatprep.mubr.msk.f32.mxu1 %vm6536_vm1, %v6535_v14 }
 0x86b   : > { %v7255_v62 = vpop.f32.mrf.mxu0 }
 0x86d   : > { %v5841_v2 = vpop.f32.mrf.mxu0 }
 0x86f   : > { %v7257_v4 = vpop.f32.mrf.mxu0 }
 0x871   : > { %v5851_v5 = vpop.f32.mrf.mxu0 }
 0x873   : > { %v2835_v6 = vpop.f32.mrf.mxu0 }
 0x874   : > { %v3073_v7 = vsel %vm1760_vm3, %v2835_v6, -inf }
 0x875   : > { %3074 = vmax.xlane.f32.xlu0 %v3073_v7  ;;  %v5861_v8 = vpop.f32.mrf.mxu0 }
 0x877   : > { %v2991_v10 = vpop.f32.mrf.mxu0 }
 0x878   : > { %v3079_v12 = vsel %vm1760_vm3, %v2991_v10, -inf }
 0x879   : > { %3080 = vmax.xlane.f32.xlu0 %v3079_v12  ;;  %v5871_v13 = vpop.f32.mrf.mxu0 }
 0x8a8   : > { %v7261_v16 = vpop.f32.mrf.mxu1 }
 0x8a9   : > { %v6169_v18 = vpack.i.bf16 %v7261_v16, %v7255_v62 }
 0x8aa   : > { %v5846_v20 = vpop.f32.mrf.mxu1 }
 0x8e1   : > { %v7265_v24 = vpop.f32.mrf.mxu1 }
 0x8e3   : > { %v5856_v25 = vpop.f32.mrf.mxu1 }
 0x8e5   : > { %v2913_v26 = vpop.f32.mrf.mxu1 }
 0x8e6   : > { %v3076_v22 = vsel %vm1760_vm3, %v2913_v26, -inf }
 0x8e7   : > { %3077 = vmax.xlane.f32.xlu1 %v3076_v22  ;;  %v5866_v27 = vpop.f32.mrf.mxu1 }
 0x8e9   : > { %v3069_v28 = vpop.f32.mrf.mxu1 }
 0x8ea   : > { %v3082_v32 = vsel %vm1760_vm3, %v3069_v28, -inf }
 0x8eb   : > { %3083 = vmax.xlane.f32.xlu0 %v3082_v32  ;;  %v5876_v35 = vpop.f32.mrf.mxu1 }
 0x8f8   : > { %3193 = vrot.lane.b32.xlu1 %v7097_v33, %s6538_s4 }
 0x8fc   : > { %3269 = vrot.lane.b32.xlu1 %v7141_v17, %s6538_s4 }
 0x8fe   : > { %v3075_v36 = vpop.xlane.xlu0 %3074 }
 0x8ff   : > { %v3085_v37 = vsub.f32 %v2835_v6, %v3075_v36 }
 0x900   : > { %3345 = vrot.lane.b32.xlu1 %v7100_v34, %s6538_s4 }
 0x901   : > { %3117 = vrot.lane.b32.xlu0 %v7088_v30, %s6538_s4  ;;  %v3089_v39 = vmul.f32 1.442695, %v3085_v37 }
 0x902   : > { %v3081_v38 = vpop.xlane.xlu0 %3080 }
 0x903   : > { %v3087_v40 = vsub.f32 %v2991_v10, %v3081_v38  ;;  %6231 = vpow2.f32 %v3089_v39 }
 0x905   : > { %v3093_v42 = vmul.f32 1.442695, %v3087_v40 }
 0x907   : > { %6233 = vpow2.f32 %v3093_v42 }
 0x910   : > { %v6232_v44 = vpop.eup %6231 }
 0x911   : > { %v3097_v46 = vsel %vm1760_vm3, %v6232_v44, 0.0 }
 0x914   : > { %v6234_v47 = vpop.eup %6233 }
 0x915   : > { %v3103_v48 = vsel %vm1760_vm3, %v6234_v47, 0.0 }
 0x920   : > { %3098 = vadd.xlane.f32.xlu0 %v3097_v46 }
 0x924   : > { %3104 = vadd.xlane.f32.xlu0 %v3103_v48 }
 0x93a   : > { %3423 = vrot.lane.b32.xlu0 %v7053_v9, %s6539_s24 }
 0x93e   : > { %3421 = vrot.lane.b32.xlu0 %v7057_v11, %s6539_s24 }
 0x942   : > { %3579 = vrot.lane.b32.xlu0 %v7072_v21, %s6539_s24 }
 0x946   : > { %3577 = vrot.lane.b32.xlu0 %v7076_v23, %s6539_s24 }
 0x970   : > { %v3078_v49 = vpop.xlane.xlu1 %3077 }
 0x971   : > { %v3086_v50 = vsub.f32 %v2913_v26, %v3078_v49 }
 0x973   : > { %v3091_v51 = vmul.f32 1.442695, %v3086_v50 }
 0x974   : > { %v3194_v52 = vpop.permute.xlu1 %3193  ;;  %v3084_v54 = vpop.xlane.xlu0 %3083 }
 0x975   : > { %6235 = vpow2.f32 %v3091_v51  ;;  %5883 = vmatpush3.msra.mxu1 %v3194_v52  ;;  %v3088_v21 = vsub.f32 %v3069_v28, %v3084_v54 }
 0x976   : > { %5892 = vmatprep.subr.mxu1 %v6535_v14 }
 0x977   : > { %v3095_v23 = vmul.f32 1.442695, %v3088_v21 }
 0x978   : > { %v3118_v55 = vpop.permute.xlu0 %3117  ;;  %v3270_v5 = vpop.permute.xlu1 %3269 }
 0x979   : > { %5878 = vmatpush3.msra.mxu0 %v3118_v55 }
 0x97a   : > { %5887 = vmatprep.subr.mxu0 %v6535_v14 }
 0x97c   : > { %v3346_v10 = vpop.permute.xlu1 %3345 }
 0x982   : > { %v6236_v9 = vpop.eup %6235 }
 0x983   : > { %v3100_v11 = vsel %vm1760_vm3, %v6236_v9, 0.0 }
 0x984   : > { %3101 = vadd.xlane.f32.xlu1 %v3100_v11 }
 0x995   : > { %3501 = vrot.lane.b32.xlu1 %v7060_v15, %s6539_s24 }
 0x999   : > { %3499 = vrot.lane.b32.xlu1 %v7069_v19, %s6539_s24 }
 0x9a9   : > { %v3099_v56 = vpop.xlane.xlu0 %3098 }
 0x9aa   : > { %6237 = vrcp.f32 %v3099_v56 }
 0x9ab   : > { %6239 = vpow2.f32 %v3095_v23 }
 0x9ad   : > { %v3105_v57 = vpop.xlane.xlu0 %3104 }
 0x9ae   : > { %6241 = vrcp.f32 %v3105_v57 }
 0x9b1   : > { %v3424_v58 = vpop.permute.xlu0 %3423 }
 0x9b5   : > { %v3422_v2 = vpop.permute.xlu0 %3421 }
 0x9b7   : > { %v6238_v59 = vpop.eup %6237 }
 0x9b8   : > { %v3113_v60 = vmul.f32 %v6238_v59, %v6232_v44  ;;  %v6240_v61 = vpop.eup %6239 }
 0x9b9   : > { %v3106_v15 = vsel %vm1760_vm3, %v6240_v61, 0.0  ;;  %v3580_v7 = vpop.permute.xlu0 %3579 }
 0x9ba   : > { %5880 = vmatmul.mubr.msk.f32.vlgmr.msra.gmra.mxu0 %vm1760_vm3, %v3113_v60 }
 0x9bb   : > { %v6242_v6 = vpop.eup %6241  ;;  %5888 = vmatpush3.msra.mxu0 %v3270_v5  ;;  %5889 = vmatprep.mubr.msk.f32.mxu0 %vm6536_vm1, %v6535_v14 }
 0x9bc   : > { %5897 = vmatprep.subr.mxu0 %v6535_v14  ;;  %v3115_v19 = vmul.f32 %v6242_v6, %v6234_v47 }
 0x9bd   : > { %3107 = vadd.xlane.f32.xlu1 %v3106_v15  ;;  %v3578_v8 = vpop.permute.xlu0 %3577 }
 0x9be   : > { %5890 = vmatmul.mubr.msk.f32.vlgmr.msra.gmra.mxu0 %vm1760_vm3, %v3115_v19 }
 0x9bf   : > { %5898 = vmatpush3.xpose.msk.msra.mxu0 %vm1455_vm2, %v3424_v58  ;;  %5899 = vmatprep.mubr.msk.f32.mxu0 %vm6536_vm1, %v6535_v14 }
 0x9c0   : > { %5907 = vmatprep.subr.mxu0 %v6535_v14 }
 0x9c2   : > { %5900 = vmatmul.mubr.msk.f32.vlgmr.msra.gmra.mxu0 %vm1455_vm2, %v3422_v2 }
 0x9c3   : > { %5908 = vmatpush3.xpose.msk.msra.mxu0 %vm1455_vm2, %v3580_v7  ;;  %5909 = vmatprep.mubr.msk.f32.mxu0 %vm6536_vm1, %v6535_v14 }
 0x9c4   : > { %5917 = vmatprep.subr.mxu0 %v6535_v14 }
 0x9c6   : > { %5910 = vmatmul.mubr.msk.f32.vlgmr.msra.gmra.mxu0 %vm1455_vm2, %v3578_v8 }
 0x9c7   : > { %5919 = vmatprep.mubr.msk.f32.mxu0 %vm6536_vm1, %v6535_v14 }
 0x9ce   : > { %3657 = vrot.lane.b32.xlu1 %v7085_v29, %s6539_s24 }
 0x9d2   : > { %3655 = vrot.lane.b32.xlu1 %v7090_v31, %s6539_s24 }
 0xa0d   : > { %v3102_v12 = vpop.xlane.xlu1 %3101 }
 0xa0e   : > { %6243 = vrcp.f32 %v3102_v12 }
 0xa11   : > { %v3502_v25 = vpop.permute.xlu1 %3501 }
 0xa15   : > { %v3500_v26 = vpop.permute.xlu1 %3499 }
 0xa1b   : > { %v6244_v13 = vpop.eup %6243 }
 0xa1c   : > { %v3114_v20 = vmul.f32 %v6244_v13, %v6236_v9 }
 0xa1e   : > { %5885 = vmatmul.mubr.msk.f32.vlgmr.msra.gmra.mxu1 %vm1760_vm3, %v3114_v20 }
 0xa1f   : > { %5893 = vmatpush3.msra.mxu1 %v3346_v10  ;;  %5894 = vmatprep.mubr.msk.f32.mxu1 %vm6536_vm1, %v6535_v14 }
 0xa20   : > { %5902 = vmatprep.subr.mxu1 %v6535_v14 }
 0xa46   : > { %v3108_v22 = vpop.xlane.xlu1 %3107 }
 0xa47   : > { %6245 = vrcp.f32 %v3108_v22 }
 0xa4a   : > { %v3658_v31 = vpop.permute.xlu1 %3657 }
 0xa4e   : > { %v3656_v28 = vpop.permute.xlu1 %3655 }
 0xa54   : > { %v6246_v29 = vpop.eup %6245 }
 0xa55   : > { %v3116_v27 = vmul.f32 %v6246_v29, %v6240_v61 }
 0xa57   : > { %5895 = vmatmul.mubr.msk.f32.vlgmr.msra.gmra.mxu1 %vm1760_vm3, %v3116_v27 }
 0xa58   : > { %5903 = vmatpush3.xpose.msk.msra.mxu1 %vm1455_vm2, %v3502_v25  ;;  %5904 = vmatprep.mubr.msk.f32.mxu1 %vm6536_vm1, %v6535_v14 }
 0xa59   : > { %5912 = vmatprep.subr.mxu1 %v6535_v14 }
 0xa5b   : > { %5905 = vmatmul.mubr.msk.f32.vlgmr.msra.gmra.mxu1 %vm1455_vm2, %v3500_v26 }
 0xa5c   : > { %5913 = vmatpush3.xpose.msk.msra.mxu1 %vm1455_vm2, %v3658_v31  ;;  %5914 = vmatprep.mubr.msk.f32.mxu1 %vm6536_vm1, %v6535_v14 }
 0xa5d   : > { %5922 = vmatprep.subr.mxu1 %v6535_v14 }
 0xa5f   : > { %5915 = vmatmul.mubr.msk.f32.vlgmr.msra.gmra.mxu1 %vm1455_vm2, %v3656_v28 }
 0xa60   : > { %5924 = vmatprep.mubr.msk.f32.mxu1 %vm6536_vm1, %v6535_v14 }
 0xa7a   : > { %v7333_v32 = vpop.f32.mrf.mxu0 }
 0xa7c   : > { %v5881_v35 = vpop.f32.mrf.mxu0 }
 0xa7e   : > { %v7335_v36 = vpop.f32.mrf.mxu0 }
 0xa80   : > { %v5891_v37 = vpop.f32.mrf.mxu0 }
 0xa82   : > { %v3495_v38 = vpop.f32.mrf.mxu0 }
 0xa83   : > { %v3733_v39 = vsel %vm1760_vm3, %v3495_v38, -inf }
 0xa84   : > { %3734 = vmax.xlane.f32.xlu0 %v3733_v39  ;;  %v5901_v40 = vpop.f32.mrf.mxu0 }
 0xa85   : > { %v4158_v40 = vld [vmem:[%s6887_s23 + $0x78] sm:$0xff] }
 0xa86   : > { %v3651_v42 = vpop.f32.mrf.mxu0 }
 0xa87   : > { %v3739_v44 = vsel %vm1760_vm3, %v3651_v42, -inf }
 0xa88   : > { %3740 = vmax.xlane.f32.xlu0 %v3739_v44  ;;  %v5911_v46 = vpop.f32.mrf.mxu0  ;;  %v4156_v44 = vld [vmem:[%s6887_s23 + $0x68] sm:$0xff] }
 0xa89   : > { %v4155_v46 = vld [vmem:[%s6887_s23 + $0x60] sm:$0xff] }
 0xade   : > { %v3265_v47 = vpop.f32.mrf.mxu1 }
 0xadf   : > { %v6174_v22 = vpack.i.bf16 %v3265_v47, %v7333_v32  ;;  %v4154_v47 = vld [vmem:[%s6887_s23 + $0x58] sm:$0xff] }
 0xae0   : > { %v5886_v48 = vpop.f32.mrf.mxu1 }
 0xae1   : > { %v4153_v48 = vld [vmem:[%s6887_s23 + $0x50] sm:$0xff] }
 0xb0d   : > { %v3735_v49 = vpop.xlane.xlu0 %3734 }
 0xb0e   : > { %v3745_v50 = vsub.f32 %v3495_v38, %v3735_v49  ;;  %v4152_v49 = vld [vmem:[%s6887_s23 + $0x48] sm:$0xff] }
 0xb10   : > { %v3749_v51 = vmul.f32 1.442695, %v3745_v50  ;;  %v4151_v50 = vld [vmem:[%s6887_s23 + $0x40] sm:$0xff] }
 0xb11   : > { %v3741_v52 = vpop.xlane.xlu0 %3740 }
 0xb12   : > { %v3747_v54 = vsub.f32 %v3651_v42, %v3741_v52  ;;  %6247 = vpow2.f32 %v3749_v51  ;;  %v4157_v42 = vld [vmem:[%s6887_s23 + $0x70] sm:$0xff]  ;;  %v4150_v51 = vld [vmem:[%s6887_s23 + $0x38] sm:$0xff] }
 0xb13   : > { %v4149_v52 = vld [vmem:[%s6887_s23 + $0x30] sm:$0xff] }
 0xb14   : > { %v3753_v55 = vmul.f32 1.442695, %v3747_v54  ;;  %v4148_v54 = vld [vmem:[%s6887_s23 + $0x28] sm:$0xff] }
 0xb16   : > { %6249 = vpow2.f32 %v3753_v55  ;;  %v4147_v55 = vld [vmem:[%s6887_s23 + $0x20] sm:$0xff] }
 0xb17   : > { %v7339_v9 = vpop.f32.mrf.mxu1 }
 0xb19   : > { %v5896_v11 = vpop.f32.mrf.mxu1 }
 0xb1a   : > { %v4146_v11 = vld [vmem:[%s6887_s23 + $0x18] sm:$0xff] }
 0xb1b   : > { %v3573_v21 = vpop.f32.mrf.mxu1 }
 0xb1c   : > { %v3736_v23 = vsel %vm1760_vm3, %v3573_v21, -inf }
 0xb1d   : > { %3737 = vmax.xlane.f32.xlu1 %v3736_v23  ;;  %v5906_v56 = vpop.f32.mrf.mxu1  ;;  %v4144_v23 = vld [vmem:[%s6887_s23 + $0x8] sm:$0xff] }
 0xb1e   : > { %v4143_v56 = vld [vmem:[%s6887_s23] sm:$0xff] }
 0xb1f   : > { %v3729_v57 = vpop.f32.mrf.mxu1  ;;  %v6248_v59 = vpop.eup %6247 }
 0xb20   : > { %v3742_v58 = vsel %vm1760_vm3, %v3729_v57, -inf  ;;  %v3757_v61 = vsel %vm1760_vm3, %v6248_v59, 0.0 }
 0xb21   : > { %3743 = vmax.xlane.f32.xlu0 %v3742_v58  ;;  %v5916_v60 = vpop.f32.mrf.mxu1 }
 0xb23   : > { %v6250_v2 = vpop.eup %6249 }
 0xb24   : > { %v3763_v5 = vsel %vm1760_vm3, %v6250_v2, 0.0 }
 0xb25   : > { %3758 = vadd.xlane.f32.xlu0 %v3757_v61 }
 0xb29   : > { %3764 = vadd.xlane.f32.xlu0 %v3763_v5 }
 0xb3f   : > { %3777 = vrot.lane.b32.xlu0 %v7088_v30, %s6539_s24 }
 0xb43   : > { %6170 = vrot.lane.b32.xlu0 %v6169_v18, %s6539_s24 }
 0xba6   : > { %v3738_v6 = vpop.xlane.xlu1 %3737 }
 0xba7   : > { %v3746_v15 = vsub.f32 %v3573_v21, %v3738_v6  ;;  %v4145_v21 = vld [vmem:[%s6887_s23 + $0x10] sm:$0xff] }
 0xba9   : > { %v3751_v19 = vmul.f32 1.442695, %v3746_v15 }
 0xbaa   : > { %v3744_v7 = vpop.xlane.xlu0 %3743 }
 0xbab   : > { %6251 = vpow2.f32 %v3751_v19  ;;  %v3748_v62 = vsub.f32 %v3729_v57, %v3744_v7 }
 0xbad   : > { %v3755_v16 = vmul.f32 1.442695, %v3748_v62 }
 0xbae   : > { %v3759_v8 = vpop.xlane.xlu0 %3758 }
 0xbaf   : > { %6253 = vrcp.f32 %v3759_v8 }
 0xbb0   : > { %6255 = vpow2.f32 %v3755_v16 }
 0xbb2   : > { %v3765_v10 = vpop.xlane.xlu0 %3764 }
 0xbb3   : > { %6257 = vrcp.f32 %v3765_v10 }
 0xbb6   : > { %v3778_v12 = vpop.permute.xlu0 %3777 }
 0xbb7   : > { %5918 = vmatpush3.msra.mxu0 %v3778_v12 }
 0xbb8   : > { %v6252_v13 = vpop.eup %6251  ;;  %5927 = vmatprep.subr.mxu0 %v6535_v14 }
 0xbb9   : > { %v3760_v30 = vsel %vm1760_vm3, %v6252_v13, 0.0 }
 0xbba   : > { %3761 = vadd.xlane.f32.xlu1 %v3760_v30  ;;  %v6171_v19 = vpop.permute.xlu0 %6170 }
 0xbbb   : > { %v6173_v8 = vunpack.i.h.bf16 %v6171_v19  ;;  %v6172_v10 = vunpack.i.l.bf16 %v6171_v19 }
 0xbbc   : > { %v6254_v20 = vpop.eup %6253 }
 0xbbd   : > { %v3773_v25 = vmul.f32 %v6254_v20, %v6248_v59  ;;  %v6256_v18 = vpop.eup %6255  ;;  %v4130_v20 = vsel %vm1455_vm2, %v7181_v43, %v6173_v8  ;;  %v4347_v8 = vld [vmem:[%s6893_s25 + $0xc8] sm:$0xff] }
 0xbbe   : > { %v3766_v26 = vsel %vm1760_vm3, %v6256_v18, 0.0 }
 0xbbf   : > { %5920 = vmatmul.mubr.msk.f32.vlgmr.msra.gmra.mxu0 %vm1760_vm3, %v3773_v25  ;;  %v4129_v25 = vsel %vm1455_vm2, %v7179_v41, %v6172_v10  ;;  %v4346_v10 = vld [vmem:[%s6893_s25 + $0xc0] sm:$0xff] }
 0xbc0   : > { %5929 = vmatprep.mubr.msk.f32.mxu0 %vm6536_vm1, %v6535_v14  ;;  %v6258_v27 = vpop.eup %6257 }
 0xbc1   : > { %v3775_v28 = vmul.f32 %v6258_v27, %v6250_v2  ;;  %v6189_v2 = vpack.i.bf16 %v7339_v9, %v7335_v36 }
 0xbcb   : > { %3853 = vrot.lane.b32.xlu1 %v7097_v33, %s6539_s24  ;;  %v6184_v33 = vpack.i.bf16 %v7265_v24, %v7257_v4 }
 0xbcf   : > { %3929 = vrot.lane.b32.xlu1 %v7141_v17, %s6539_s24 }
 0xbf3   : > { %3767 = vadd.xlane.f32.xlu1 %v3766_v26 }
 0xc04   : > { %4005 = vrot.lane.b32.xlu1 %v7100_v34, %s6539_s24 }
 0xc08   : > { %6175 = vrot.lane.b32.xlu1 %v6174_v22, %s6538_s4 }
 0xc0c   : > { %6185 = vrot.lane.b32.xlu1 %v6184_v33, %s6539_s24 }
 0xc43   : > { %v3762_v17 = vpop.xlane.xlu1 %3761 }
 0xc44   : > { %6259 = vrcp.f32 %v3762_v17 }
 0xc47   : > { %v3854_v29 = vpop.permute.xlu1 %3853 }
 0xc48   : > { %5923 = vmatpush3.msra.mxu1 %v3854_v29 }
 0xc49   : > { %5932 = vmatprep.subr.mxu1 %v6535_v14 }
 0xc4b   : > { %v3930_v31 = vpop.permute.xlu1 %3929 }
 0xc4c   : > { %5928 = vmatpush3.msra.mxu0 %v3930_v31 }
 0xc4d   : > { %5930 = vmatmul.mubr.msk.f32.vlgmr.msra.gmra.mxu0 %vm1760_vm3, %v3775_v28  ;;  %5937 = vmatprep.subr.mxu0 %v4158_v40 }
 0xc4e   : > { %5938 = vmatpush3.msra.mxu0 %v4158_v40 }
 0xc4f   : > { %5939 = vmatprep.subr.mxu0 %v4157_v42 }
 0xc50   : > { %5940 = vmatpush3.msra.mxu0 %v4157_v42 }
 0xc51   : > { %v6260_v34 = vpop.eup %6259  ;;  %5941 = vmatprep.subr.mxu0 %v4156_v44 }
 0xc52   : > { %v3774_v32 = vmul.f32 %v6260_v34, %v6252_v13  ;;  %5942 = vmatpush3.msra.mxu0 %v4156_v44 }
 0xc53   : > { %5943 = vmatprep.subr.mxu0 %v4155_v46 }
 0xc54   : > { %5925 = vmatmul.mubr.msk.f32.vlgmr.msra.gmra.mxu1 %vm1760_vm3, %v3774_v32  ;;  %5944 = vmatpush3.msra.mxu0 %v4155_v46  ;;  %v6312_v46 = vld [vmem:[#allocation2 + $0x10] sm:$0xff] }
 0xc55   : > { %5934 = vmatprep.mubr.msk.f32.mxu1 %vm6536_vm1, %v6535_v14  ;;  %5945 = vmatprep.subr.mxu0 %v4154_v47 }
 0xc56   : > { %5946 = vmatpush3.msra.mxu0 %v4154_v47 }
 0xc57   : > { %5947 = vmatprep.subr.mxu0 %v4153_v48 }
 0xc58   : > { %5948 = vmatpush3.msra.mxu0 %v4153_v48 }
 0xc59   : > { %5949 = vmatprep.subr.mxu0 %v4152_v49 }
 0xc5a   : > { %5950 = vmatpush3.msra.mxu0 %v4152_v49 }
 0xc5b   : > { %5951 = vmatprep.subr.mxu0 %v4151_v50 }
 0xc5c   : > { %5952 = vmatpush3.msra.mxu0 %v4151_v50 }
 0xc5d   : > { %5953 = vmatprep.subr.mxu0 %v4150_v51 }
 0xc5e   : > { %5954 = vmatpush3.msra.mxu0 %v4150_v51 }
 0xc5f   : > { %5955 = vmatprep.subr.mxu0 %v4149_v52 }
 0xc60   : > { %5956 = vmatpush3.msra.mxu0 %v4149_v52  ;;  %v6313_v52 = vld [vmem:[#allocation2 + $0x18] sm:$0xff] }
 0xc61   : > { %5957 = vmatprep.subr.mxu0 %v4148_v54 }
 0xc62   : > { %5958 = vmatpush3.msra.mxu0 %v4148_v54 }
 0xc63   : > { %5959 = vmatprep.subr.mxu0 %v4147_v55 }
 0xc64   : > { %5960 = vmatpush3.msra.mxu0 %v4147_v55  ;;  %v6314_v55 = vld [vmem:[#allocation2 + $0x8] sm:$0xff] }
 0xc65   : > { %5961 = vmatprep.subr.mxu0 %v4146_v11 }
 0xc66   : > { %5962 = vmatpush3.msra.mxu0 %v4146_v11 }
 0xc67   : > { %5963 = vmatprep.subr.mxu0 %v4145_v21 }
 0xc68   : > { %5964 = vmatpush3.msra.mxu0 %v4145_v21  ;;  %v4353_v21 = vld [vmem:[%s6893_s25 + $0xf8] sm:$0xff] }
 0xc69   : > { %5965 = vmatprep.subr.mxu0 %v4144_v23 }
 0xc6a   : > { %5966 = vmatpush3.msra.mxu0 %v4144_v23  ;;  %v4352_v23 = vld [vmem:[%s6893_s25 + $0xf0] sm:$0xff] }
 0xc6b   : > { %5967 = vmatprep.subr.mxu0 %v4143_v56 }
 0xc6c   : > { %5968 = vmatpush3.msra.mxu0 %v4143_v56  ;;  %v4351_v56 = vld [vmem:[%s6893_s25 + $0xe8] sm:$0xff] }
 0xc7c   : > { %v3768_v4 = vpop.xlane.xlu1 %3767 }
 0xc7d   : > { %6261 = vrcp.f32 %v3768_v4 }
 0xc7f   : > { %v3849_v24 = vpop.f32.mrf.mxu0 }
 0xc80   : > { %v4006_v35 = vpop.permute.xlu1 %4005 }
 0xc81   : > { %5933 = vmatpush3.msra.mxu1 %v4006_v35  ;;  %v5921_v37 = vpop.f32.mrf.mxu0 }
 0xc82   : > { %4366 = vmatprep.subr.mxu1 %v4353_v21 }
 0xc84   : > { %v6176_v7 = vpop.permute.xlu1 %6175 }
 0xc85   : > { %v6178_v12 = vunpack.i.h.bf16 %v6176_v7  ;;  %v6177_v13 = vunpack.i.l.bf16 %v6176_v7 }
 0xc87   : > { %v4134_v62 = vsel %vm4133_vm4, %v4129_v25, %v6177_v13  ;;  %v4135_v16 = vsel %vm4133_vm4, %v4130_v20, %v6178_v12  ;;  %v4345_v12 = vld [vmem:[%s6893_s25 + $0xb8] sm:$0xff]  ;;  %v4344_v13 = vld [vmem:[%s6893_s25 + $0xb0] sm:$0xff]  ;;  %v4342_v20 = vld [vmem:[%s6893_s25 + $0xa0] sm:$0xff] }
 0xc88   : > { %v6186_v22 = vpop.permute.xlu1 %6185  ;;  %v4339_v25 = vld [vmem:[%s6893_s25 + $0x88] sm:$0xff] }
 0xc89   : > { %v6188_v17 = vunpack.i.h.bf16 %v6186_v22  ;;  %v6187_v43 = vunpack.i.l.bf16 %v6186_v22  ;;  %v4334_v22 = vld [vmem:[%s6893_s25 + $0x60] sm:$0xff] }
 0xc8a   : > { %v6262_v38 = vpop.eup %6261 }
 0xc8b   : > { %v3776_v39 = vmul.f32 %v6262_v38, %v6256_v18  ;;  %v4131_v34 = vsel %vm1455_vm2, %v7183_v45, %v6187_v43  ;;  %v4132_v32 = vsel %vm1455_vm2, %v7187_v53, %v6188_v17  ;;  %v5523_v38 = vld [vmem:[%s988_s9] ss:$0 sm:$0xff]  ;;  %v4332_v17 = vld [vmem:[%s6893_s25 + $0x50] sm:$0xff]  ;;  %v4331_v43 = vld [vmem:[%s6893_s25 + $0x48] sm:$0xff] }
 0xc8c   : > { %v6311_v53 = vld [vmem:[#allocation2] sm:$0xff] }
 0xc8d   : > { %5935 = vmatmul.mubr.msk.f32.vlgmr.msra.gmra.mxu1 %vm1760_vm3, %v3776_v39 }
 0xc8e   : > { %4430 = vmatprep.mubr.f32.mxu1 %v6535_v14  ;;  %4367 = vmatpush1.msra.mxu1 %v4352_v23  ;;  %v5525_v23 = vld [vmem:[%s7904_s19] ss:$0 sm:$0xff] }
 0xc8f   : > { %4368 = vmatprep.subr.mxu1 %v4351_v56 }
 0xd0d   : > { %v4001_v57 = vpop.f32.mrf.mxu0 }
 0xd0f   : > { %v5931_v58 = vpop.f32.mrf.mxu0 }
 0xd10   : > { %v4349_v58 = vld [vmem:[%s6893_s25 + $0xd8] sm:$0xff] }
 0xd14   : > { %v3925_v59 = vpop.f32.mrf.mxu1 }
 0xd15   : > { %v6179_v60 = vpack.i.bf16 %v3925_v59, %v3849_v24  ;;  %v4348_v59 = vld [vmem:[%s6893_s25 + $0xd0] sm:$0xff] }
 0xd16   : > { %v5926_v61 = vpop.f32.mrf.mxu1 }
 0xd17   : > { %6180 = vrot.lane.b32.xlu0 %v6179_v60, %s6537_s1 }
 0xd1b   : > { %6190 = vrot.lane.b32.xlu0 %v6189_v2, %s6538_s4  ;;  %s7907_s4 = sld [smem:[#allocation34_spill]] (!%p5529_p9) }
 0xd4d   : > { %v4077_v5 = vpop.f32.mrf.mxu1 }
 0xd4e   : > { %v6194_v6 = vpack.i.bf16 %v4077_v5, %v4001_v57  ;;  %v4350_v57 = vld [vmem:[%s6893_s25 + $0xe0] sm:$0xff] }
 0xd4f   : > { %v5936_v15 = vpop.f32.mrf.mxu1  ;;  %4369 = vmatpush1.msra.mxu1 %v4350_v57 }
 0xd50   : > { %6195 = vrot.lane.b32.xlu1 %v6194_v6, %s6537_s1  ;;  %4370 = vmatprep.subr.mxu1 %v4349_v58 }
 0xd51   : > { %4371 = vmatpush1.msra.mxu1 %v4348_v59 }
 0xd52   : > { %4372 = vmatprep.subr.mxu1 %v4347_v8 }
 0xd53   : > { %4373 = vmatpush1.msra.mxu1 %v4346_v10 }
 0xd54   : > { %4374 = vmatprep.subr.mxu1 %v4345_v12 }
 0xd55   : > { %4375 = vmatpush1.msra.mxu1 %v4344_v13 }
 0xd89   : > { %v6181_v30 = vpop.permute.xlu0 %6180 }
 0xd8a   : > { %v6183_v36 = vunpack.i.h.bf16 %v6181_v30  ;;  %v6182_v9 = vunpack.i.l.bf16 %v6181_v30  ;;  %v4343_v30 = vld [vmem:[%s6893_s25 + $0xa8] sm:$0xff] }
 0xd8b   : > { %4376 = vmatprep.subr.mxu1 %v4343_v30 }
 0xd8c   : > { %v4139_v18 = vsel %vm4138_vm5, %v4134_v62, %v6182_v9  ;;  %v4140_v26 = vsel %vm4138_vm5, %v4135_v16, %v6183_v36  ;;  %4377 = vmatpush1.msra.mxu1 %v4342_v20  ;;  %v4341_v36 = vld [vmem:[%s6893_s25 + $0x98] sm:$0xff]  ;;  %v4340_v9 = vld [vmem:[%s6893_s25 + $0x90] sm:$0xff]  ;;  %v4338_v62 = vld [vmem:[%s6893_s25 + $0x80] sm:$0xff] }
 0xd8d   : > { %5969 = vmatprep.mubr.f32.mxu0 %v4139_v18  ;;  %v6191_v33 = vpop.permute.xlu0 %6190  ;;  %4378 = vmatprep.subr.mxu1 %v4341_v36  ;;  %v4337_v16 = vld [vmem:[%s6893_s25 + $0x78] sm:$0xff]  ;;  %v4336_v18 = vld [vmem:[%s6893_s25 + $0x70] sm:$0xff] }
 0xd8e   : > { %5970 = vmatmul.mubr.f32.vlgmr.msra.gmra.mxu0 %v4140_v26  ;;  %v6193_v29 = vunpack.i.h.bf16 %v6191_v33  ;;  %v6192_v27 = vunpack.i.l.bf16 %v6191_v33  ;;  %4379 = vmatpush1.msra.mxu1 %v4340_v9  ;;  %v4335_v26 = vld [vmem:[%s6893_s25 + $0x68] sm:$0xff]  ;;  %v4333_v33 = vld [vmem:[%s6893_s25 + $0x58] sm:$0xff]  ;;  %v4701_v9 = vld [vmem:[%s6895_s2 + $0xf0] sm:$0xff] }
 0xd8f   : > { %4380 = vmatprep.subr.mxu1 %v4339_v25  ;;  %v4702_v20 = vld [vmem:[%s6895_s2 + $0xf8] sm:$0xff]  ;;  %v4685_v25 = vld [vmem:[%s6895_s2 + $0x70] sm:$0xff] }
 0xd90   : > { %v4136_v4 = vsel %vm4133_vm4, %v4131_v34, %v6192_v27  ;;  %v4137_v24 = vsel %vm4133_vm4, %v4132_v32, %v6193_v29  ;;  %4381 = vmatpush1.msra.mxu1 %v4338_v62  ;;  %v4330_v29 = vld [vmem:[%s6893_s25 + $0x40] sm:$0xff]  ;;  %v4329_v27 = vld [vmem:[%s6893_s25 + $0x38] sm:$0xff]  ;;  %v4324_v32 = vld [vmem:[%s6893_s25 + $0x10] sm:$0xff]  ;;  %5651 = vmatprep.subr.mxu0 %v4702_v20 }
 0xd91   : > { %4382 = vmatprep.subr.mxu1 %v4337_v16  ;;  %v4325_v34 = vld [vmem:[%s6893_s25 + $0x18] sm:$0xff]  ;;  %v4684_v62 = vld [vmem:[%s6895_s2 + $0x68] sm:$0xff]  ;;  %v4699_v16 = vld [vmem:[%s6895_s2 + $0xe0] sm:$0xff] }
 0xd92   : > { %4383 = vmatpush1.msra.mxu1 %v4336_v18  ;;  %v4686_v36 = vld [vmem:[%s6895_s2 + $0x78] sm:$0xff]  ;;  %v4683_v18 = vld [vmem:[%s6895_s2 + $0x60] sm:$0xff] }
 0xd93   : > { %4384 = vmatprep.subr.mxu1 %v4335_v26  ;;  %5652 = vmatpush3.msra.mxu0 %v4686_v36  ;;  %v4698_v26 = vld [vmem:[%s6895_s2 + $0xd8] sm:$0xff] }
 0xd94   : > { %4385 = vmatpush1.msra.mxu1 %v4334_v22  ;;  %5653 = vmatprep.subr.mxu0 %v4701_v9  ;;  %v4682_v22 = vld [vmem:[%s6895_s2 + $0x58] sm:$0xff] }
 0xd95   : > { %4386 = vmatprep.subr.mxu1 %v4333_v33  ;;  %5654 = vmatpush3.msra.mxu0 %v4685_v25  ;;  %v4697_v33 = vld [vmem:[%s6895_s2 + $0xd0] sm:$0xff] }
 0xd96   : > { %4387 = vmatpush1.msra.mxu1 %v4332_v17  ;;  %v4681_v17 = vld [vmem:[%s6895_s2 + $0x50] sm:$0xff] }
 0xd97   : > { %4388 = vmatprep.subr.mxu1 %v4331_v43  ;;  %v4696_v43 = vld [vmem:[%s6895_s2 + $0xc8] sm:$0xff] }
 0xd98   : > { %4389 = vmatpush1.msra.mxu1 %v4330_v29  ;;  %v4680_v29 = vld [vmem:[%s6895_s2 + $0x48] sm:$0xff] }
 0xd99   : > { %4390 = vmatprep.subr.mxu1 %v4329_v27  ;;  %v4695_v27 = vld [vmem:[%s6895_s2 + $0xc0] sm:$0xff] }
 0xdc2   : > { %v6196_v31 = vpop.permute.xlu1 %6195 }
 0xdc3   : > { %v6198_v28 = vunpack.i.h.bf16 %v6196_v31  ;;  %v6197_v41 = vunpack.i.l.bf16 %v6196_v31  ;;  %v4328_v31 = vld [vmem:[%s6893_s25 + $0x30] sm:$0xff] }
 0xdc4   : > { %4391 = vmatpush1.msra.mxu1 %v4328_v31  ;;  %v4679_v31 = vld [vmem:[%s6895_s2 + $0x40] sm:$0xff] }
 0xdc5   : > { %v4141_v35 = vsel %vm4138_vm5, %v4136_v4, %v6197_v41  ;;  %v4142_v37 = vsel %vm4138_vm5, %v4137_v24, %v6198_v28  ;;  %v4327_v28 = vld [vmem:[%s6893_s25 + $0x28] sm:$0xff]  ;;  %v4326_v41 = vld [vmem:[%s6893_s25 + $0x20] sm:$0xff] }
 0xdc6   : > { %5972 = vmatprep.mubr.f32.mxu0 %v4141_v35  ;;  %4392 = vmatprep.subr.mxu1 %v4327_v28  ;;  %v4323_v4 = vld [vmem:[%s6893_s25 + $0x8] sm:$0xff]  ;;  %v4322_v24 = vld [vmem:[%s6893_s25] sm:$0xff]  ;;  %v4694_v28 = vld [vmem:[%s6895_s2 + $0xb8] sm:$0xff] }
 0xdc7   : > { %5973 = vmatmul.mubr.f32.gmra.mxu0 %v4142_v37  ;;  %4393 = vmatpush1.msra.mxu1 %v4326_v41  ;;  %v4678_v41 = vld [vmem:[%s6895_s2 + $0x38] sm:$0xff] }
 0xdc8   : > { %4394 = vmatprep.subr.mxu1 %v4325_v34  ;;  %v4693_v34 = vld [vmem:[%s6895_s2 + $0xb0] sm:$0xff] }
 0xdc9   : > { %4395 = vmatpush1.msra.mxu1 %v4324_v32  ;;  %v4677_v32 = vld [vmem:[%s6895_s2 + $0x30] sm:$0xff] }
 0xdca   : > { %4396 = vmatprep.subr.mxu1 %v4323_v4  ;;  %v4692_v4 = vld [vmem:[%s6895_s2 + $0xa8] sm:$0xff] }
 0xdcb   : > { %4397 = vmatpush1.msra.mxu1 %v4322_v24  ;;  %v4676_v24 = vld [vmem:[%s6895_s2 + $0x28] sm:$0xff] }
 0xdcc   : > { %6049 = vmatprep.subr.mxu1 %v4702_v20 }
 0xe4e   : > { %v5971_v39 = vpop.f32.mrf.mxu0 }
 0xe4f   : > { %v4238_v45 = vadd.f32 %v5971_v39, %v5523_v38 }
 0xe50   : > { %v4232_v40 = vpop.f32.mrf.mxu0 }
 0xe51   : > { %v4233_v42 = vadd.f32 %v5523_v38, %v4232_v40  ;;  %v4252_v44 = vadd.f32 %v6311_v53, %v4238_v45 }
 0xe53   : > { %4259 = vadd.xlane.f32.xlu1 %v4252_v44  ;;  %v4251_v47 = vadd.f32 %v6312_v46, %v4233_v42 }
 0xe55   : > { %4257 = vadd.xlane.f32.xlu0 %v4251_v47 }
 0xe87   : > { %v5974_v48 = vpop.f32.mrf.mxu0 }
 0xe88   : > { %v4248_v51 = vadd.f32 %v5974_v48, %v5523_v38 }
 0xe89   : > { %v4242_v49 = vpop.f32.mrf.mxu0 }
 0xe8a   : > { %v4243_v50 = vadd.f32 %v5523_v38, %v4242_v49  ;;  %v7420_v11 = vadd.f32 %v6314_v55, %v4248_v51 }
 0xe8c   : > { %v7417_v54 = vadd.f32 %v6313_v52, %v4243_v50 }
 0xe8e   : > { %4261 = vadd.xlane.f32.xlu0 %v7417_v54 }
 0xe92   : > { %4263 = vadd.xlane.f32.xlu0 %v7420_v11 }
 0xedc   : > { %v4260_v60 = vpop.xlane.xlu1 %4259 }
 0xedd   : > { %v4267_v61 = vmul.f32 0.0078125, %v4260_v60 }
 0xede   : > { %v4258_v2 = vpop.xlane.xlu0 %4257 }
 0xedf   : > { %v7429_v5 = vsub.f32 %v4252_v44, %v4267_v61  ;;  %v4266_v6 = vmul.f32 0.0078125, %v4258_v2 }
 0xee1   : > { %v7431_v15 = vsub.f32 %v4251_v47, %v4266_v6  ;;  %v4275_v19 = vmul.f32 %v7429_v5, %v7429_v5 }
 0xee3   : > { %4280 = vadd.xlane.f32.xlu1 %v4275_v19  ;;  %v4274_v7 = vmul.f32 %v7431_v15, %v7431_v15 }
 0xee5   : > { %4278 = vadd.xlane.f32.xlu0 %v4274_v7 }
 0xf17   : > { %v4262_v35 = vpop.xlane.xlu0 %4261 }
 0xf18   : > { %v4268_v37 = vmul.f32 0.0078125, %v4262_v35  ;;  %v4691_v35 = vld [vmem:[%s6895_s2 + $0xa0] sm:$0xff] }
 0xf1a   : > { %v4272_v38 = vsub.f32 %v7417_v54, %v4268_v37  ;;  %v4675_v37 = vld [vmem:[%s6895_s2 + $0x20] sm:$0xff] }
 0xf1b   : > { %v4264_v39 = vpop.xlane.xlu0 %4263 }
 0xf1c   : > { %v4269_v45 = vmul.f32 0.0078125, %v4264_v39  ;;  %v4276_v40 = vmul.f32 %v4272_v38, %v4272_v38  ;;  %v4674_v39 = vld [vmem:[%s6895_s2 + $0x18] sm:$0xff] }
 0xf1e   : > { %v4273_v42 = vsub.f32 %v7420_v11, %v4269_v45  ;;  %4282 = vadd.xlane.f32.xlu0 %v4276_v40  ;;  %v5524_v11 = vld [vmem:[%s7903_s0] ss:$0 sm:$0xff]  ;;  %v4689_v45 = vld [vmem:[%s6895_s2 + $0x90] sm:$0xff] }
 0xf1f   : > { %v4673_v40 = vld [vmem:[%s6895_s2 + $0x10] sm:$0xff] }
 0xf20   : > { %v4277_v53 = vmul.f32 %v4273_v42, %v4273_v42 }
 0xf22   : > { %4284 = vadd.xlane.f32.xlu1 %v4277_v53  ;;  %v4672_v53 = vld [vmem:[%s6895_s2 + $0x8] sm:$0xff] }
 0xf6c   : > { %v4281_v44 = vpop.xlane.xlu1 %4280 }
 0xf6d   : > { %v4287_v46 = vmul.f32 0.0078125, %v4281_v44  ;;  %v4687_v44 = vld [vmem:[%s6895_s2 + $0x80] sm:$0xff] }
 0xf6e   : > { %v4279_v47 = vpop.xlane.xlu0 %4278 }
 0xf6f   : > { %v4291_v48 = vadd.f32 1e-05, %v4287_v46  ;;  %v4286_v49 = vmul.f32 0.0078125, %v4279_v47  ;;  %v4671_v46 = vld [vmem:[%s6895_s2] sm:$0xff] }
 0xf70   : > { %v4354_v47 = vld [vmem:[%s6927_s26] sm:$0x3] }
 0xf71   : > { %6263 = vrsqrt.f32 %v4291_v48  ;;  %v4290_v50 = vadd.f32 1e-05, %v4286_v49  ;;  %v7527_v48 = vrot.slane %v4354_v47, %v1264_v1  ;;  %v7531_v49 = vrot.slane %v4354_v47, %v1268_v3 }
 0xf73   : > { %6265 = vrsqrt.f32 %v4290_v50 }
 0xf7e   : > { %v6264_v51 = vpop.eup %6263 }
 0xf7f   : > { %v4299_v55 = vmul.f32 %v6264_v51, %v7429_v5 }
 0xf80   : > { %v6266_v52 = vpop.eup %6265 }
 0xf81   : > { %v4298_v54 = vmul.f32 %v6266_v52, %v7431_v15  ;;  %v4309_v57 = vmul.f32 %v5524_v11, %v4299_v55 }
 0xf83   : > { %v4308_v21 = vmul.f32 %v5524_v11, %v4298_v54  ;;  %v7481_v58 = vadd.f32 %v5525_v23, %v4309_v57 }
 0xf85   : > { %v7477_v56 = vadd.f32 %v5525_v23, %v4308_v21 }
 0xf87   : > { %4431 = vmatmul.mubr.f32.vlgmr.msra.gmra.mxu1 %v7477_v56 }
 0xf88   : > { %4436 = vmatprep.mubr.f32.mxu1 %v6535_v14  ;;  %6065 = vmatpush3.msra.mxu1 %v4686_v36 }
 0xf89   : > { %6050 = vmatprep.subr.mxu1 %v4701_v9 }
 0xf8a   : > { %6066 = vmatpush3.msra.mxu1 %v4685_v25 }
 0xf8b   : > { %4437 = vmatmul.mubr.f32.gmra.mxu1 %v7481_v58 }
 0xf8c   : > { %4442 = vmatprep.mubr.f32.mxu1 %v6535_v14 }
 0xfa7   : > { %v4283_v59 = vpop.xlane.xlu0 %4282 }
 0xfa8   : > { %v4288_v60 = vmul.f32 0.0078125, %v4283_v59 }
 0xfaa   : > { %v4292_v61 = vadd.f32 1e-05, %v4288_v60 }
 0xfab   : > { %v4285_v2 = vpop.xlane.xlu1 %4284 }
 0xfac   : > { %6267 = vrsqrt.f32 %v4292_v61  ;;  %v4289_v5 = vmul.f32 0.0078125, %v4285_v2 }
 0xfae   : > { %v4293_v6 = vadd.f32 1e-05, %v4289_v5 }
 0xfb0   : > { %6269 = vrsqrt.f32 %v4293_v6 }
 0xfb9   : > { %v6268_v15 = vpop.eup %6267 }
 0xfba   : > { %v4300_v19 = vmul.f32 %v6268_v15, %v4272_v38  ;;  %v4690_v38 = vld [vmem:[%s6895_s2 + $0x98] sm:$0xff] }
 0xfbc   : > { %v4310_v7 = vmul.f32 %v5524_v11, %v4300_v19 }
 0xfbd   : > { %v6270_v8 = vpop.eup %6269 }
 0xfbe   : > { %v7485_v10 = vadd.f32 %v5525_v23, %v4310_v7  ;;  %v4301_v12 = vmul.f32 %v6270_v8, %v4273_v42  ;;  %v4688_v42 = vld [vmem:[%s6895_s2 + $0x88] sm:$0xff] }
 0xfc0   : > { %4443 = vmatmul.mubr.f32.gmra.mxu1 %v7485_v10  ;;  %v4311_v13 = vmul.f32 %v5524_v11, %v4301_v12 }
 0xfc1   : > { %4448 = vmatprep.mubr.f32.mxu1 %v6535_v14  ;;  %v4700_v14 = vld [vmem:[%s6895_s2 + $0xe8] sm:$0xff] }
 0xfc2   : > { %v7489_v30 = vadd.f32 %v5525_v23, %v4311_v13  ;;  %5655 = vmatprep.subr.mxu0 %v4700_v14  ;;  %6051 = vmatprep.subr.mxu1 %v4700_v14 }
 0xfc3   : > { %5656 = vmatpush3.msra.mxu0 %v4684_v62  ;;  %6067 = vmatpush3.msra.mxu1 %v4684_v62 }
 0xfc4   : > { %4449 = vmatmul.mubr.f32.gmra.mxu1 %v7489_v30  ;;  %5657 = vmatprep.subr.mxu0 %v4699_v16 }
 0xfc5   : > { %6052 = vmatprep.subr.mxu1 %v4699_v16  ;;  %5658 = vmatpush3.msra.mxu0 %v4683_v18 }
 0xfc6   : > { %6068 = vmatpush3.msra.mxu1 %v4683_v18  ;;  %5659 = vmatprep.subr.mxu0 %v4698_v26 }
 0xfc7   : > { %6053 = vmatprep.subr.mxu1 %v4698_v26  ;;  %5660 = vmatpush3.msra.mxu0 %v4682_v22 }
 0xfc8   : > { %6069 = vmatpush3.msra.mxu1 %v4682_v22  ;;  %5661 = vmatprep.subr.mxu0 %v4697_v33 }
 0xfc9   : > { %6054 = vmatprep.subr.mxu1 %v4697_v33  ;;  %5662 = vmatpush3.msra.mxu0 %v4681_v17 }
 0xfca   : > { %6070 = vmatpush3.msra.mxu1 %v4681_v17  ;;  %5663 = vmatprep.subr.mxu0 %v4696_v43 }
 0xfcb   : > { %6055 = vmatprep.subr.mxu1 %v4696_v43  ;;  %5664 = vmatpush3.msra.mxu0 %v4680_v29 }
 0xfcc   : > { %6071 = vmatpush3.msra.mxu1 %v4680_v29  ;;  %5665 = vmatprep.subr.mxu0 %v4695_v27 }
 0xfcd   : > { %6056 = vmatprep.subr.mxu1 %v4695_v27  ;;  %5666 = vmatpush3.msra.mxu0 %v4679_v31 }
 0xfce   : > { %6072 = vmatpush3.msra.mxu1 %v4679_v31  ;;  %5667 = vmatprep.subr.mxu0 %v4694_v28 }
 0xfcf   : > { %6057 = vmatprep.subr.mxu1 %v4694_v28  ;;  %5668 = vmatpush3.msra.mxu0 %v4678_v41 }
 0xfd0   : > { %6073 = vmatpush3.msra.mxu1 %v4678_v41  ;;  %5669 = vmatprep.subr.mxu0 %v4693_v34 }
 0xfd1   : > { %6058 = vmatprep.subr.mxu1 %v4693_v34  ;;  %5670 = vmatpush3.msra.mxu0 %v4677_v32 }
 0xfd2   : > { %6074 = vmatpush3.msra.mxu1 %v4677_v32  ;;  %5671 = vmatprep.subr.mxu0 %v4692_v4 }
 0xfd3   : > { %6059 = vmatprep.subr.mxu1 %v4692_v4  ;;  %5672 = vmatpush3.msra.mxu0 %v4676_v24 }
 0xfd4   : > { %6075 = vmatpush3.msra.mxu1 %v4676_v24  ;;  %5673 = vmatprep.subr.mxu0 %v4691_v35 }
 0xfd5   : > { %6060 = vmatprep.subr.mxu1 %v4691_v35  ;;  %5674 = vmatpush3.msra.mxu0 %v4675_v37 }
 0xfd6   : > { %6076 = vmatpush3.msra.mxu1 %v4675_v37  ;;  %5675 = vmatprep.subr.mxu0 %v4690_v38 }
 0xfd7   : > { %6061 = vmatprep.subr.mxu1 %v4690_v38  ;;  %5676 = vmatpush3.msra.mxu0 %v4674_v39 }
 0xfd8   : > { %6077 = vmatpush3.msra.mxu1 %v4674_v39  ;;  %5677 = vmatprep.subr.mxu0 %v4689_v45 }
 0xfd9   : > { %6062 = vmatprep.subr.mxu1 %v4689_v45  ;;  %5678 = vmatpush3.msra.mxu0 %v4673_v40 }
 0xfda   : > { %6078 = vmatpush3.msra.mxu1 %v4673_v40  ;;  %5679 = vmatprep.subr.mxu0 %v4688_v42 }
 0xfdb   : > { %6063 = vmatprep.subr.mxu1 %v4688_v42  ;;  %5680 = vmatpush3.msra.mxu0 %v4672_v53 }
 0xfdc   : > { %6079 = vmatpush3.msra.mxu1 %v4672_v53  ;;  %5681 = vmatprep.subr.mxu0 %v4687_v44 }
 0xfdd   : > { %6064 = vmatprep.subr.mxu1 %v4687_v44  ;;  %5682 = vmatpush3.msra.mxu0 %v4671_v46 }
 0xfde   : > { %6080 = vmatpush3.msra.mxu1 %v4671_v46 }
0x1047   : > { %v4432_v50 = vpop.f32.mrf.mxu1 }
0x1048   : > { %v7534_v51 = vadd.f32 %v4432_v50, %v7527_v48 }
0x1049   : > { %v4434_v52 = vpop.f32.mrf.mxu1 }
0x104a   : > { %v7537_v54 = vmul.f32 0.70710677, %v7534_v51  ;;  %v7540_v55 = vadd.f32 %v4434_v52, %v7531_v49 }
0x104b   : > { %v4438_v11 = vpop.f32.mrf.mxu1 }
0x104c   : > { %v4487_v21 = vand.u32 2147483647, %v7537_v54  ;;  %v7544_v1 = vmul.f32 0.70710677, %v7540_v55  ;;  %v7547_v0 = vadd.f32 %v4438_v11, %v7527_v48  ;;  %vm4471_vm6 = vcmp.ge.f32.partialorder %v7537_v54, 0.0 }
0x104d   : > { %v4440_v3 = vpop.f32.mrf.mxu1 }
0x104e   : > { %v4495_v23 = vmul.f32 0.3275911, %v4487_v21  ;;  %v4488_v57 = vand.u32 2147483647, %v7544_v1  ;;  %v7551_v59 = vmul.f32 0.70710677, %v7547_v0  ;;  %v7554_v60 = vadd.f32 %v4440_v3, %v7531_v49 }
0x104f   : > { %v4599_v13 = vsub.f32 0.0, %v4487_v21  ;;  %vm4472_vm7 = vcmp.ge.f32.partialorder %v7544_v1, 0.0 }
0x1050   : > { %v4503_v61 = vadd.f32 1.0, %v4495_v23  ;;  %v4496_v2 = vmul.f32 0.3275911, %v4488_v57  ;;  %v4489_v5 = vand.u32 2147483647, %v7551_v59  ;;  %v4600_v36 = vsub.f32 0.0, %v4488_v57 }
0x1051   : > { %v7558_v6 = vmul.f32 0.70710677, %v7554_v60  ;;  %v4607_v9 = vmul.f32 %v4599_v13, %v4487_v21  ;;  %vm4473_vm8 = vcmp.ge.f32.partialorder %v7551_v59, 0.0  ;;  %v4455_v59 = vmul.f32 0.5, %v7534_v51 }
0x1052   : > { %6271 = vrcp.f32 %v4503_v61  ;;  %v4504_v15 = vadd.f32 1.0, %v4496_v2  ;;  %v4497_v19 = vmul.f32 0.3275911, %v4489_v5  ;;  %v4601_v25 = vsub.f32 0.0, %v4489_v5 }
0x1053   : > { %v4490_v7 = vand.u32 2147483647, %v7558_v6  ;;  %v4608_v62 = vmul.f32 %v4600_v36, %v4488_v57  ;;  %v4615_v18 = vmul.f32 1.442695, %v4607_v9  ;;  %vm4474_vm9 = vcmp.ge.f32.partialorder %v7558_v6, 0.0 }
0x1054   : > { %6273 = vrcp.f32 %v4504_v15  ;;  %v4505_v8 = vadd.f32 1.0, %v4497_v19  ;;  %v4609_v22 = vmul.f32 %v4601_v25, %v4489_v5 }
0x1055   : > { %v4498_v12 = vmul.f32 0.3275911, %v4490_v7  ;;  %v4602_v26 = vsub.f32 0.0, %v4490_v7  ;;  %v4617_v43 = vmul.f32 1.442695, %v4608_v62  ;;  %v6540_v62 = vmov -1.0  }
0x1056   : > { %6275 = vrcp.f32 %v4505_v8  ;;  %v4619_v41 = vmul.f32 1.442695, %v4609_v22 }
0x1057   : > { %v4506_v20 = vadd.f32 1.0, %v4498_v12  ;;  %v4610_v28 = vmul.f32 %v4602_v26, %v4490_v7 }
0x1059   : > { %6277 = vrcp.f32 %v4506_v20  ;;  %v4621_v39 = vmul.f32 1.442695, %v4610_v28 }
0x105a   : > { %6279 = vpow2.f32 %v4615_v18 }
0x105b   : > { %6281 = vpow2.f32 %v4617_v43 }
0x105c   : > { %6283 = vpow2.f32 %v4619_v41 }
0x105d   : > { %6285 = vpow2.f32 %v4621_v39 }
0x105f   : > { %v6272_v14 = vpop.eup %6271 }
0x1060   : > { %v4527_v16 = vmul.f32 1.0614054, %v6272_v14 }
0x1061   : > { %v6274_v33 = vpop.eup %6273 }
0x1062   : > { %v4535_v17 = vadd.f32 -1.4531521, %v4527_v16  ;;  %v4528_v29 = vmul.f32 1.0614054, %v6274_v33  ;;  %v4479_v16 = vsel %vm4471_vm6, 1.0, %v6540_v62 }
0x1063   : > { %v6276_v27 = vpop.eup %6275 }
0x1064   : > { %v4543_v31 = vmul.f32 %v6272_v14, %v4535_v17  ;;  %v4536_v34 = vadd.f32 -1.4531521, %v4528_v29  ;;  %v4529_v32 = vmul.f32 1.0614054, %v6276_v27 }
0x1066   : > { %v4551_v4 = vadd.f32 1.4214138, %v4543_v31  ;;  %v6278_v24 = vpop.eup %6277  ;;  %v4544_v35 = vmul.f32 %v6274_v33, %v4536_v34  ;;  %v4537_v37 = vadd.f32 -1.4531521, %v4529_v32  ;;  %v4481_v32 = vsel %vm4473_vm8, 1.0, %v6540_v62 }
0x1067   : > { %v4530_v45 = vmul.f32 1.0614054, %v6278_v24  ;;  %v6280_v15 = vpop.eup %6279 }
0x1068   : > { %v4559_v38 = vmul.f32 %v6272_v14, %v4551_v4  ;;  %v4552_v40 = vadd.f32 1.4214138, %v4544_v35  ;;  %v4545_v42 = vmul.f32 %v6276_v27, %v4537_v37  ;;  %v6282_v36 = vpop.eup %6281 }
0x1069   : > { %v4538_v44 = vadd.f32 -1.4531521, %v4530_v45  ;;  %v6284_v26 = vpop.eup %6283 }
0x106a   : > { %v4567_v53 = vadd.f32 -0.28449672, %v4559_v38  ;;  %v4560_v46 = vmul.f32 %v6274_v33, %v4552_v40  ;;  %v4553_v47 = vadd.f32 1.4214138, %v4545_v42  ;;  %v6286_v31 = vpop.eup %6285  ;;  %v4482_v38 = vsel %vm4474_vm9, 1.0, %v6540_v62 }
0x106b   : > { %v4546_v52 = vmul.f32 %v6278_v24, %v4538_v44  ;;  %v4458_v42 = vmul.f32 0.5, %v7554_v60  ;;  %v4457_v44 = vmul.f32 0.5, %v7547_v0 }
0x106c   : > { %v4575_v50 = vmul.f32 %v6272_v14, %v4567_v53  ;;  %v4568_v11 = vadd.f32 -0.28449672, %v4560_v46  ;;  %v4561_v21 = vmul.f32 %v6276_v27, %v4553_v47 }
0x106d   : > { %v4554_v23 = vadd.f32 1.4214138, %v4546_v52 }
0x106e   : > { %v4583_v3 = vadd.f32 0.2548296, %v4575_v50  ;;  %v4576_v57 = vmul.f32 %v6274_v33, %v4568_v11  ;;  %v4569_v61 = vadd.f32 -0.28449672, %v4561_v21 }
0x106f   : > { %v4562_v5 = vmul.f32 %v6278_v24, %v4554_v23 }
0x1070   : > { %v4591_v2 = vmul.f32 %v6272_v14, %v4583_v3  ;;  %v4584_v19 = vadd.f32 0.2548296, %v4576_v57  ;;  %v4577_v7 = vmul.f32 %v6276_v27, %v4569_v61 }
0x1071   : > { %v4570_v12 = vadd.f32 -0.28449672, %v4562_v5 }
0x1072   : > { %v4631_v8 = vmul.f32 %v6280_v15, %v4591_v2  ;;  %v4592_v13 = vmul.f32 %v6274_v33, %v4584_v19  ;;  %v4585_v20 = vadd.f32 0.2548296, %v4577_v7  ;;  %v4480_v33 = vsel %vm4472_vm7, 1.0, %v6540_v62 }
0x1073   : > { %v4578_v25 = vmul.f32 %v6278_v24, %v4570_v12 }
0x1074   : > { %v4639_v9 = vsub.f32 1.0, %v4631_v8  ;;  %v4632_v18 = vmul.f32 %v6282_v36, %v4592_v13  ;;  %v4593_v14 = vmul.f32 %v6276_v27, %v4585_v20  ;;  %v4456_v27 = vmul.f32 0.5, %v7540_v55 }
0x1075   : > { %v4586_v17 = vadd.f32 0.2548296, %v4578_v25 }
0x1076   : > { %v4647_v22 = vmul.f32 %v4639_v9, %v4479_v16  ;;  %v4640_v54 = vsub.f32 1.0, %v4632_v18  ;;  %v4633_v43 = vmul.f32 %v6284_v26, %v4593_v14 }
0x1077   : > { %v4594_v29 = vmul.f32 %v6278_v24, %v4586_v17 }
0x1078   : > { %v4648_v28 = vmul.f32 %v4640_v54, %v4480_v33  ;;  %v4641_v41 = vsub.f32 1.0, %v4633_v43  ;;  %v4655_v34 = vadd.f32 1.0, %v4647_v22 }
0x1079   : > { %v4634_v1 = vmul.f32 %v6286_v31, %v4594_v29 }
0x107a   : > { %v4656_v4 = vadd.f32 1.0, %v4648_v28  ;;  %v4649_v35 = vmul.f32 %v4641_v41, %v4481_v32  ;;  %v4663_v24 = vmul.f32 %v4655_v34, %v4455_v59 }
0x107b   : > { %v4642_v37 = vsub.f32 1.0, %v4634_v1 }
0x107c   : > { %v4664_v39 = vmul.f32 %v4656_v4, %v4456_v27  ;;  %v4657_v40 = vadd.f32 1.0, %v4649_v35 }
0x107d   : > { %v4650_v45 = vmul.f32 %v4642_v37, %v4482_v38 }
0x107e   : > { %4774 = vmatprep.mubr.f32.mxu0 %v4664_v39  ;;  %v4665_v52 = vmul.f32 %v4657_v40, %v4457_v44 }
0x107f   : > { %4775 = vmatmul.mubr.f32.vlgmr.msra.gmra.mxu0 %v4663_v24  ;;  %v4658_v6 = vadd.f32 1.0, %v4650_v45 }
0x1080   : > { %v4444_v53 = vpop.f32.mrf.mxu1 }
0x1081   : > { %v7574_v55 = vadd.f32 %v4444_v53, %v7527_v48  ;;  %v4666_v51 = vmul.f32 %v4658_v6, %v4458_v42 }
0x1082   : > { %v4446_v46 = vpop.f32.mrf.mxu1 }
0x1083   : > { %v7577_v47 = vmul.f32 0.70710677, %v7574_v55  ;;  %v7580_v50 = vadd.f32 %v4446_v46, %v7531_v49  ;;  %4779 = vmatprep.mubr.f32.mxu0 %v4666_v51 }
0x1084   : > { %v4450_v11 = vpop.f32.mrf.mxu1  ;;  %4780 = vmatmul.mubr.f32.gmra.mxu0 %v4665_v52 }
0x1085   : > { %v4491_v60 = vand.u32 2147483647, %v7577_v47  ;;  %v7584_v21 = vmul.f32 0.70710677, %v7580_v50  ;;  %v7587_v0 = vadd.f32 %v4450_v11, %v7527_v48  ;;  %vm4475_vm10 = vcmp.ge.f32.partialorder %v7577_v47, 0.0 }
0x1086   : > { %v4452_v3 = vpop.f32.mrf.mxu1 }
0x1087   : > { %v4499_v23 = vmul.f32 0.3275911, %v4491_v60  ;;  %v4492_v57 = vand.u32 2147483647, %v7584_v21  ;;  %v7591_v61 = vmul.f32 0.70710677, %v7587_v0  ;;  %v7594_v2 = vadd.f32 %v4452_v3, %v7531_v49 }
0x1088   : > { %v4603_v36 = vsub.f32 0.0, %v4491_v60  ;;  %vm4476_vm11 = vcmp.ge.f32.partialorder %v7584_v21, 0.0 }
0x1089   : > { %v4507_v5 = vadd.f32 1.0, %v4499_v23  ;;  %v4500_v15 = vmul.f32 0.3275911, %v4492_v57  ;;  %v4493_v19 = vand.u32 2147483647, %v7591_v61  ;;  %v4604_v49 = vsub.f32 0.0, %v4492_v57 }
0x108a   : > { %v7598_v7 = vmul.f32 0.70710677, %v7594_v2  ;;  %v4611_v25 = vmul.f32 %v4603_v36, %v4491_v60  ;;  %vm4477_vm12 = vcmp.ge.f32.partialorder %v7591_v61, 0.0  ;;  %v4459_v61 = vmul.f32 0.5, %v7574_v55 }
0x108b   : > { %6287 = vrcp.f32 %v4507_v5  ;;  %v4508_v48 = vadd.f32 1.0, %v4500_v15  ;;  %v4501_v8 = vmul.f32 0.3275911, %v4493_v19  ;;  %v4605_v16 = vsub.f32 0.0, %v4493_v19 }
0x108c   : > { %v4494_v12 = vand.u32 2147483647, %v7598_v7  ;;  %v4612_v14 = vmul.f32 %v4604_v49, %v4492_v57  ;;  %v4623_v22 = vmul.f32 1.442695, %v4611_v25  ;;  %vm4478_vm13 = vcmp.ge.f32.partialorder %v7598_v7, 0.0 }
0x108d   : > { %6289 = vrcp.f32 %v4508_v48  ;;  %v4509_v13 = vadd.f32 1.0, %v4501_v8  ;;  %v4613_v54 = vmul.f32 %v4605_v16, %v4493_v19  ;;  %v4483_v16 = vsel %vm4475_vm10, 1.0, %v6540_v62 }
0x108e   : > { %v4502_v20 = vmul.f32 0.3275911, %v4494_v12  ;;  %v4606_v17 = vsub.f32 0.0, %v4494_v12  ;;  %v4625_v29 = vmul.f32 1.442695, %v4612_v14 }
0x108f   : > { %6291 = vrcp.f32 %v4509_v13  ;;  %v4627_v32 = vmul.f32 1.442695, %v4613_v54 }
0x1090   : > { %v4510_v9 = vadd.f32 1.0, %v4502_v20  ;;  %v4614_v34 = vmul.f32 %v4606_v17, %v4494_v12 }
0x1092   : > { %6293 = vrcp.f32 %v4510_v9  ;;  %v4629_v39 = vmul.f32 1.442695, %v4614_v34 }
0x1093   : > { %6295 = vpow2.f32 %v4623_v22 }
0x1094   : > { %6297 = vpow2.f32 %v4625_v29 }
0x1095   : > { %6299 = vpow2.f32 %v4627_v32  ;;  %v4485_v32 = vsel %vm4477_vm12, 1.0, %v6540_v62 }
0x1096   : > { %6301 = vpow2.f32 %v4629_v39 }
0x1098   : > { %v6288_v18 = vpop.eup %6287 }
0x1099   : > { %v4531_v26 = vmul.f32 1.0614054, %v6288_v18 }
0x109a   : > { %v6290_v43 = vpop.eup %6289 }
0x109b   : > { %v4539_v33 = vadd.f32 -1.4531521, %v4531_v26  ;;  %v4532_v31 = vmul.f32 1.0614054, %v6290_v43 }
0x109c   : > { %v6292_v28 = vpop.eup %6291 }
0x109d   : > { %v4547_v41 = vmul.f32 %v6288_v18, %v4539_v33  ;;  %v4540_v1 = vadd.f32 -1.4531521, %v4532_v31  ;;  %v4533_v27 = vmul.f32 1.0614054, %v6292_v28  ;;  %v4484_v33 = vsel %vm4476_vm11, 1.0, %v6540_v62 }
0x109f   : > { %v4555_v4 = vadd.f32 1.4214138, %v4547_v41  ;;  %v6294_v35 = vpop.eup %6293  ;;  %v4548_v59 = vmul.f32 %v6290_v43, %v4540_v1  ;;  %v4541_v37 = vadd.f32 -1.4531521, %v4533_v27 }
0x10a0   : > { %v4534_v24 = vmul.f32 1.0614054, %v6294_v35  ;;  %v6296_v19 = vpop.eup %6295 }
0x10a1   : > { %v4563_v38 = vmul.f32 %v6288_v18, %v4555_v4  ;;  %v4556_v45 = vadd.f32 1.4214138, %v4548_v59  ;;  %v4549_v40 = vmul.f32 %v6292_v28, %v4541_v37  ;;  %v6298_v9 = vpop.eup %6297  ;;  %v4486_v59 = vsel %vm4478_vm13, 1.0, %v6540_v62  ;;  %v5526_v62 = vld [vmem:[%s1001_s5] ss:$0 sm:$0xff] }
0x10a2   : > { %v4542_v53 = vadd.f32 -1.4531521, %v4534_v24  ;;  %v4462_v24 = vmul.f32 0.5, %v7594_v2 }
0x10a3   : > { %v4571_v42 = vadd.f32 -0.28449672, %v4563_v38  ;;  %v4564_v6 = vmul.f32 %v6290_v43, %v4556_v45  ;;  %v4557_v44 = vadd.f32 1.4214138, %v4549_v40  ;;  %v4461_v45 = vmul.f32 0.5, %v7587_v0 }
0x10a4   : > { %v4550_v51 = vmul.f32 %v6294_v35, %v4542_v53 }
0x10a5   : > { %v4579_v46 = vmul.f32 %v6288_v18, %v4571_v42  ;;  %v4572_v52 = vadd.f32 -0.28449672, %v4564_v6  ;;  %v4565_v11 = vmul.f32 %v6292_v28, %v4557_v44 }
0x10a6   : > { %v4558_v3 = vadd.f32 1.4214138, %v4550_v51 }
0x10a7   : > { %v4587_v60 = vadd.f32 0.2548296, %v4579_v46  ;;  %v4580_v23 = vmul.f32 %v6290_v43, %v4572_v52  ;;  %v4573_v57 = vadd.f32 -0.28449672, %v4565_v11 }
0x10a8   : > { %v4566_v15 = vmul.f32 %v6294_v35, %v4558_v3 }
0x10a9   : > { %v4595_v5 = vmul.f32 %v6288_v18, %v4587_v60  ;;  %v4588_v48 = vadd.f32 0.2548296, %v4580_v23  ;;  %v4581_v8 = vmul.f32 %v6292_v28, %v4573_v57  ;;  %v6300_v18 = vpop.eup %6299 }
0x10aa   : > { %v4574_v13 = vadd.f32 -0.28449672, %v4566_v15  ;;  %v6302_v29 = vpop.eup %6301 }
0x10ab   : > { %v4635_v12 = vmul.f32 %v6296_v19, %v4595_v5  ;;  %v4596_v20 = vmul.f32 %v6290_v43, %v4588_v48  ;;  %v4589_v36 = vadd.f32 0.2548296, %v4581_v8 }
0x10ac   : > { %v4582_v25 = vmul.f32 %v6294_v35, %v4574_v13 }
0x10ad   : > { %v4643_v49 = vsub.f32 1.0, %v4635_v12  ;;  %v4636_v14 = vmul.f32 %v6298_v9, %v4596_v20  ;;  %v4597_v26 = vmul.f32 %v6292_v28, %v4589_v36  ;;  %v4460_v28 = vmul.f32 0.5, %v7580_v50 }
0x10ae   : > { %v4590_v17 = vadd.f32 0.2548296, %v4582_v25 }
0x10af   : > { %v4651_v22 = vmul.f32 %v4643_v49, %v4483_v16  ;;  %v4644_v54 = vsub.f32 1.0, %v4636_v14  ;;  %v4637_v47 = vmul.f32 %v6300_v18, %v4597_v26 }
0x10b0   : > { %v4598_v43 = vmul.f32 %v6294_v35, %v4590_v17 }
0x10b1   : > { %v4652_v31 = vmul.f32 %v4644_v54, %v4484_v33  ;;  %v4645_v41 = vsub.f32 1.0, %v4637_v47  ;;  %v4659_v34 = vadd.f32 1.0, %v4651_v22 }
0x10b2   : > { %v4638_v21 = vmul.f32 %v6302_v29, %v4598_v43 }
0x10b3   : > { %v4660_v1 = vadd.f32 1.0, %v4652_v31  ;;  %v4653_v27 = vmul.f32 %v4645_v41, %v4485_v32  ;;  %v4667_v37 = vmul.f32 %v4659_v34, %v4459_v61  ;;  %v5527_v41 = vld [vmem:[%s7905_s21] ss:$0 sm:$0xff]  ;;  %s7910_s21 = sld [smem:[#allocation36_spill]] (!%p5529_p9) }
0x10b4   : > { %v4646_v4 = vsub.f32 1.0, %v4638_v21  ;;  %v5528_v32 = vld [vmem:[%s7906_s28] ss:$0 sm:$0xff]  ;;  %s7911_s28 = sld [smem:[#allocation38_spill]] (!%p5529_p9) }
0x10b5   : > { %v4668_v35 = vmul.f32 %v4660_v1, %v4460_v28  ;;  %v4661_v39 = vadd.f32 1.0, %v4653_v27 }
0x10b6   : > { %v4654_v38 = vmul.f32 %v4646_v4, %v4486_v59 }
0x10b7   : > { %4784 = vmatprep.mubr.f32.mxu1 %v4668_v35  ;;  %v4669_v40 = vmul.f32 %v4661_v39, %v4461_v45 }
0x10b8   : > { %4785 = vmatmul.mubr.f32.vlgmr.msra.gmra.mxu1 %v4667_v37  ;;  %v4662_v7 = vadd.f32 1.0, %v4654_v38 }
0x10ba   : > { %v4670_v50 = vmul.f32 %v4662_v7, %v4462_v24 }
0x10bc   : > { %4789 = vmatprep.mubr.f32.mxu1 %v4670_v50 }
0x10bd   : > { %4790 = vmatmul.mubr.f32.gmra.mxu1 %v4669_v40 }
0x113f   : > { %v5683_v55 = vpop.f32.mrf.mxu0 }
0x1141   : > { %v5684_v42 = vpop.f32.mrf.mxu0 }
0x1142   : > { %v5685_v53 = vadd.f32 %v5684_v42, %v5683_v55 }
0x1144   : > { %v4777_v6 = vadd.f32 %v5685_v53, %v5526_v62  ;;  %v5686_v44 = vpop.f32.mrf.mxu0 }
0x1146   : > { %v5687_v46 = vpop.f32.mrf.mxu0  ;;  %v4795_v2 = vadd.f32 %v4777_v6, %v7477_v56 }
0x1147   : > { %v5688_v51 = vadd.f32 %v5687_v46, %v5686_v44 }
0x1148   : > { %4801 = vadd.xlane.f32.xlu0 %v4795_v2 }
0x1149   : > { %v4782_v0 = vadd.f32 %v5688_v51, %v5526_v62 }
0x114b   : > { %v4796_v52 = vadd.f32 %v4782_v0, %v7481_v58 }
0x114d   : > { %4803 = vadd.xlane.f32.xlu1 %v4796_v52 }
0x1178   : > { %v5689_v11 = vpop.f32.mrf.mxu1 }
0x117a   : > { %v5690_v60 = vpop.f32.mrf.mxu1 }
0x117b   : > { %v5691_v3 = vadd.f32 %v5690_v60, %v5689_v11 }
0x117d   : > { %v4787_v23 = vadd.f32 %v5691_v3, %v5526_v62  ;;  %v5692_v57 = vpop.f32.mrf.mxu1 }
0x117f   : > { %v5693_v5 = vpop.f32.mrf.mxu1  ;;  %v4797_v15 = vadd.f32 %v4787_v23, %v7485_v10 }
0x1180   : > { %v5694_v19 = vadd.f32 %v5693_v5, %v5692_v57 }
0x1181   : > { %4805 = vadd.xlane.f32.xlu0 %v4797_v15 }
0x1182   : > { %v4792_v48 = vadd.f32 %v5694_v19, %v5526_v62 }
0x1184   : > { %v4798_v8 = vadd.f32 %v4792_v48, %v7489_v30 }
0x1186   : > { %4807 = vadd.xlane.f32.xlu1 %v4798_v8 }
0x11d1   : > { %v4802_v56 = vpop.xlane.xlu0 %4801 }
0x11d2   : > { %v4809_v12 = vmul.f32 0.0078125, %v4802_v56 }
0x11d4   : > { %v4813_v13 = vsub.f32 %v4795_v2, %v4809_v12 }
0x11d6   : > { %v4804_v20 = vpop.xlane.xlu1 %4803  ;;  %v4817_v58 = vmul.f32 %v4813_v13, %v4813_v13 }
0x11d7   : > { %v4810_v36 = vmul.f32 0.0078125, %v4804_v20 }
0x11d8   : > { %4821 = vadd.xlane.f32.xlu0 %v4817_v58 }
0x11d9   : > { %v4814_v9 = vsub.f32 %v4796_v52, %v4810_v36 }
0x11db   : > { %v4818_v49 = vmul.f32 %v4814_v9, %v4814_v9 }
0x11dd   : > { %4823 = vadd.xlane.f32.xlu1 %v4818_v49 }
0x120a   : > { %v4806_v25 = vpop.xlane.xlu0 %4805 }
0x120b   : > { %v4811_v16 = vmul.f32 0.0078125, %v4806_v25 }
0x120d   : > { %v4815_v14 = vsub.f32 %v4797_v15, %v4811_v16 }
0x120f   : > { %v4808_v10 = vpop.xlane.xlu1 %4807  ;;  %v4819_v26 = vmul.f32 %v4815_v14, %v4815_v14 }
0x1210   : > { %v4812_v18 = vmul.f32 0.0078125, %v4808_v10 }
0x1211   : > { %4825 = vadd.xlane.f32.xlu0 %v4819_v26 }
0x1212   : > { %v4816_v30 = vsub.f32 %v4798_v8, %v4812_v18 }
0x1214   : > { %v4820_v22 = vmul.f32 %v4816_v30, %v4816_v30 }
0x1216   : > { %4827 = vadd.xlane.f32.xlu1 %v4820_v22 }
0x1261   : > { %v4822_v17 = vpop.xlane.xlu0 %4821 }
0x1262   : > { %v4829_v54 = vmul.f32 0.0078125, %v4822_v17 }
0x1264   : > { %v4833_v47 = vadd.f32 1e-05, %v4829_v54 }
0x1266   : > { %6303 = vrsqrt.f32 %v4833_v47  ;;  %v4824_v33 = vpop.xlane.xlu1 %4823 }
0x1267   : > { %v4830_v43 = vmul.f32 0.0078125, %v4824_v33 }
0x1269   : > { %v4834_v29 = vadd.f32 1e-05, %v4830_v43 }
0x126b   : > { %6305 = vrsqrt.f32 %v4834_v29 }
0x1273   : > { %v6304_v31 = vpop.eup %6303 }
0x1274   : > { %v4841_v34 = vmul.f32 %v6304_v31, %v4813_v13 }
0x1276   : > { %v4851_v21 = vmul.f32 %v5527_v41, %v4841_v34 }
0x1278   : > { %v6306_v28 = vpop.eup %6305  ;;  %v7632_v1 = vadd.f32 %v5528_v32, %v4851_v21 }
0x1279   : > { %v4842_v27 = vmul.f32 %v6306_v28, %v4814_v9 }
0x127a   : > { %4865 = vst [vmem:[#allocation2 + $0x10] sm:$0xff] %v7632_v1 }
0x127b   : > { %v4852_v61 = vmul.f32 %v5527_v41, %v4842_v27 }
0x127d   : > { %v7635_v4 = vadd.f32 %v5528_v32, %v4852_v61 }
0x127f   : > { %4866 = vst [vmem:[#allocation2] sm:$0xff] %v7635_v4 }
0x129a   : > { %v4826_v59 = vpop.xlane.xlu0 %4825 }
0x129b   : > { %v4831_v35 = vmul.f32 0.0078125, %v4826_v59 }
0x129d   : > { %v4835_v37 = vadd.f32 1e-05, %v4831_v35 }
0x129f   : > { %6307 = vrsqrt.f32 %v4835_v37  ;;  %v4828_v38 = vpop.xlane.xlu1 %4827 }
0x12a0   : > { %v4832_v39 = vmul.f32 0.0078125, %v4828_v38 }
0x12a2   : > { %v4836_v24 = vadd.f32 1e-05, %v4832_v39 }
0x12a4   : > { %6309 = vrsqrt.f32 %v4836_v24 }
0x12ac   : > { %v6308_v7 = vpop.eup %6307 }
0x12ad   : > { %v4843_v45 = vmul.f32 %v6308_v7, %v4815_v14 }
0x12af   : > { %v4853_v50 = vmul.f32 %v5527_v41, %v4843_v45 }
0x12b1   : > { %v6310_v40 = vpop.eup %6309  ;;  %v7638_v55 = vadd.f32 %v5528_v32, %v4853_v50 }
0x12b2   : > { %v4844_v62 = vmul.f32 %v6310_v40, %v4816_v30 }
0x12b3   : > { %4867 = vst [vmem:[#allocation2 + $0x18] sm:$0xff] %v7638_v55 }
0x12b4   : > { %v4854_v42 = vmul.f32 %v5527_v41, %v4844_v62  ;;  %4872 = sbr.rel (%p5529_p9) target bundleno = 5503 (0x157f), region = 144 }
0x12b6   : > { %v7641_v53 = vadd.f32 %v5528_v32, %v4854_v42 }
0x12b8   : > { %4868 = vst [vmem:[#allocation2 + $0x8] sm:$0xff] %v7641_v53 }
0x12b9   : > { %v5530_v6 = vld [vmem:[%s7907_s4] ss:$0 sm:$0xff]  ;;  %v5009_v0 = vld [vmem:[%s7908_s29 + $0x78] sm:$0xff]  ;;  %v6541_v52 = vmov 0.0   ;;  %v5008_v11 = vld [vmem:[%s7908_s29 + $0x70] sm:$0xff]  ;;  %vm6542_vm14 = vmmov 0   ;;  %v4893_v36 = vstv %s4892_s27 }
0x12ba   : > { %v4882_v44 = vmul.f32 %v5530_v6, %v7638_v55  ;;  %v4880_v46 = vmul.f32 %v5530_v6, %v7632_v1  ;;  %v4883_v2 = vmul.f32 %v5530_v6, %v7641_v53  ;;  %v4881_v51 = vmul.f32 %v5530_v6, %v7635_v4  ;;  %5975 = vmatprep.subr.mxu0 %v6541_v52  ;;  %v5007_v60 = vld [vmem:[%s7908_s29 + $0x68] sm:$0xff]  ;;  %v5006_v3 = vld [vmem:[%s7908_s29 + $0x60] sm:$0xff]  ;;  %v5005_v23 = vld [vmem:[%s7908_s29 + $0x58] sm:$0xff] }
0x12bb   : > { %6007 = vmatprep.mubr.msk.f32.mxu0 %vm6542_vm14, %v6541_v52  ;;  %5976 = vmatpush3.msra.mxu0 %v5009_v0  ;;  %v5004_v57 = vld [vmem:[%s7908_s29 + $0x50] sm:$0xff]  ;;  %v5003_v5 = vld [vmem:[%s7908_s29 + $0x48] sm:$0xff]  ;;  %v5002_v15 = vld [vmem:[%s7908_s29 + $0x40] sm:$0xff]  ;;  %vm5021_vm15 = vcmask 1041409   ;;  %vm5023_vm0 = vcmask 1042434   ;;  %vm5025_vm1 = vcmask 1043459  }
0x12bc   : > { %4888 = vadd.xlane.f32.xlu1 %v4882_v44  ;;  %4884 = vadd.xlane.f32.xlu0 %v4880_v46  ;;  %v5001_v19 = vld [vmem:[%s7908_s29 + $0x38] sm:$0xff]  ;;  %v5000_v48 = vld [vmem:[%s7908_s29 + $0x30] sm:$0xff]  ;;  %v4999_v8 = vld [vmem:[%s7908_s29 + $0x28] sm:$0xff]  ;;  %vm5246_vm11 = vcmask 60416  }
0x12bd   : > { %6010 = vmatprep.subr.mxu1 %v6541_v52  ;;  %5977 = vmatprep.subr.mxu0 %v6541_v52  ;;  %v4998_v56 = vld [vmem:[%s7908_s29 + $0x20] sm:$0xff]  ;;  %v4997_v12 = vld [vmem:[%s7908_s29 + $0x18] sm:$0xff]  ;;  %v4996_v13 = vld [vmem:[%s7908_s29 + $0x10] sm:$0xff] }
0x12be   : > { %6042 = vmatprep.mubr.msk.f32.mxu1 %vm6542_vm14, %v6541_v52  ;;  %5978 = vmatpush3.msra.mxu0 %v5008_v11  ;;  %v4995_v20 = vld [vmem:[%s7908_s29 + $0x8] sm:$0xff]  ;;  %v4994_v58 = vld [vmem:[%s7908_s29] sm:$0xff] }
0x12bf   : > { %5979 = vmatprep.subr.mxu0 %v6541_v52 }
0x12c0   : > { %4890 = vadd.xlane.f32.xlu1 %v4883_v2  ;;  %4886 = vadd.xlane.f32.xlu0 %v4881_v51 }
0x12c1   : > { %5980 = vmatpush3.msra.mxu0 %v5007_v60 }
0x12c2   : > { %5981 = vmatprep.subr.mxu0 %v6541_v52 }
0x12c3   : > { %5982 = vmatpush3.msra.mxu0 %v5006_v3 }
0x12c4   : > { %5983 = vmatprep.subr.mxu0 %v6541_v52 }
0x12c5   : > { %5984 = vmatpush3.msra.mxu0 %v5005_v23 }
0x12c6   : > { %5985 = vmatprep.subr.mxu0 %v6541_v52 }
0x12c7   : > { %5986 = vmatpush3.msra.mxu0 %v5004_v57 }
0x12c8   : > { %5987 = vmatprep.subr.mxu0 %v6541_v52 }
0x12c9   : > { %5988 = vmatpush3.msra.mxu0 %v5003_v5 }
0x12ca   : > { %5989 = vmatprep.subr.mxu0 %v6541_v52 }
0x12cb   : > { %5990 = vmatpush3.msra.mxu0 %v5002_v15 }
0x12cc   : > { %5991 = vmatprep.subr.mxu0 %v6541_v52 }
0x12cd   : > { %5992 = vmatpush3.msra.mxu0 %v5001_v19 }
0x12ce   : > { %5993 = vmatprep.subr.mxu0 %v6541_v52 }
0x12cf   : > { %5994 = vmatpush3.msra.mxu0 %v5000_v48 }
0x12d0   : > { %5995 = vmatprep.subr.mxu0 %v6541_v52 }
0x12d1   : > { %5996 = vmatpush3.msra.mxu0 %v4999_v8 }
0x12d2   : > { %5997 = vmatprep.subr.mxu0 %v6541_v52 }
0x12d3   : > { %5998 = vmatpush3.msra.mxu0 %v4998_v56 }
0x12d4   : > { %5999 = vmatprep.subr.mxu0 %v6541_v52 }
0x12d5   : > { %6000 = vmatpush3.msra.mxu0 %v4997_v12 }
0x12d6   : > { %6001 = vmatprep.subr.mxu0 %v6541_v52 }
0x12d7   : > { %6002 = vmatpush3.msra.mxu0 %v4996_v13 }
0x12d8   : > { %6003 = vmatprep.subr.mxu0 %v6541_v52 }
0x12d9   : > { %6004 = vmatpush3.msra.mxu0 %v4995_v20 }
0x12da   : > { %6005 = vmatprep.subr.mxu0 %v6541_v52 }
0x12db   : > { %6006 = vmatpush3.msra.mxu0 %v4994_v58 }
0x1345   : > { %v4889_v9 = vpop.xlane.xlu1 %4888  ;;  %v4885_v49 = vpop.xlane.xlu0 %4884 }
0x1346   : > { %v4896_v25 = vadd.f32 %v4893_v36, %v4889_v9  ;;  %v4894_v16 = vadd.f32 %v4893_v36, %v4885_v49 }
0x1348   : > { %v4910_v14 = vrot.slane %v4896_v25, 4  ;;  %v4898_v10 = vrot.slane %v4894_v16, 4 }
0x1349   : > { %v4891_v26 = vpop.xlane.xlu1 %4890  ;;  %v4887_v18 = vpop.xlane.xlu0 %4886 }
0x134a   : > { %v4911_v30 = vmax.f32 %v4896_v25, %v4910_v14  ;;  %v4899_v22 = vmax.f32 %v4894_v16, %v4898_v10  ;;  %v4897_v17 = vadd.f32 %v4893_v36, %v4891_v26  ;;  %v4895_v54 = vadd.f32 %v4893_v36, %v4887_v18 }
0x134c   : > { %v4912_v47 = vrot.slane %v4911_v30, 2  ;;  %v4900_v33 = vrot.slane %v4899_v22, 2  ;;  %v4916_v43 = vrot.slane %v4897_v17, 4  ;;  %v4904_v29 = vrot.slane %v4895_v54, 4 }
0x134e   : > { %v4913_v31 = vmax.f32 %v4911_v30, %v4912_v47  ;;  %v4901_v41 = vmax.f32 %v4899_v22, %v4900_v33  ;;  %v4917_v34 = vmax.f32 %v4897_v17, %v4916_v43  ;;  %v4905_v32 = vmax.f32 %v4895_v54, %v4904_v29 }
0x1350   : > { %v4914_v21 = vrot.slane %v4913_v31, 1  ;;  %v4902_v28 = vrot.slane %v4901_v41, 1  ;;  %v4918_v27 = vrot.slane %v4917_v34, 2  ;;  %v4906_v61 = vrot.slane %v4905_v32, 2 }
0x1352   : > { %v4915_v59 = vmax.f32 %v4913_v31, %v4914_v21  ;;  %v4903_v35 = vmax.f32 %v4901_v41, %v4902_v28  ;;  %v4919_v37 = vmax.f32 %v4917_v34, %v4918_v27  ;;  %v4907_v38 = vmax.f32 %v4905_v32, %v4906_v61 }
0x1354   : > { %v4924_v39 = vsub.f32 %v4896_v25, %v4915_v59  ;;  %v4922_v24 = vsub.f32 %v4894_v16, %v4903_v35  ;;  %v4920_v7 = vrot.slane %v4919_v37, 1  ;;  %v4908_v45 = vrot.slane %v4907_v38, 1 }
0x1356   : > { %v4930_v50 = vmul.f32 1.442695, %v4924_v39  ;;  %v4926_v40 = vmul.f32 1.442695, %v4922_v24  ;;  %v4921_v62 = vmax.f32 %v4919_v37, %v4920_v7  ;;  %v4909_v42 = vmax.f32 %v4907_v38, %v4908_v45 }
0x1358   : > { %6315 = vpow2.f32 %v4930_v50  ;;  %v4925_v6 = vsub.f32 %v4897_v17, %v4921_v62  ;;  %v4923_v44 = vsub.f32 %v4895_v54, %v4909_v42 }
0x1359   : > { %6317 = vpow2.f32 %v4926_v40 }
0x135a   : > { %v4932_v46 = vmul.f32 1.442695, %v4925_v6  ;;  %v4928_v2 = vmul.f32 1.442695, %v4923_v44 }
0x135c   : > { %6319 = vpow2.f32 %v4932_v46 }
0x135d   : > { %6321 = vpow2.f32 %v4928_v2 }
0x1365   : > { %v6316_v51 = vpop.eup %6315 }
0x1366   : > { %v6318_v0 = vpop.eup %6317  ;;  %v4946_v11 = vrot.slane %v6316_v51, 4 }
0x1367   : > { %v4934_v60 = vrot.slane %v6318_v0, 4 }
0x1368   : > { %v4947_v3 = vadd.f32 %v6316_v51, %v4946_v11 }
0x1369   : > { %v6320_v23 = vpop.eup %6319  ;;  %v4935_v57 = vadd.f32 %v6318_v0, %v4934_v60 }
0x136a   : > { %v6322_v5 = vpop.eup %6321  ;;  %v4948_v15 = vrot.slane %v4947_v3, 2  ;;  %v4952_v19 = vrot.slane %v6320_v23, 4 }
0x136b   : > { %v4940_v48 = vrot.slane %v6322_v5, 4  ;;  %v4936_v8 = vrot.slane %v4935_v57, 2 }
0x136c   : > { %v4949_v56 = vadd.f32 %v4948_v15, %v4947_v3  ;;  %v4953_v12 = vadd.f32 %v6320_v23, %v4952_v19  ;;  %v5137_v15 = vld [vmem:[%s7909_s7 + $0x60] sm:$0xff]  ;;  %v5136_v19 = vld [vmem:[%s7909_s7 + $0x58] sm:$0xff] }
0x136d   : > { %v4937_v13 = vadd.f32 %v4936_v8, %v4935_v57  ;;  %v4941_v20 = vadd.f32 %v6322_v5, %v4940_v48  ;;  %v5139_v57 = vld [vmem:[%s7909_s7 + $0x70] sm:$0xff]  ;;  %v5134_v8 = vld [vmem:[%s7909_s7 + $0x48] sm:$0xff] }
0x136e   : > { %v4950_v58 = vrot.slane %v4949_v56, 1  ;;  %v4954_v36 = vrot.slane %v4953_v12, 2  ;;  %v5135_v48 = vld [vmem:[%s7909_s7 + $0x50] sm:$0xff] }
0x136f   : > { %v4938_v9 = vrot.slane %v4937_v13, 1  ;;  %v4942_v49 = vrot.slane %v4941_v20, 2 }
0x1370   : > { %v4951_v25 = vadd.f32 %v4950_v58, %v4949_v56  ;;  %v4955_v16 = vadd.f32 %v4954_v36, %v4953_v12  ;;  %v5133_v56 = vld [vmem:[%s7909_s7 + $0x40] sm:$0xff]  ;;  %v5132_v12 = vld [vmem:[%s7909_s7 + $0x38] sm:$0xff] }
0x1371   : > { %v4939_v14 = vadd.f32 %v4938_v9, %v4937_v13  ;;  %v4943_v10 = vadd.f32 %v4942_v49, %v4941_v20  ;;  %v5131_v13 = vld [vmem:[%s7909_s7 + $0x30] sm:$0xff]  ;;  %v5130_v20 = vld [vmem:[%s7909_s7 + $0x28] sm:$0xff]  ;;  %v5129_v58 = vld [vmem:[%s7909_s7 + $0x20] sm:$0xff] }
0x1372   : > { %v4956_v26 = vrot.slane %v4955_v16, 1  ;;  %6323 = vrcp.f32 %v4951_v25  ;;  %v5128_v36 = vld [vmem:[%s7909_s7 + $0x18] sm:$0xff]  ;;  %v5127_v9 = vld [vmem:[%s7909_s7 + $0x10] sm:$0xff]  ;;  %v5126_v49 = vld [vmem:[%s7909_s7 + $0x8] sm:$0xff] }
0x1373   : > { %v4944_v18 = vrot.slane %v4943_v10, 1  ;;  %6325 = vrcp.f32 %v4939_v14  ;;  %v5125_v25 = vld [vmem:[%s7909_s7] sm:$0xff] }
0x1374   : > { %v4957_v30 = vadd.f32 %v4956_v26, %v4955_v16  ;;  %v5531_v16 = vld [vmem:[%s7910_s21] ss:$0 sm:$0xff] }
0x1375   : > { %v4945_v22 = vadd.f32 %v4944_v18, %v4943_v10 }
0x1376   : > { %6327 = vrcp.f32 %v4957_v30 }
0x1377   : > { %6329 = vrcp.f32 %v4945_v22 }
0x137f   : > { %v6324_v17 = vpop.eup %6323 }
0x1380   : > { %v6326_v54 = vpop.eup %6325  ;;  %v4964_v47 = vmul.f32 %v6324_v17, %v6316_v51 }
0x1381   : > { %v4962_v33 = vmul.f32 %v6326_v54, %v6318_v0 }
0x1382   : > { %v4968_v43 = vmul.f32 %v4964_v47, %v7638_v55 }
0x1383   : > { %v6328_v29 = vpop.eup %6327  ;;  %v4966_v31 = vmul.f32 %v4962_v33, %v7632_v1 }
0x1384   : > { %v6330_v41 = vpop.eup %6329  ;;  %v4965_v34 = vmul.f32 %v6328_v29, %v6320_v23  ;;  %v4982_v32 = vrot.slane %v4968_v43, 4  ;;  %v5140_v23 = vld [vmem:[%s7909_s7 + $0x78] sm:$0xff] }
0x1385   : > { %v4963_v21 = vmul.f32 %v6330_v41, %v6322_v5  ;;  %v4970_v28 = vrot.slane %v4966_v31, 4  ;;  %6011 = vmatpush3.msra.mxu1 %v5140_v23  ;;  %v5138_v5 = vld [vmem:[%s7909_s7 + $0x68] sm:$0xff] }
0x1386   : > { %v4969_v27 = vmul.f32 %v4965_v34, %v7641_v53  ;;  %v4983_v61 = vadd.f32 %v4982_v32, %v4968_v43  ;;  %6012 = vmatprep.subr.mxu1 %v6541_v52 }
0x1387   : > { %v4967_v59 = vmul.f32 %v4963_v21, %v7635_v4  ;;  %v4971_v35 = vadd.f32 %v4970_v28, %v4966_v31  ;;  %6013 = vmatpush3.msra.mxu1 %v5139_v57 }
0x1388   : > { %v4984_v37 = vrot.slane %v4983_v61, 2  ;;  %v4988_v38 = vrot.slane %v4969_v27, 4  ;;  %6014 = vmatprep.subr.mxu1 %v6541_v52 }
0x1389   : > { %v4972_v39 = vrot.slane %v4971_v35, 2  ;;  %v4976_v24 = vrot.slane %v4967_v59, 4  ;;  %6015 = vmatpush3.msra.mxu1 %v5138_v5 }
0x138a   : > { %v4989_v7 = vadd.f32 %v4988_v38, %v4969_v27  ;;  %v4985_v50 = vadd.f32 %v4984_v37, %v4983_v61  ;;  %6016 = vmatprep.subr.mxu1 %v6541_v52  ;;  %v6543_v37 = vmov -1.0  }
0x138b   : > { %v4973_v55 = vadd.f32 %v4972_v39, %v4971_v35  ;;  %v4977_v45 = vadd.f32 %v4976_v24, %v4967_v59  ;;  %6017 = vmatpush3.msra.mxu1 %v5137_v15 }
0x138c   : > { %v4990_v1 = vrot.slane %v4989_v7, 2  ;;  %v4986_v44 = vrot.slane %v4985_v50, 1  ;;  %6018 = vmatprep.subr.mxu1 %v6541_v52 }
0x138d   : > { %v4978_v40 = vrot.slane %v4977_v45, 2  ;;  %v4974_v42 = vrot.slane %v4973_v55, 1  ;;  %6019 = vmatpush3.msra.mxu1 %v5136_v19 }
0x138e   : > { %v4991_v62 = vadd.f32 %v4990_v1, %v4989_v7  ;;  %v4987_v51 = vadd.f32 %v4986_v44, %v4985_v50  ;;  %6020 = vmatprep.subr.mxu1 %v6541_v52 }
0x138f   : > { %v4979_v6 = vadd.f32 %v4978_v40, %v4977_v45  ;;  %v4975_v2 = vadd.f32 %v4974_v42, %v4973_v55  ;;  %6021 = vmatpush3.msra.mxu1 %v5135_v48  ;;  %v5532_v45 = vld [vmem:[%s7911_s28] ss:$0 sm:$0xff] }
0x1390   : > { %v4992_v53 = vrot.slane %v4991_v62, 1  ;;  %6022 = vmatprep.subr.mxu1 %v6541_v52 }
0x1391   : > { %v4980_v46 = vrot.slane %v4979_v6, 1  ;;  %6023 = vmatpush3.msra.mxu1 %v5134_v8 }
0x1392   : > { %v4993_v0 = vadd.f32 %v4992_v53, %v4991_v62  ;;  %6024 = vmatprep.subr.mxu1 %v6541_v52  ;;  %v5228_v53 = vand.u32 127, %v1262_v63 }
0x1393   : > { %v4981_v4 = vadd.f32 %v4980_v46, %v4979_v6  ;;  %6025 = vmatpush3.msra.mxu1 %v5133_v56 }
0x1394   : > { %6026 = vmatprep.subr.mxu1 %v6541_v52  ;;  %vm5229_vm3 = vcmp.eq.s32.totalorder %v5228_v53, 0  ;;  %vm5230_vm4 = vcmp.eq.s32.totalorder %v5228_v53, 1  ;;  %vm5232_vm6 = vcmp.eq.s32.totalorder %v5228_v53, 7  ;;  %vm5240_vm7 = vcmp.eq.s32.totalorder %v5228_v53, 6 }
0x1395   : > { %v5022_v11 = vsel %vm5021_vm15, %v4981_v4, %v4975_v2  ;;  %6027 = vmatpush3.msra.mxu1 %v5132_v12  ;;  %vm5231_vm5 = vmor %vm5229_vm3, %vm5230_vm4  ;;  %vm5236_vm8 = vcmp.eq.s32.totalorder %v5228_v53, 5  ;;  %vm5234_vm9 = vcmp.eq.s32.totalorder %v5228_v53, 3 }
0x1396   : > { %v5024_v60 = vsel %vm5023_vm0, %v4987_v51, %v5022_v11  ;;  %6028 = vmatprep.subr.mxu1 %v6541_v52  ;;  %vm5233_vm10 = vmor %vm5231_vm5, %vm5232_vm6 }
0x1397   : > { %v5026_v3 = vsel %vm5025_vm1, %v4993_v0, %v5024_v60  ;;  %6029 = vmatpush3.msra.mxu1 %v5131_v13 }
0x1398   : > { %6008 = vmatmul.mubr.f32.vlgmr.msra.gmra.mxu0 %v5026_v3  ;;  %6030 = vmatprep.subr.mxu1 %v6541_v52 }
0x1399   : > { %6031 = vmatpush3.msra.mxu1 %v5130_v20 }
0x139a   : > { %6032 = vmatprep.subr.mxu1 %v6541_v52 }
0x139b   : > { %6033 = vmatpush3.msra.mxu1 %v5129_v58 }
0x139c   : > { %6034 = vmatprep.subr.mxu1 %v6541_v52 }
0x139d   : > { %6035 = vmatpush3.msra.mxu1 %v5128_v36 }
0x139e   : > { %6036 = vmatprep.subr.mxu1 %v6541_v52 }
0x139f   : > { %6037 = vmatpush3.msra.mxu1 %v5127_v9 }
0x13a0   : > { %6038 = vmatprep.subr.mxu1 %v6541_v52 }
0x13a1   : > { %6039 = vmatpush3.msra.mxu1 %v5126_v49 }
0x13a2   : > { %6040 = vmatprep.subr.mxu1 %v6541_v52 }
0x13a3   : > { %6041 = vmatpush3.msra.mxu1 %v5125_v25 }
0x1458   : > { %v5094_v14 = vpop.f32.mrf.mxu0 }
0x1459   : > { %v5095_v10 = vadd.f32 %v5531_v16, %v5094_v14 }
0x145a   : > { %v6009_v26 = vpop.f32.mrf.mxu0 }
0x145b   : > { %v5099_v18 = vmul.f32 0.70710677, %v5095_v10  ;;  %v5098_v24 = vmul.f32 0.5, %v5095_v10 }
0x145d   : > { %v5102_v30 = vand.u32 2147483647, %v5099_v18  ;;  %vm5100_vm2 = vcmp.ge.f32.partialorder %v5099_v18, 0.0 }
0x145e   : > { %v5101_v38 = vsel %vm5100_vm2, 1.0, %v6543_v37 }
0x145f   : > { %v5103_v22 = vmul.f32 0.3275911, %v5102_v30  ;;  %v5116_v54 = vsub.f32 0.0, %v5102_v30 }
0x1461   : > { %v5104_v17 = vadd.f32 1.0, %v5103_v22  ;;  %v5117_v47 = vmul.f32 %v5116_v54, %v5102_v30 }
0x1463   : > { %6331 = vrcp.f32 %v5104_v17  ;;  %v5118_v43 = vmul.f32 1.442695, %v5117_v47 }
0x1465   : > { %6333 = vpow2.f32 %v5118_v43 }
0x1470   : > { %v6332_v33 = vpop.eup %6331 }
0x1471   : > { %v5107_v29 = vmul.f32 1.0614054, %v6332_v33 }
0x1472   : > { %v6334_v61 = vpop.eup %6333 }
0x1473   : > { %v5108_v31 = vadd.f32 -1.4531521, %v5107_v29 }
0x1475   : > { %v5109_v52 = vmul.f32 %v6332_v33, %v5108_v31 }
0x1477   : > { %v5110_v41 = vadd.f32 1.4214138, %v5109_v52 }
0x1479   : > { %v5111_v34 = vmul.f32 %v6332_v33, %v5110_v41 }
0x147b   : > { %v5112_v32 = vadd.f32 -0.28449672, %v5111_v34 }
0x147d   : > { %v5113_v21 = vmul.f32 %v6332_v33, %v5112_v32 }
0x147f   : > { %v5114_v28 = vadd.f32 0.2548296, %v5113_v21 }
0x1481   : > { %v5115_v27 = vmul.f32 %v6332_v33, %v5114_v28 }
0x1483   : > { %v5120_v59 = vmul.f32 %v6334_v61, %v5115_v27 }
0x1485   : > { %v5121_v35 = vsub.f32 1.0, %v5120_v59 }
0x1487   : > { %v5122_v39 = vmul.f32 %v5121_v35, %v5101_v38 }
0x1489   : > { %v5123_v7 = vadd.f32 1.0, %v5122_v39 }
0x148b   : > { %v5124_v55 = vmul.f32 %v5123_v7, %v5098_v24 }
0x148d   : > { %6043 = vmatmul.mubr.f32.vlgmr.msra.gmra.mxu1 %v5124_v55 }
0x154d   : > { %v5214_v50 = vpop.f32.mrf.mxu1 }
0x154e   : > { %v5215_v1 = vadd.f32 %v5532_v45, %v5214_v50 }
0x154f   : > { %v6044_v40 = vpop.f32.mrf.mxu1 }
0x1550   : > { %v5219_v62 = vand.u32 2147483647, %v5215_v1  ;;  %v5218_v51 = vmax.f32 %v5215_v1, 0.0 }
0x1552   : > { %v5220_v42 = vsub.f32 0.0, %v5219_v62 }
0x1554   : > { %v5221_v6 = vmul.f32 1.442695, %v5220_v42 }
0x1556   : > { %6335 = vpow2.f32 %v5221_v6 }
0x1557   : > { %6337 = vtanh.f32 %v5215_v1 }
0x1563   : > { %v6336_v44 = vpop.eup %6335 }
0x1564   : > { %v5223_v46 = vadd.f32 1.0, %v6336_v44  ;;  %v6338_v2 = vpop.eup %6337 }
0x1565   : > { %v5238_v11 = vmul.f32 1.5, %v6338_v2 }
0x1566   : > { %6339 = vlog2.f32 %v5223_v46 }
0x1567   : > { %v5533_v23 = vadd.f32 -0.5, %v5238_v11 }
0x1573   : > { %v6340_v4 = vpop.eup %6339 }
0x1574   : > { %v5225_v0 = vmul.f32 0.6931472, %v6340_v4 }
0x1576   : > { %v5226_v60 = vadd.f32 %v5225_v0, %v5218_v51 }
0x1578   : > { %v5241_v3 = vadd.f32 0.001, %v5226_v60  ;;  %v5235_v57 = vadd.f32 1.0, %v5226_v60 }
0x157a   : > { %v5242_v5 = vsel %vm5240_vm7, %v5241_v3, %v5226_v60 }
0x157b   : > { %v5243_v15 = vsel %vm5236_vm8, %v5533_v23, %v5242_v5 }
0x157c   : > { %v5244_v63 = vsel %vm5234_vm9, %v5235_v57, %v5243_v15 }
0x157d   : > { %v5245_v19 = vsel %vm5233_vm10, %v5215_v1, %v5244_v63 }
0x157e   : > { %5247 = vst.msk [vmem:[#allocation13] sm:$0xf] %vm5246_vm11, %v5245_v19 }
0x157f PF: > { %p6111_p11 = scmp.eq.s32.totalorder %s6700_s20, 2  ;;  %s6544_s1 = smov [#allocation13]  }
0x1580   : > { %s5255_s4 = sshll.u32 %s6544_s1, 4  ;;  %s5256_s4 = int_to_ptr.vmem [resolvable:$true] %s5255_s4 }
0x1581   : > { %s6453_s24 = scalar_lea.vmem %s5256_s4, 64  ;;  %p6460_p1 = scmp.lt.s32.totalorder %s5256_s4, %s5256_s4 }
0x1582   : > { %p6454_p12 = scmp.ne.s32.totalorder %s5256_s4, %s6453_s24  ;;  %p6461_p7 = scmp.lt.s32.totalorder %s6453_s24, %s6453_s24 }
0x1584   : > { %p6455_p13 = pnand %p6454_p12, %p6111_p11  ;;  %p6462_p2 = por %p6461_p7, %p6460_p1 }
0x1586   : > { %p6456_p0 = pneg %p6455_p13 }
0x1588   : > { %p6463_p3 = pnand %p6462_p2, %p6456_p0 }
0x158a   : > { %6466 = shalt.err (!%p6463_p3)
}
0x158b   : > { %s7912_s9 = sld [smem:[#allocation39_spill]] }
0x1591   : > { %6094 = dma.vmem_to_hbm [thread:$0]  (%p6111_p11), %s5256_s4, 64, %s7912_s9, [#allocation7]  }
0x1592   : > { %6506 = dma.done.wait (%p6111_p11), [#allocation7], 64  }
0x1593   : > { %6508 = vsyncadd (%p6111_p11), [#allocation7], 4294967232 }
0x1594 PF: > { %s7913_s8 = sld [smem:[#allocation20_spill]] }
0x1595   : > { %s7914_s3 = sld [smem:[#allocation18_spill]] }
0x1596   : > { %s7915_s26 = sld [smem:[#allocation19_spill]] }
0x1597   : > { %s7916_s1 = sld [smem:[#allocation21_spill]] }
0x159a   : > { %p44_p4 = scmp.ge.s32.totalorder %s7913_s8, 5  }
0x159c   :  { %46 = sbr.rel (!%p44_p4) target bundleno = 34 (0x22), region = 226 }
0x15a1   :  { %5268 = vsyncpa [#allocation6], 1 }
0x15a2   :  { %5270 = vsyncpa [#allocation6 + $0x1], 1 }
0x15a3   :  { %5271 = vsyncpa [#allocation9], 1 }
0x15a4   :  { %5273 = vsyncpa [#allocation9 + $0x1], 1 }
0x15a5   :  { %5274 = vsyncpa [#allocation12], 1 }
0x15a6   :  { %5276 = vsyncpa [#allocation12 + $0x1], 1 }
0x15a7   :  { %5277 = vsyncpa [#allocation7], 1 }
0x15a8   :  { %5279 = vsyncpa [#allocation7 + $0x1], 1 }

</bundles_post_ra>
